<compile_context>
chip_gen: v5e
topology: v5e:2x2
jax: 0.10.0
libtpu: 0.0.40
codegen_flags: <defaults>
</compile_context>

<pallas_src>
import jax
import jax.numpy as jnp
from jax.experimental import pallas as pl
from jax.experimental.pallas import tpu as pltpu


# ----------------------------- Pallas kernels --------------------------------

def _conv_bias_relu_pool_kernel(taps_ref, w_ref, b_ref, o_ref):
    """Fused 3x3 conv + 2x2 maxpool + bias + ReLU for one row tile.

    taps : (4, TM, 9*Cin) bf16  -- im2col patches, one slab per 2x2 pool tap
    w    : (9*Cin, Cout)   bf16
    b    : (1, Cout)       f32
    out  : (TM, Cout)      bf16
    maxpool(relu(conv+b)) == relu(max_taps(patches@W) + b)  (bias/ReLU commute).
    """
    t, tm, k = taps_ref.shape
    cout = w_ref.shape[1]
    # One merged MXU dot instead of 4 small ones (cuts fill latency, crucial
    # for conv1's K=9); the leading-dim reshapes are tile-aligned (TM % 8 == 0).
    p = taps_ref[...].reshape(t * tm, k)
    m = jnp.dot(p, w_ref[...], preferred_element_type=jnp.float32)
    m = m.reshape(t, tm, cout).max(axis=0)            # 2x2 maxpool on the VPU
    # f32 epilogue (v5e VPU has no bf16 path); cast only on the final store.
    o_ref[...] = jnp.maximum(m + b_ref[...], 0.0).astype(o_ref.dtype)


def _mlp_head_kernel(x_ref, w1_ref, b1_ref, w2_ref, b2_ref, o_ref):
    """Fused fc1(+bias+ReLU) and fc2(+bias); fc2 is lane-padded to 128."""
    h = jnp.dot(x_ref[...], w1_ref[...], preferred_element_type=jnp.float32)
    h = jnp.maximum(h + b1_ref[...], 0.0)
    y = jnp.dot(h.astype(w2_ref.dtype), w2_ref[...],
                preferred_element_type=jnp.float32)
    o_ref[...] = (y + b2_ref[...]).astype(o_ref.dtype)


# ----------------------------- Tiling helpers ---------------------------------

def _round_up(x, m):
    return (x + m - 1) // m * m


def _row_tile(nm, tm_max):
    """Row tile: multiple of 8, <= tm_max, and >=2 grid steps when possible
    (keeps both v7x TensorCores busy, bounds VMEM for any batch)."""
    half = _round_up((nm + 1) // 2, 8)
    return max(8, min(tm_max, half))


# ----------------------------- Wrappers ---------------------------------------

def _pool_tap_patches(x_nhwc):
    """im2col patches grouped by 2x2 pool tap, stacked into one array.

    Returns (4, N*Ho*Wo, 9*Cin) bf16; tap (r, c) covers input position
    (2*ho + r + kh - 1, 2*wo + c + kw - 1).  Row layout is (kh, kw, cin)-major,
    matching the weight reshape in prepare_params().
    XLA glue, done once per layer (in bf16 to halve the moved bytes).
    """
    N, H, W, Cin = x_nhwc.shape
    Ho, Wo = H // 2, W // 2
    xp = jnp.pad(x_nhwc, ((0, 0), (1, 1), (1, 1), (0, 0)))
    taps = []
    for r in range(2):
        for c in range(2):
            cols = []
            for kh in range(3):
                for kw in range(3):
                    cols.append(xp[:, r + kh: r + kh + 2 * Ho: 2,
                                      c + kw: c + kw + 2 * Wo: 2, :])
            p = jnp.stack(cols, axis=-2)                 # (N, Ho, Wo, 9, Cin)
            taps.append(p.reshape(N * Ho * Wo, 9 * Cin))
    return jnp.stack(taps, axis=0)                       # (4, N*M, 9*Cin)


def conv3x3_relu_pool(x_nhwc, w2d, bias, *, tm_max=1024):
    """3x3 conv (pad=1) + bias + ReLU + 2x2 maxpool.  Returns (N,Ho,Wo,Cout)."""
    N, H, W, Cin = x_nhwc.shape
    K, Cout = w2d.shape
    Ho, Wo = H // 2, W // 2
    NM = N * Ho * Wo

    taps = _pool_tap_patches(x_nhwc.astype(jnp.bfloat16))   # (4, NM, K)
    tm = _row_tile(NM, tm_max)
    g = pl.cdiv(NM, tm)
    NMp = g * tm
    if NMp != NM:
        taps = jnp.pad(taps, ((0, 0), (0, NMp - NM), (0, 0)))
    b2 = bias.reshape(1, Cout).astype(jnp.float32)

    out = pl.pallas_call(
        _conv_bias_relu_pool_kernel,
        grid=(g,),
        in_specs=[pl.BlockSpec((4, tm, K), lambda i: (0, i, 0)),
                  pl.BlockSpec((K, Cout), lambda i: (0, 0)),
                  pl.BlockSpec((1, Cout), lambda i: (0, 0))],
        out_specs=pl.BlockSpec((tm, Cout), lambda i: (i, 0)),
        out_shape=jax.ShapeDtypeStruct((NMp, Cout), jnp.bfloat16),
        compiler_params=pltpu.CompilerParams(
            dimension_semantics=("parallel",)),
    )(taps, w2d.astype(jnp.bfloat16), b2)
    return out[:NM].reshape(N, Ho, Wo, Cout)


def mlp_head(x2d, w1, b1, w2p, b2p, *, tb_max=512):
    """Fused fc1+ReLU+fc2 (fc2 padded to 128 outputs). x2d: (N, 64*7*7)."""
    N, K = x2d.shape
    H1 = w1.shape[1]
    H2 = w2p.shape[1]
    tb = _row_tile(N, tb_max)
    g = pl.cdiv(N, tb)
    Np = g * tb
    x = x2d.astype(jnp.bfloat16)
    if Np != N:                                    # pad instead of tb=N fallback
        x = jnp.pad(x, ((0, Np - N), (0, 0)))
    b1r = b1.reshape(1, H1).astype(jnp.float32)
    b2r = b2p.reshape(1, H2).astype(jnp.float32)

    out = pl.pallas_call(
        _mlp_head_kernel,
        grid=(g,),
        in_specs=[
            pl.BlockSpec((tb, K), lambda i: (i, 0)),
            pl.BlockSpec((K, H1), lambda i: (0, 0)),
            pl.BlockSpec((1, H1), lambda i: (0, 0)),
            pl.BlockSpec((H1, H2), lambda i: (0, 0)),
            pl.BlockSpec((1, H2), lambda i: (0, 0)),
        ],
        out_specs=pl.BlockSpec((tb, H2), lambda i: (i, 0)),
        out_shape=jax.ShapeDtypeStruct((Np, H2), jnp.float32),
        compiler_params=pltpu.CompilerParams(
            dimension_semantics=("parallel",)),
    )(x, w1.astype(jnp.bfloat16), b1r, w2p.astype(jnp.bfloat16), b2r)
    return out[:N]


# ----------------------------- Model forward ----------------------------------

def cnn_forward(x_nchw, kp):
    # NCHW -> NHWC; single cast to bf16 (MXU operand dtype).
    x = jnp.transpose(x_nchw, (0, 2, 3, 1)).astype(jnp.bfloat16)
    N, H, W, _ = x.shape
    y = conv3x3_relu_pool(x, kp["w1"], kp["b1"])          # (N, 14, 14, 32)
    y = conv3x3_relu_pool(y, kp["w2"], kp["b2"])          # (N, 7, 7, 64)
    feat = y.reshape(N, (H // 4) * (W // 4) * 64)   # NHWC flatten (wfc1 permuted)
    logits = mlp_head(feat, kp["wfc1"], kp["bfc1"], kp["wfc2"], kp["bfc2"])
    return logits[:, :10]                            # drop fc2 lane padding


# --------------------------- Parameter handling --------------------------------

def init_torch_params(key):
    """Random params in PyTorch layouts (Conv2d OIHW, Linear (out, in))."""
    ks = jax.random.split(key, 8)
    s = 0.05
    return {
        "conv1.weight": s * jax.random.normal(ks[0], (32, 1, 3, 3), jnp.float32),
        "conv1.bias":   s * jax.random.normal(ks[1], (32,), jnp.float32),
        "conv2.weight": s * jax.random.normal(ks[2], (64, 32, 3, 3), jnp.float32),
        "conv2.bias":   s * jax.random.normal(ks[3], (64,), jnp.float32),
        "fc1.weight":   s * jax.random.normal(ks[4], (128, 64 * 7 * 7), jnp.float32),
        "fc1.bias":     s * jax.random.normal(ks[5], (128,), jnp.float32),
        "fc2.weight":   s * jax.random.normal(ks[6], (10, 128), jnp.float32),
        "fc2.bias":     s * jax.random.normal(ks[7], (10,), jnp.float32),
    }


def prepare_params(tp):
    """One-time conversion from PyTorch layout to kernel layout (off hot path)."""
    def conv_w(w_oihw):
        cout, cin = w_oihw.shape[0], w_oihw.shape[1]
        # (cout, cin, kh, kw) -> rows ordered (kh, kw, cin), matching patches.
        return (jnp.transpose(w_oihw, (2, 3, 1, 0))
                .reshape(9 * cin, cout).astype(jnp.bfloat16))

    # fc1: torch flattens activations as (c, h, w); kernel features are
    # NHWC-flattened (h, w, c) -> permute wfc1's rows once instead of
    # transposing the activation every forward pass.
    w1 = (tp["fc1.weight"].reshape(128, 64, 7, 7)
          .transpose(2, 3, 1, 0).reshape(7 * 7 * 64, 128).astype(jnp.bfloat16))
    # fc2: pad output dim 10 -> 128 so stores are full 128-lane vregs.
    w2 = jnp.zeros((128, 128), jnp.float32).at[:, :10].set(tp["fc2.weight"].T)
    b2 = jnp.zeros((128,), jnp.float32).at[:10].set(tp["fc2.bias"])
    return {
        "w1": conv_w(tp["conv1.weight"]),
        "b1": tp["conv1.bias"].astype(jnp.float32),
        "w2": conv_w(tp["conv2.weight"]),
        "b2": tp["conv2.bias"].astype(jnp.float32),
        "wfc1": w1,
        "bfc1": tp["fc1.bias"].astype(jnp.float32),
        "wfc2": w2.astype(jnp.bfloat16),
        "bfc2": b2,
    }


if __name__ == "__main__":
    key = jax.random.PRNGKey(0)
    kx, kp = jax.random.split(key)
    params = prepare_params(init_torch_params(kp))
    # 28x28 input is implied by fc1's 64*7*7 fan-in (two 2x maxpools).
    x = jax.random.normal(kx, (2, 1, 28, 28), dtype=jnp.float32)

    out = jax.jit(cnn_forward)(x, params)
    out = jax.block_until_ready(out)

    assert out.shape == (2, 10), out.shape
    assert bool(jnp.all(jnp.isfinite(out)))
    print("KERNEL_OK")
</pallas_src>

<mosaic_0001>
module attributes {stable_mosaic.version = 11 : i64} {
  func.func @_conv_bias_relu_pool_kernel(%arg0: i32, %arg1: memref<4x200x9xbf16, #tpu.memory_space<vmem>>, %arg2: memref<9x32xbf16, #tpu.memory_space<vmem>>, %arg3: memref<1x32xf32, #tpu.memory_space<vmem>>, %arg4: memref<200x32xbf16, #tpu.memory_space<vmem>>) attributes {dimension_semantics = [#tpu.dimension_semantics<parallel>], iteration_bounds = array<i64: 2>, scalar_prefetch = 0 : i64, scratch_operands = 0 : i64, tpu.core_type = #tpu.core_type<tc>, window_params = [{transform_indices = @transform_0, window_bounds = array<i64: 4, 200, 9>}, {pipeline_mode = #tpu.pipeline_mode<synchronous>, transform_indices = @transform_1, window_bounds = array<i64: 9, 32>}, {pipeline_mode = #tpu.pipeline_mode<synchronous>, transform_indices = @transform_2, window_bounds = array<i64: 1, 32>}, {transform_indices = @transform_3, window_bounds = array<i64: 200, 32>}]} {
    %c0 = arith.constant 0 : index
    %c0_0 = arith.constant 0 : index
    %c0_1 = arith.constant 0 : index
    %0 = vector.load %arg1[%c0, %c0_0, %c0_1] : memref<4x200x9xbf16, #tpu.memory_space<vmem>>, vector<4x200x9xbf16>
    %1 = vector.shape_cast %0 : vector<4x200x9xbf16> to vector<800x9xbf16>
    %c0_2 = arith.constant 0 : index
    %c0_3 = arith.constant 0 : index
    %2 = vector.load %arg2[%c0_2, %c0_3] : memref<9x32xbf16, #tpu.memory_space<vmem>>, vector<9x32xbf16>
    %cst = arith.constant dense<0.000000e+00> : vector<800x32xf32>
    %3 = tpu.matmul %1, %2, %cst {dimension_numbers = #tpu.dot_dimension_numbers<[1], [0], [0], [1], [0, 0, 1, 1], [], []>} : vector<800x9xbf16>, vector<9x32xbf16>, vector<800x32xf32> -> vector<800x32xf32>
    %4 = vector.shape_cast %3 : vector<800x32xf32> to vector<4x200x32xf32>
    %cst_4 = arith.constant dense<0xFF800000> : vector<200x32xf32>
    %5 = vector.multi_reduction <maximumf>, %4, %cst_4 [0] : vector<4x200x32xf32> to vector<200x32xf32>
    %c0_5 = arith.constant 0 : index
    %c0_6 = arith.constant 0 : index
    %6 = vector.load %arg3[%c0_5, %c0_6] : memref<1x32xf32, #tpu.memory_space<vmem>>, vector<1x32xf32>
    %7 = vector.broadcast %6 : vector<1x32xf32> to vector<200x32xf32>
    %8 = arith.addf %5, %7 : vector<200x32xf32>
    %cst_7 = arith.constant 0.000000e+00 : f32
    %9 = vector.broadcast %cst_7 : f32 to vector<200x32xf32>
    %10 = arith.maximumf %8, %9 : vector<200x32xf32>
    %11 = arith.truncf %10 : vector<200x32xf32> to vector<200x32xbf16>
    %c0_8 = arith.constant 0 : index
    %c0_9 = arith.constant 0 : index
    %12 = vector.load %arg4[%c0_8, %c0_9] : memref<200x32xbf16, #tpu.memory_space<vmem>>, vector<200x32xbf16>
    tpu.vector_store %arg4[%c0_8, %c0_9], %11 {strides = array<i32>} : memref<200x32xbf16, #tpu.memory_space<vmem>>, vector<200x32xbf16>,
    return
  }
  func.func @transform_0(%arg0: i32) -> (i32, i32, i32) {
    %c0_i32 = arith.constant 0 : i32
    %c0_i32_0 = arith.constant 0 : i32
    %c0_i32_1 = arith.constant 0 : i32
    return %c0_i32, %arg0, %c0_i32_0 : i32, i32, i32
  }
  func.func @transform_1(%arg0: i32) -> (i32, i32) {
    %c0_i32 = arith.constant 0 : i32
    %c0_i32_0 = arith.constant 0 : i32
    %c0_i32_1 = arith.constant 0 : i32
    return %c0_i32, %c0_i32_0 : i32, i32
  }
  func.func @transform_2(%arg0: i32) -> (i32, i32) {
    %c0_i32 = arith.constant 0 : i32
    %c0_i32_0 = arith.constant 0 : i32
    %c0_i32_1 = arith.constant 0 : i32
    return %c0_i32, %c0_i32_0 : i32, i32
  }
  func.func @transform_3(%arg0: i32) -> (i32, i32) {
    %c0_i32 = arith.constant 0 : i32
    %c0_i32_0 = arith.constant 0 : i32
    return %arg0, %c0_i32 : i32, i32
  }
}

module attributes {stable_mosaic.version = 11 : i64} {
  func.func @_conv_bias_relu_pool_kernel(%arg0: i32, %arg1: memref<4x56x288xbf16, #tpu.memory_space<vmem>>, %arg2: memref<288x64xbf16, #tpu.memory_space<vmem>>, %arg3: memref<1x64xf32, #tpu.memory_space<vmem>>, %arg4: memref<56x64xbf16, #tpu.memory_space<vmem>>) attributes {dimension_semantics = [#tpu.dimension_semantics<parallel>], iteration_bounds = array<i64: 2>, scalar_prefetch = 0 : i64, scratch_operands = 0 : i64, tpu.core_type = #tpu.core_type<tc>, window_params = [{transform_indices = @transform_0, window_bounds = array<i64: 4, 56, 288>}, {pipeline_mode = #tpu.pipeline_mode<synchronous>, transform_indices = @transform_1, window_bounds = array<i64: 288, 64>}, {pipeline_mode = #tpu.pipeline_mode<synchronous>, transform_indices = @transform_2, window_bounds = array<i64: 1, 64>}, {transform_indices = @transform_3, window_bounds = array<i64: 56, 64>}]} {
    %c0 = arith.constant 0 : index
    %c0_0 = arith.constant 0 : index
    %c0_1 = arith.constant 0 : index
    %0 = vector.load %arg1[%c0, %c0_0, %c0_1] : memref<4x56x288xbf16, #tpu.memory_space<vmem>>, vector<4x56x288xbf16>
    %1 = vector.shape_cast %0 : vector<4x56x288xbf16> to vector<224x288xbf16>
    %c0_2 = arith.constant 0 : index
    %c0_3 = arith.constant 0 : index
    %2 = vector.load %arg2[%c0_2, %c0_3] : memref<288x64xbf16, #tpu.memory_space<vmem>>, vector<288x64xbf16>
    %cst = arith.constant dense<0.000000e+00> : vector<224x64xf32>
    %3 = tpu.matmul %1, %2, %cst {dimension_numbers = #tpu.dot_dimension_numbers<[1], [0], [0], [1], [0, 0, 1, 1], [], []>} : vector<224x288xbf16>, vector<288x64xbf16>, vector<224x64xf32> -> vector<224x64xf32>
    %4 = vector.shape_cast %3 : vector<224x64xf32> to vector<4x56x64xf32>
    %cst_4 = arith.constant dense<0xFF800000> : vector<56x64xf32>
    %5 = vector.multi_reduction <maximumf>, %4, %cst_4 [0] : vector<4x56x64xf32> to vector<56x64xf32>
    %c0_5 = arith.constant 0 : index
    %c0_6 = arith.constant 0 : index
    %6 = vector.load %arg3[%c0_5, %c0_6] : memref<1x64xf32, #tpu.memory_space<vmem>>, vector<1x64xf32>
    %7 = vector.broadcast %6 : vector<1x64xf32> to vector<56x64xf32>
    %8 = arith.addf %5, %7 : vector<56x64xf32>
    %cst_7 = arith.constant 0.000000e+00 : f32
    %9 = vector.broadcast %cst_7 : f32 to vector<56x64xf32>
    %10 = arith.maximumf %8, %9 : vector<56x64xf32>
    %11 = arith.truncf %10 : vector<56x64xf32> to vector<56x64xbf16>
    %c0_8 = arith.constant 0 : index
    %c0_9 = arith.constant 0 : index
    %12 = vector.load %arg4[%c0_8, %c0_9] : memref<56x64xbf16, #tpu.memory_space<vmem>>, vector<56x64xbf16>
    tpu.vector_store %arg4[%c0_8, %c0_9], %11 {strides = array<i32>} : memref<56x64xbf16, #tpu.memory_space<vmem>>, vector<56x64xbf16>,
    return
  }
  func.func @transform_0(%arg0: i32) -> (i32, i32, i32) {
    %c0_i32 = arith.constant 0 : i32
    %c0_i32_0 = arith.constant 0 : i32
    %c0_i32_1 = arith.constant 0 : i32
    return %c0_i32, %arg0, %c0_i32_0 : i32, i32, i32
  }
  func.func @transform_1(%arg0: i32) -> (i32, i32) {
    %c0_i32 = arith.constant 0 : i32
    %c0_i32_0 = arith.constant 0 : i32
    %c0_i32_1 = arith.constant 0 : i32
    return %c0_i32, %c0_i32_0 : i32, i32
  }
  func.func @transform_2(%arg0: i32) -> (i32, i32) {
    %c0_i32 = arith.constant 0 : i32
    %c0_i32_0 = arith.constant 0 : i32
    %c0_i32_1 = arith.constant 0 : i32
    return %c0_i32, %c0_i32_0 : i32, i32
  }
  func.func @transform_3(%arg0: i32) -> (i32, i32) {
    %c0_i32 = arith.constant 0 : i32
    %c0_i32_0 = arith.constant 0 : i32
    return %arg0, %c0_i32 : i32, i32
  }
}

module attributes {stable_mosaic.version = 11 : i64} {
  func.func @_mlp_head_kernel(%arg0: i32, %arg1: memref<8x3136xbf16, #tpu.memory_space<vmem>>, %arg2: memref<3136x128xbf16, #tpu.memory_space<vmem>>, %arg3: memref<1x128xf32, #tpu.memory_space<vmem>>, %arg4: memref<128x128xbf16, #tpu.memory_space<vmem>>, %arg5: memref<1x128xf32, #tpu.memory_space<vmem>>, %arg6: memref<8x128xf32, #tpu.memory_space<vmem>>) attributes {dimension_semantics = [#tpu.dimension_semantics<parallel>], iteration_bounds = array<i64: 1>, scalar_prefetch = 0 : i64, scratch_operands = 0 : i64, tpu.core_type = #tpu.core_type<tc>, window_params = [{transform_indices = @transform_0, window_bounds = array<i64: 8, 3136>}, {pipeline_mode = #tpu.pipeline_mode<synchronous>, transform_indices = @transform_1, window_bounds = array<i64: 3136, 128>}, {pipeline_mode = #tpu.pipeline_mode<synchronous>, transform_indices = @transform_2, window_bounds = array<i64: 1, 128>}, {pipeline_mode = #tpu.pipeline_mode<synchronous>, transform_indices = @transform_3, window_bounds = array<i64: 128, 128>}, {pipeline_mode = #tpu.pipeline_mode<synchronous>, transform_indices = @transform_4, window_bounds = array<i64: 1, 128>}, {transform_indices = @transform_5, window_bounds = array<i64: 8, 128>}]} {
    %c0 = arith.constant 0 : index
    %c0_0 = arith.constant 0 : index
    %0 = vector.load %arg1[%c0, %c0_0] : memref<8x3136xbf16, #tpu.memory_space<vmem>>, vector<8x3136xbf16>
    %c0_1 = arith.constant 0 : index
    %c0_2 = arith.constant 0 : index
    %1 = vector.load %arg2[%c0_1, %c0_2] : memref<3136x128xbf16, #tpu.memory_space<vmem>>, vector<3136x128xbf16>
    %cst = arith.constant dense<0.000000e+00> : vector<8x128xf32>
    %2 = tpu.matmul %0, %1, %cst {dimension_numbers = #tpu.dot_dimension_numbers<[1], [0], [0], [1], [0, 0, 1, 1], [], []>} : vector<8x3136xbf16>, vector<3136x128xbf16>, vector<8x128xf32> -> vector<8x128xf32>
    %c0_3 = arith.constant 0 : index
    %c0_4 = arith.constant 0 : index
    %3 = vector.load %arg3[%c0_3, %c0_4] : memref<1x128xf32, #tpu.memory_space<vmem>>, vector<1x128xf32>
    %4 = vector.broadcast %3 : vector<1x128xf32> to vector<8x128xf32>
    %5 = arith.addf %2, %4 : vector<8x128xf32>
    %cst_5 = arith.constant 0.000000e+00 : f32
    %6 = vector.broadcast %cst_5 : f32 to vector<8x128xf32>
    %7 = arith.maximumf %5, %6 : vector<8x128xf32>
    %8 = arith.truncf %7 : vector<8x128xf32> to vector<8x128xbf16>
    %c0_6 = arith.constant 0 : index
    %c0_7 = arith.constant 0 : index
    %9 = vector.load %arg4[%c0_6, %c0_7] : memref<128x128xbf16, #tpu.memory_space<vmem>>, vector<128x128xbf16>
    %cst_8 = arith.constant dense<0.000000e+00> : vector<8x128xf32>
    %10 = tpu.matmul %8, %9, %cst_8 {dimension_numbers = #tpu.dot_dimension_numbers<[1], [0], [0], [1], [0, 0, 1, 1], [], []>} : vector<8x128xbf16>, vector<128x128xbf16>, vector<8x128xf32> -> vector<8x128xf32>
    %c0_9 = arith.constant 0 : index
    %c0_10 = arith.constant 0 : index
    %11 = vector.load %arg5[%c0_9, %c0_10] : memref<1x128xf32, #tpu.memory_space<vmem>>, vector<1x128xf32>
    %12 = vector.broadcast %11 : vector<1x128xf32> to vector<8x128xf32>
    %13 = arith.addf %10, %12 : vector<8x128xf32>
    %c0_11 = arith.constant 0 : index
    %c0_12 = arith.constant 0 : index
    %14 = vector.load %arg6[%c0_11, %c0_12] : memref<8x128xf32, #tpu.memory_space<vmem>>, vector<8x128xf32>
    tpu.vector_store %arg6[%c0_11, %c0_12], %13 {strides = array<i32>} : memref<8x128xf32, #tpu.memory_space<vmem>>, vector<8x128xf32>,
    return
  }
  func.func @transform_0(%arg0: i32) -> (i32, i32) {
    %c0_i32 = arith.constant 0 : i32
    %c0_i32_0 = arith.constant 0 : i32
    return %arg0, %c0_i32 : i32, i32
  }
  func.func @transform_1(%arg0: i32) -> (i32, i32) {
    %c0_i32 = arith.constant 0 : i32
    %c0_i32_0 = arith.constant 0 : i32
    %c0_i32_1 = arith.constant 0 : i32
    return %c0_i32, %c0_i32_0 : i32, i32
  }
  func.func @transform_2(%arg0: i32) -> (i32, i32) {
    %c0_i32 = arith.constant 0 : i32
    %c0_i32_0 = arith.constant 0 : i32
    %c0_i32_1 = arith.constant 0 : i32
    return %c0_i32, %c0_i32_0 : i32, i32
  }
  func.func @transform_3(%arg0: i32) -> (i32, i32) {
    %c0_i32 = arith.constant 0 : i32
    %c0_i32_0 = arith.constant 0 : i32
    %c0_i32_1 = arith.constant 0 : i32
    return %c0_i32, %c0_i32_0 : i32, i32
  }
  func.func @transform_4(%arg0: i32) -> (i32, i32) {
    %c0_i32 = arith.constant 0 : i32
    %c0_i32_0 = arith.constant 0 : i32
    %c0_i32_1 = arith.constant 0 : i32
    return %c0_i32, %c0_i32_0 : i32, i32
  }
  func.func @transform_5(%arg0: i32) -> (i32, i32) {
    %c0_i32 = arith.constant 0 : i32
    %c0_i32_0 = arith.constant 0 : i32
    return %arg0, %c0_i32 : i32, i32
  }
}

</mosaic_0001>

<bundles_post_ra>
// kernel: cnn_forward.3
= control target key start
LH: loop header
LB: loop body
LE: loop exit
PB: predicated region body
PF: predicated region fallthrough
CT: control target
= control target key end

     0   :  { %s2122_s12 = smov 0   ;;  %s2124_s13 = smov 0   ;;  %s2587_s0 = inlined_call_operand.vmem [shape: bf16[4,400,9], index: 0, kind: input, shape index: {}]   ;;  %s2588_s1 = inlined_call_operand.vmem [shape: bf16[9,32], index: 1, kind: input, shape index: {}]   ;;  %s2589_s2 = inlined_call_operand.vmem [shape: f32[1,32], index: 2, kind: input, shape index: {}]   ;;  %s2590_s3 = inlined_call_operand.vmem [shape: bf16[400,32], index: 3, kind: output, shape index: {}]  }
   0x1   :  { %s2126_s14 = smov 0  }
   0x2 LB: > { %s1731_s15 = sadd.s32 4294967295, %s2099_s14   ;;  %s2139_s16 = sadd.s32 1, %s2099_s14   ;;  %s2099_s14 = sphi %s2126_s14, %s2593_s14   ;;  %s2095_s13 = sphi %s2124_s13, %s2592_s13   ;;  %s2091_s12 = sphi %s2122_s12, %s2591_s12  }
   0x3   : > { %s17_s17 = ssub.s32 %s2099_s14, %s2139_s16  ;;  %s20_s18 = sadd.s32 1, %s2095_s13 }
   0x4   : > { %p18_p0 = scmp.eq.s32.totalorder %s17_s17, 0  ;;  %p27_p1 = scmp.ne.s32.totalorder %s2095_s13, %s2091_s12 }
   0x5   : > { %p28_p2 = scmp.eq.s32.totalorder %s2099_s14, 0  ;;  %p1734_p4 = scmp.ge.s32.totalorder %s2099_s14, 2 }
   0x6   : > { %s2148_s19 = scalar_select %p18_p0, %s2095_s13, %s20_s18  }
   0x7   : > { %p29_p3 = por %p28_p2, %p27_p1  ;;  %127 = sbr.rel (%p1734_p4) target bundleno = 69 (0x45), region = 24 }
   0xc   : > { %130 = sbr.rel (!%p29_p3) target bundleno = 69 (0x45), region = 28  ;;  %s132_s20 = sand.u32 (%p29_p3), 1, %s2095_s13  }
   0xd   : > { %s1994_s21 = smul.u32 (%p29_p3), 100, %s2099_s14 }
   0xe   : > { %s2049_s22 = smul.u32 (%p29_p3), 400, %s132_s20 }
   0xf   : > { %s2156_s25 = scalar_lea.vmem (%p29_p3), %s2587_s0, %s1994_s21 }
  0x10   : > { %v154_v0 = vld [vmem:[%s2156_s25] sm:$0xff] (%p29_p3)   ;;  %v158_v1 = vld [vmem:[%s2156_s25 + $0x8] sm:$0xff] (%p29_p3)   ;;  %v162_v2 = vld [vmem:[%s2156_s25 + $0x10] sm:$0xff] (%p29_p3)   ;;  %s2161_s26 = scalar_lea.vmem (%p29_p3), [#allocation2], %s2049_s22 }
  0x11   : > { %155 = vst [vmem:[%s2161_s26] sm:$0xff] %v154_v0   ;;  %v166_v3 = vld [vmem:[%s2156_s25 + $0x18] sm:$0xff]   ;;  %v170_v4 = vld [vmem:[%s2156_s25 + $0x20] sm:$0xff]   ;;  %v174_v5 = vld [vmem:[%s2156_s25 + $0x28] sm:$0xff]  }
  0x12   : > { %159 = vst [vmem:[%s2161_s26 + $0x8] sm:$0xff] %v158_v1   ;;  %v178_v6 = vld [vmem:[%s2156_s25 + $0x30] sm:$0xff]   ;;  %v182_v7 = vld [vmem:[%s2156_s25 + $0x38] sm:$0xff]   ;;  %v186_v8 = vld [vmem:[%s2156_s25 + $0x40] sm:$0xff]  }
  0x13   : > { %163 = vst [vmem:[%s2161_s26 + $0x10] sm:$0xff] %v162_v2   ;;  %v190_v9 = vld [vmem:[%s2156_s25 + $0x48] sm:$0xff]   ;;  %v194_v10 = vld [vmem:[%s2156_s25 + $0x50] sm:$0xff]   ;;  %v198_v11 = vld [vmem:[%s2156_s25 + $0x58] sm:$0xff]  }
  0x14   : > { %167 = vst [vmem:[%s2161_s26 + $0x18] sm:$0xff] %v166_v3   ;;  %v202_v12 = vld [vmem:[%s2156_s25 + $0x60] sm:$0xf]  ;;  %v204_v13 = vld [vmem:[%s2156_s25 + $0xc8] sm:$0xff]   ;;  %v208_v14 = vld [vmem:[%s2156_s25 + $0xd0] sm:$0xff]  }
  0x15   : > { %171 = vst [vmem:[%s2161_s26 + $0x20] sm:$0xff] %v170_v4   ;;  %v212_v15 = vld [vmem:[%s2156_s25 + $0xd8] sm:$0xff]   ;;  %v216_v16 = vld [vmem:[%s2156_s25 + $0xe0] sm:$0xff]   ;;  %v220_v17 = vld [vmem:[%s2156_s25 + $0xe8] sm:$0xff]  }
  0x16   : > { %175 = vst [vmem:[%s2161_s26 + $0x28] sm:$0xff] %v174_v5   ;;  %v224_v18 = vld [vmem:[%s2156_s25 + $0xf0] sm:$0xff]   ;;  %v228_v19 = vld [vmem:[%s2156_s25 + $0xf8] sm:$0xff]   ;;  %v232_v20 = vld [vmem:[%s2156_s25 + $0x100] sm:$0xff]  }
  0x17   : > { %179 = vst [vmem:[%s2161_s26 + $0x30] sm:$0xff] %v178_v6   ;;  %v236_v21 = vld [vmem:[%s2156_s25 + $0x108] sm:$0xff]   ;;  %v240_v22 = vld [vmem:[%s2156_s25 + $0x110] sm:$0xff]   ;;  %v244_v23 = vld [vmem:[%s2156_s25 + $0x118] sm:$0xff]  }
  0x18   : > { %183 = vst [vmem:[%s2161_s26 + $0x38] sm:$0xff] %v182_v7   ;;  %v248_v24 = vld [vmem:[%s2156_s25 + $0x120] sm:$0xff]   ;;  %v252_v25 = vld [vmem:[%s2156_s25 + $0x128] sm:$0xf]  ;;  %v254_v26 = vld [vmem:[%s2156_s25 + $0x190] sm:$0xff]  }
  0x19   : > { %187 = vst [vmem:[%s2161_s26 + $0x40] sm:$0xff] %v186_v8   ;;  %v258_v27 = vld [vmem:[%s2156_s25 + $0x198] sm:$0xff]   ;;  %v262_v28 = vld [vmem:[%s2156_s25 + $0x1a0] sm:$0xff]   ;;  %v266_v29 = vld [vmem:[%s2156_s25 + $0x1a8] sm:$0xff]  }
  0x1a   : > { %191 = vst [vmem:[%s2161_s26 + $0x48] sm:$0xff] %v190_v9   ;;  %v270_v30 = vld [vmem:[%s2156_s25 + $0x1b0] sm:$0xff]   ;;  %v274_v31 = vld [vmem:[%s2156_s25 + $0x1b8] sm:$0xff]   ;;  %v278_v32 = vld [vmem:[%s2156_s25 + $0x1c0] sm:$0xff]  }
  0x1b   : > { %195 = vst [vmem:[%s2161_s26 + $0x50] sm:$0xff] %v194_v10   ;;  %v282_v33 = vld [vmem:[%s2156_s25 + $0x1c8] sm:$0xff]   ;;  %v286_v34 = vld [vmem:[%s2156_s25 + $0x1d0] sm:$0xff]   ;;  %v290_v35 = vld [vmem:[%s2156_s25 + $0x1d8] sm:$0xff]  }
  0x1c   : > { %199 = vst [vmem:[%s2161_s26 + $0x58] sm:$0xff] %v198_v11   ;;  %v294_v36 = vld [vmem:[%s2156_s25 + $0x1e0] sm:$0xff]   ;;  %v298_v37 = vld [vmem:[%s2156_s25 + $0x1e8] sm:$0xff]   ;;  %v302_v38 = vld [vmem:[%s2156_s25 + $0x1f0] sm:$0xf] }
  0x1d   : > { %203 = vst [vmem:[%s2161_s26 + $0x60] sm:$0xf] %v202_v12  ;;  %v304_v39 = vld [vmem:[%s2156_s25 + $0x258] sm:$0xff]   ;;  %v308_v40 = vld [vmem:[%s2156_s25 + $0x260] sm:$0xff]   ;;  %v312_v41 = vld [vmem:[%s2156_s25 + $0x268] sm:$0xff]  }
  0x1e   : > { %205 = vst [vmem:[%s2161_s26 + $0x64] sm:$0xff] %v204_v13   ;;  %v316_v42 = vld [vmem:[%s2156_s25 + $0x270] sm:$0xff]   ;;  %v320_v43 = vld [vmem:[%s2156_s25 + $0x278] sm:$0xff]   ;;  %v324_v44 = vld [vmem:[%s2156_s25 + $0x280] sm:$0xff]  }
  0x1f   : > { %209 = vst [vmem:[%s2161_s26 + $0x6c] sm:$0xff] %v208_v14   ;;  %v328_v45 = vld [vmem:[%s2156_s25 + $0x288] sm:$0xff]   ;;  %v332_v46 = vld [vmem:[%s2156_s25 + $0x290] sm:$0xff]   ;;  %v336_v47 = vld [vmem:[%s2156_s25 + $0x298] sm:$0xff]  }
  0x20   : > { %213 = vst [vmem:[%s2161_s26 + $0x74] sm:$0xff] %v212_v15   ;;  %v340_v48 = vld [vmem:[%s2156_s25 + $0x2a0] sm:$0xff]   ;;  %v344_v49 = vld [vmem:[%s2156_s25 + $0x2a8] sm:$0xff]   ;;  %v348_v50 = vld [vmem:[%s2156_s25 + $0x2b0] sm:$0xff]  }
  0x21   : > { %217 = vst [vmem:[%s2161_s26 + $0x7c] sm:$0xff] %v216_v16   ;;  %v352_v51 = vld [vmem:[%s2156_s25 + $0x2b8] sm:$0xf] }
  0x22   : > { %221 = vst [vmem:[%s2161_s26 + $0x84] sm:$0xff] %v220_v17  }
  0x23   : > { %225 = vst [vmem:[%s2161_s26 + $0x8c] sm:$0xff] %v224_v18  }
  0x24   : > { %229 = vst [vmem:[%s2161_s26 + $0x94] sm:$0xff] %v228_v19  }
  0x25   : > { %233 = vst [vmem:[%s2161_s26 + $0x9c] sm:$0xff] %v232_v20  }
  0x26   : > { %237 = vst [vmem:[%s2161_s26 + $0xa4] sm:$0xff] %v236_v21  }
  0x27   : > { %241 = vst [vmem:[%s2161_s26 + $0xac] sm:$0xff] %v240_v22  }
  0x28   : > { %245 = vst [vmem:[%s2161_s26 + $0xb4] sm:$0xff] %v244_v23  }
  0x29   : > { %249 = vst [vmem:[%s2161_s26 + $0xbc] sm:$0xff] %v248_v24  }
  0x2a   : > { %253 = vst [vmem:[%s2161_s26 + $0xc4] sm:$0xf] %v252_v25 }
  0x2b   : > { %255 = vst [vmem:[%s2161_s26 + $0xc8] sm:$0xff] %v254_v26  }
  0x2c   : > { %259 = vst [vmem:[%s2161_s26 + $0xd0] sm:$0xff] %v258_v27  }
  0x2d   : > { %263 = vst [vmem:[%s2161_s26 + $0xd8] sm:$0xff] %v262_v28  }
  0x2e   : > { %267 = vst [vmem:[%s2161_s26 + $0xe0] sm:$0xff] %v266_v29  }
  0x2f   : > { %271 = vst [vmem:[%s2161_s26 + $0xe8] sm:$0xff] %v270_v30  }
  0x30   : > { %275 = vst [vmem:[%s2161_s26 + $0xf0] sm:$0xff] %v274_v31  }
  0x31   : > { %279 = vst [vmem:[%s2161_s26 + $0xf8] sm:$0xff] %v278_v32  }
  0x32   : > { %283 = vst [vmem:[%s2161_s26 + $0x100] sm:$0xff] %v282_v33  }
  0x33   : > { %287 = vst [vmem:[%s2161_s26 + $0x108] sm:$0xff] %v286_v34  }
  0x34   : > { %291 = vst [vmem:[%s2161_s26 + $0x110] sm:$0xff] %v290_v35  }
  0x35   : > { %295 = vst [vmem:[%s2161_s26 + $0x118] sm:$0xff] %v294_v36  }
  0x36   : > { %299 = vst [vmem:[%s2161_s26 + $0x120] sm:$0xff] %v298_v37  }
  0x37   : > { %303 = vst [vmem:[%s2161_s26 + $0x128] sm:$0xf] %v302_v38 }
  0x38   : > { %305 = vst [vmem:[%s2161_s26 + $0x12c] sm:$0xff] %v304_v39  }
  0x39   : > { %309 = vst [vmem:[%s2161_s26 + $0x134] sm:$0xff] %v308_v40  }
  0x3a   : > { %313 = vst [vmem:[%s2161_s26 + $0x13c] sm:$0xff] %v312_v41  }
  0x3b   : > { %317 = vst [vmem:[%s2161_s26 + $0x144] sm:$0xff] %v316_v42  }
  0x3c   : > { %321 = vst [vmem:[%s2161_s26 + $0x14c] sm:$0xff] %v320_v43  }
  0x3d   : > { %325 = vst [vmem:[%s2161_s26 + $0x154] sm:$0xff] %v324_v44  }
  0x3e   : > { %329 = vst [vmem:[%s2161_s26 + $0x15c] sm:$0xff] %v328_v45  }
  0x3f   : > { %333 = vst [vmem:[%s2161_s26 + $0x164] sm:$0xff] %v332_v46  }
  0x40   : > { %337 = vst [vmem:[%s2161_s26 + $0x16c] sm:$0xff] %v336_v47  }
  0x41   : > { %341 = vst [vmem:[%s2161_s26 + $0x174] sm:$0xff] %v340_v48  }
  0x42   : > { %345 = vst [vmem:[%s2161_s26 + $0x17c] sm:$0xff] %v344_v49  }
  0x43   : > { %349 = vst [vmem:[%s2161_s26 + $0x184] sm:$0xff] %v348_v50  }
  0x44   : > { %353 = vst [vmem:[%s2161_s26 + $0x18c] sm:$0xf] %v352_v51 }
  0x45 PF: > { %p1736_p5 = scmp.ge.s32.totalorder %s2099_s14, 1  ;;  %p576_p6 = scmp.lt.s32.totalorder %s2099_s14, 3 }
  0x47   : > { %p577_p7 = pnand %p1736_p5, %p576_p6 }
  0x48   : > { %s583_s4 = sand.u32 (!%p577_p7), 1, %s2091_s12   ;;  %s607_s7 = smul.u32 (!%p577_p7), 25, %s1731_s15 }
  0x49   : > { %580 = sbr.rel (%p577_p7) target bundleno = 430 (0x1ae), region = 69 }
  0x4a   : > { %s2050_s5 = smul.u32 (!%p577_p7), 400, %s583_s4  ;;  %p608_p8 = scmp.lt.s32.totalorder (!%p577_p7), %s607_s7, 49 }
  0x4c   : > { %s2273_s6 = scalar_lea.vmem (!%p577_p7), [#allocation2], %s2050_s5 }
  0x4e   : > { %v1940_v52 = vld [vmem:[%s2588_s1] sm:$0xf]  ;;  %v2045_v53 = vld [vmem:[%s2588_s1] sm:$0x10]  ;;  %vm1122_vm0 = vcmask 1043456   ;;  %vm1123_vm1 = vcmask 1044480  }
  0x4f   : > { %v1941_v54 = vor.u32 %v2045_v53, %v1940_v52  ;;  %v2101_v55 = vmov 65535   ;;  %v1995_v59 = vld [vmem:[%s2273_s6] sm:$0xff]  ;;  %v2008_v60 = vld [vmem:[%s2273_s6 + $0x68] sm:$0xff]  ;;  %vm971_vm2 = vcmask 72704   ;;  %v2021_v61 = vld [vmem:[%s2273_s6 + $0xd0] sm:$0xff]  ;;  %vm1388_vm3 = vcmask 261120  }
  0x50   : > { %v1124_v56 = vsel %vm1122_vm0, 4294967295, %v2101_v55  ;;  %v2034_v62 = vld [vmem:[%s2273_s6 + $0x138] sm:$0xff]  ;;  %v1996_v63 = vld [vmem:[%s2273_s6 + $0x8] sm:$0xff]  ;;  %v2009_v0 = vld [vmem:[%s2273_s6 + $0x70] sm:$0xff]  ;;  %s2595_s7 = smov (!%p608_p8, %s607_s7), 49  ;;  %vm1643_vm4 = vcmask 257024  }
  0x51   : > { %v1125_v57 = vsel %vm1123_vm1, %v1124_v56, 0  ;;  %v2022_v1 = vld [vmem:[%s2273_s6 + $0xd8] sm:$0xff]  ;;  %v2035_v2 = vld [vmem:[%s2273_s6 + $0x140] sm:$0xff]  ;;  %v1997_v3 = vld [vmem:[%s2273_s6 + $0x10] sm:$0xff]  ;;  %s1737_s10 = sshll.u32 %s2595_s7, 2 }
  0x52   : > { %v1127_v58 = vand.u32 %v1941_v54, %v1125_v57  ;;  %v2010_v4 = vld [vmem:[%s2273_s6 + $0x78] sm:$0xff]  ;;  %v2023_v5 = vld [vmem:[%s2273_s6 + $0xe0] sm:$0xff]  ;;  %v2036_v6 = vld [vmem:[%s2273_s6 + $0x148] sm:$0xff]  ;;  %s2392_s14 = scalar_lea.vmem %s2590_s3, %s1737_s10 }
  0x53   : > { %v1998_v7 = vld [vmem:[%s2273_s6 + $0x18] sm:$0xff]  ;;  %v2011_v8 = vld [vmem:[%s2273_s6 + $0x80] sm:$0xff]  ;;  %v2024_v9 = vld [vmem:[%s2273_s6 + $0xe8] sm:$0xff] }
  0x54   : > { %1136 = vmatpush.bf16.msra.mxu0 %v1127_v58  ;;  %2046 = vmatpush.bf16.msra.mxu1 %v1127_v58  ;;  %v2037_v10 = vld [vmem:[%s2273_s6 + $0x150] sm:$0xff]  ;;  %v1999_v11 = vld [vmem:[%s2273_s6 + $0x20] sm:$0xff]  ;;  %v2012_v12 = vld [vmem:[%s2273_s6 + $0x88] sm:$0xff] }
  0x55   : > { %2047 = vmatpush.bf16.msra.mxu2 %v1127_v58  ;;  %2048 = vmatpush.bf16.msra.mxu3 %v1127_v58  ;;  %v2025_v13 = vld [vmem:[%s2273_s6 + $0xf0] sm:$0xff]  ;;  %v2038_v14 = vld [vmem:[%s2273_s6 + $0x158] sm:$0xff]  ;;  %v2000_v15 = vld [vmem:[%s2273_s6 + $0x28] sm:$0xff] }
  0x56   : > { %v2013_v16 = vld [vmem:[%s2273_s6 + $0x90] sm:$0xff]  ;;  %v2026_v17 = vld [vmem:[%s2273_s6 + $0xf8] sm:$0xff]  ;;  %v2039_v18 = vld [vmem:[%s2273_s6 + $0x160] sm:$0xff] }
  0x57   : > { %1942 = vmatmul.msk.bf16.vlgmr.msra.gmra.mxu0 %vm971_vm2, %v1995_v59  ;;  %1955 = vmatmul.msk.bf16.vlgmr.msra.gmra.mxu1 %vm971_vm2, %v2008_v60  ;;  %v2001_v19 = vld [vmem:[%s2273_s6 + $0x30] sm:$0xff]  ;;  %v2014_v20 = vld [vmem:[%s2273_s6 + $0x98] sm:$0xff]  ;;  %v2027_v21 = vld [vmem:[%s2273_s6 + $0x100] sm:$0xff] }
  0x58   : > { %1968 = vmatmul.msk.bf16.vlgmr.msra.gmra.mxu2 %vm971_vm2, %v2021_v61  ;;  %1981 = vmatmul.msk.bf16.vlgmr.msra.gmra.mxu3 %vm971_vm2, %v2034_v62  ;;  %v2040_v22 = vld [vmem:[%s2273_s6 + $0x168] sm:$0xff]  ;;  %v2002_v23 = vld [vmem:[%s2273_s6 + $0x38] sm:$0xff]  ;;  %v2015_v24 = vld [vmem:[%s2273_s6 + $0xa0] sm:$0xff] }
  0x59   : > { %v2028_v25 = vld [vmem:[%s2273_s6 + $0x108] sm:$0xff]  ;;  %v2041_v26 = vld [vmem:[%s2273_s6 + $0x170] sm:$0xff]  ;;  %v2003_v27 = vld [vmem:[%s2273_s6 + $0x40] sm:$0xff] }
  0x5a   : > { %v2016_v28 = vld [vmem:[%s2273_s6 + $0xa8] sm:$0xff]  ;;  %v2029_v31 = vld [vmem:[%s2273_s6 + $0x110] sm:$0xff]  ;;  %v2042_v32 = vld [vmem:[%s2273_s6 + $0x178] sm:$0xff] }
  0x5b   : > { %v2004_v41 = vld [vmem:[%s2273_s6 + $0x48] sm:$0xff]  ;;  %v2017_v42 = vld [vmem:[%s2273_s6 + $0xb0] sm:$0xff]  ;;  %v2030_v46 = vld [vmem:[%s2273_s6 + $0x118] sm:$0xff] }
  0x5c   : > { %v2043_v47 = vld [vmem:[%s2273_s6 + $0x180] sm:$0xff] }
  0x67   : > { %1943 = vmatmul.msk.bf16.gmra.mxu0 %vm971_vm2, %v1996_v63  ;;  %1956 = vmatmul.msk.bf16.gmra.mxu1 %vm971_vm2, %v2009_v0  ;;  %v2379_v63 = vld [vmem:[%s2589_s2] ss:$0 sm:$0xff] }
  0x68   : > { %1969 = vmatmul.msk.bf16.gmra.mxu2 %vm971_vm2, %v2022_v1  ;;  %1982 = vmatmul.msk.bf16.gmra.mxu3 %vm971_vm2, %v2035_v2  ;;  %v2005_v2 = vld [vmem:[%s2273_s6 + $0x50] sm:$0xff] }
  0x77   : > { %1944 = vmatmul.msk.bf16.gmra.mxu0 %vm971_vm2, %v1997_v3  ;;  %1957 = vmatmul.msk.bf16.gmra.mxu1 %vm971_vm2, %v2010_v4  ;;  %v2018_v3 = vld [vmem:[%s2273_s6 + $0xb8] sm:$0xff] }
  0x78   : > { %1970 = vmatmul.msk.bf16.gmra.mxu2 %vm971_vm2, %v2023_v5  ;;  %1983 = vmatmul.msk.bf16.gmra.mxu3 %vm971_vm2, %v2036_v6 }
  0x87   : > { %1945 = vmatmul.msk.bf16.gmra.mxu0 %vm971_vm2, %v1998_v7  ;;  %1958 = vmatmul.msk.bf16.gmra.mxu1 %vm971_vm2, %v2011_v8  ;;  %v2031_v8 = vld [vmem:[%s2273_s6 + $0x120] sm:$0xff] }
  0x88   : > { %1971 = vmatmul.msk.bf16.gmra.mxu2 %vm971_vm2, %v2024_v9  ;;  %1984 = vmatmul.msk.bf16.gmra.mxu3 %vm971_vm2, %v2037_v10  ;;  %v2044_v9 = vld [vmem:[%s2273_s6 + $0x188] sm:$0xff] }
  0x97   : > { %1946 = vmatmul.msk.bf16.gmra.mxu0 %vm971_vm2, %v1999_v11  ;;  %1959 = vmatmul.msk.bf16.gmra.mxu1 %vm971_vm2, %v2012_v12 }
  0x98   : > { %1972 = vmatmul.msk.bf16.gmra.mxu2 %vm971_vm2, %v2025_v13  ;;  %1985 = vmatmul.msk.bf16.gmra.mxu3 %vm971_vm2, %v2038_v14 }
  0xa7   : > { %1947 = vmatmul.msk.bf16.gmra.mxu0 %vm971_vm2, %v2000_v15  ;;  %1960 = vmatmul.msk.bf16.gmra.mxu1 %vm971_vm2, %v2013_v16 }
  0xa8   : > { %1973 = vmatmul.msk.bf16.gmra.mxu2 %vm971_vm2, %v2026_v17  ;;  %1986 = vmatmul.msk.bf16.gmra.mxu3 %vm971_vm2, %v2039_v18 }
  0xb7   : > { %1948 = vmatmul.msk.bf16.gmra.mxu0 %vm971_vm2, %v2001_v19  ;;  %1961 = vmatmul.msk.bf16.gmra.mxu1 %vm971_vm2, %v2014_v20 }
  0xb8   : > { %1974 = vmatmul.msk.bf16.gmra.mxu2 %vm971_vm2, %v2027_v21  ;;  %1987 = vmatmul.msk.bf16.gmra.mxu3 %vm971_vm2, %v2040_v22 }
  0xc7   : > { %1949 = vmatmul.msk.bf16.gmra.mxu0 %vm971_vm2, %v2002_v23  ;;  %1962 = vmatmul.msk.bf16.gmra.mxu1 %vm971_vm2, %v2015_v24 }
  0xc8   : > { %1975 = vmatmul.msk.bf16.gmra.mxu2 %vm971_vm2, %v2028_v25  ;;  %1988 = vmatmul.msk.bf16.gmra.mxu3 %vm971_vm2, %v2041_v26 }
  0xd4   : > { %v2341_v29 = vpop.f32.mrf.mxu0  ;;  %v1203_v30 = vpop.f32.mrf.mxu1 }
  0xd5   : > { %v2350_v37 = vsel %vm1388_vm3, %v1203_v30, -inf }
  0xd7   : > { %1950 = vmatmul.msk.bf16.gmra.mxu0 %vm971_vm2, %v2003_v27  ;;  %1963 = vmatmul.msk.bf16.gmra.mxu1 %vm971_vm2, %v2016_v28 }
  0xd8   : > { %1976 = vmatmul.msk.bf16.gmra.mxu2 %vm971_vm2, %v2029_v31  ;;  %1989 = vmatmul.msk.bf16.gmra.mxu3 %vm971_vm2, %v2042_v32 }
  0xdb   : > { %v1268_v33 = vpop.f32.mrf.mxu2  ;;  %v1333_v34 = vpop.f32.mrf.mxu3 }
  0xdc   : > { %v1140_v35 = vpop.f32.mrf.mxu0  ;;  %v1205_v36 = vpop.f32.mrf.mxu1  ;;  %v1406_v51 = vsel %vm1388_vm3, %v1268_v33, -inf  ;;  %v1415_v61 = vsel %vm1388_vm3, %v1333_v34, -inf }
  0xdd   : > { %v2353_v38 = vsel %vm1388_vm3, %v1140_v35, -inf  ;;  %v1404_v48 = vsel %vm1388_vm3, %v1205_v36, -inf  ;;  %v2006_v35 = vld [vmem:[%s2273_s6 + $0x58] sm:$0xff]  ;;  %v2019_v36 = vld [vmem:[%s2273_s6 + $0xc0] sm:$0xff] }
  0xde   : > { %v1398_v39 = vmax.f32 %v2353_v38, %v2350_v37 }
  0xe3   : > { %v1270_v40 = vpop.f32.mrf.mxu2  ;;  %v1335_v43 = vpop.f32.mrf.mxu3 }
  0xe4   : > { %v1143_v44 = vpop.f32.mrf.mxu0  ;;  %v1208_v45 = vpop.f32.mrf.mxu1  ;;  %v1413_v60 = vsel %vm1388_vm3, %v1270_v40, -inf  ;;  %v1422_v15 = vsel %vm1388_vm3, %v1335_v43, -inf }
  0xe5   : > { %v1403_v49 = vsel %vm1388_vm3, %v1143_v44, -inf  ;;  %v1411_v57 = vsel %vm1388_vm3, %v1208_v45, -inf  ;;  %v2032_v44 = vld [vmem:[%s2273_s6 + $0x128] sm:$0xff] }
  0xe6   : > { %v1405_v50 = vmax.f32 %v1403_v49, %v1404_v48 }
  0xe7   : > { %1951 = vmatmul.msk.bf16.gmra.mxu0 %vm971_vm2, %v2004_v41  ;;  %1964 = vmatmul.msk.bf16.gmra.mxu1 %vm971_vm2, %v2017_v42 }
  0xe8   : > { %1977 = vmatmul.msk.bf16.gmra.mxu2 %vm971_vm2, %v2030_v46  ;;  %1990 = vmatmul.msk.bf16.gmra.mxu3 %vm971_vm2, %v2043_v47  ;;  %v2370_v52 = vmax.f32 %v1405_v50, %v1406_v51 }
  0xeb   : > { %v1273_v53 = vpop.f32.mrf.mxu2  ;;  %v1338_v54 = vpop.f32.mrf.mxu3 }
  0xec   : > { %v1145_v55 = vpop.f32.mrf.mxu0  ;;  %v1210_v56 = vpop.f32.mrf.mxu1  ;;  %v1420_v14 = vsel %vm1388_vm3, %v1273_v53, -inf  ;;  %v1429_v30 = vsel %vm1388_vm3, %v1338_v54, -inf }
  0xed   : > { %v1410_v58 = vsel %vm1388_vm3, %v1145_v55, -inf  ;;  %v1418_v10 = vsel %vm1388_vm3, %v1210_v56, -inf }
  0xee   : > { %v1412_v59 = vmax.f32 %v1410_v58, %v1411_v57 }
  0xf0   : > { %v1414_v62 = vmax.f32 %v1412_v59, %v1413_v60 }
  0xf2   : > { %v1416_v0 = vmax.f32 %v1414_v62, %v1415_v61 }
  0xf3   : > { %v1275_v1 = vpop.f32.mrf.mxu2  ;;  %v1340_v4 = vpop.f32.mrf.mxu3 }
  0xf4   : > { %v1571_v5 = vadd.f32 %v2379_v63, %v1416_v0  ;;  %v1148_v6 = vpop.f32.mrf.mxu0  ;;  %v1213_v7 = vpop.f32.mrf.mxu1  ;;  %v1427_v28 = vsel %vm1388_vm3, %v1275_v1, -inf  ;;  %v1436_v50 = vsel %vm1388_vm3, %v1340_v4, -inf }
  0xf5   : > { %v1417_v11 = vsel %vm1388_vm3, %v1148_v6, -inf  ;;  %v1425_v24 = vsel %vm1388_vm3, %v1213_v7, -inf  ;;  %v2007_v7 = vld [vmem:[%s2273_s6 + $0x60] sm:$0xff] }
  0xf6   : > { %v1596_v12 = vmax.f32 %v1571_v5, 0.0  ;;  %v1419_v13 = vmax.f32 %v1417_v11, %v1418_v10 }
  0xf7   : > { %1952 = vmatmul.msk.bf16.gmra.mxu0 %vm971_vm2, %v2005_v2  ;;  %1965 = vmatmul.msk.bf16.gmra.mxu1 %vm971_vm2, %v2018_v3 }
  0xf8   : > { %v1621_v16 = vpack.c.bf16 %v1596_v12, %v1596_v12  ;;  %1978 = vmatmul.msk.bf16.gmra.mxu2 %vm971_vm2, %v2031_v8  ;;  %v1421_v17 = vmax.f32 %v1419_v13, %v1420_v14  ;;  %1991 = vmatmul.msk.bf16.gmra.mxu3 %vm971_vm2, %v2044_v9  ;;  %v2020_v8 = vld [vmem:[%s2273_s6 + $0xc8] sm:$0xff]  ;;  %v2033_v13 = vld [vmem:[%s2273_s6 + $0x130] sm:$0xff] }
  0xfa   : > { %1647 = vst.msk [vmem:[%s2392_s14 + $0xc] sm:$0xf] %vm1643_vm4, %v1621_v16  ;;  %v1423_v18 = vmax.f32 %v1421_v17, %v1422_v15 }
  0xfb   : > { %v1278_v19 = vpop.f32.mrf.mxu2  ;;  %v1343_v20 = vpop.f32.mrf.mxu3 }
  0xfc   : > { %v1572_v21 = vadd.f32 %v2379_v63, %v1423_v18  ;;  %v1150_v22 = vpop.f32.mrf.mxu0  ;;  %v1215_v23 = vpop.f32.mrf.mxu1  ;;  %v1434_v49 = vsel %vm1388_vm3, %v1278_v19, -inf  ;;  %v1443_v2 = vsel %vm1388_vm3, %v1343_v20, -inf }
  0xfd   : > { %v1424_v25 = vsel %vm1388_vm3, %v1150_v22, -inf  ;;  %v1432_v45 = vsel %vm1388_vm3, %v1215_v23, -inf }
  0xfe   : > { %v1597_v26 = vmax.f32 %v1572_v21, 0.0  ;;  %v1426_v27 = vmax.f32 %v1424_v25, %v1425_v24 }
 0x100   : > { %v1622_v31 = vpack.c.bf16 %v1597_v26, %v1597_v26  ;;  %v1428_v32 = vmax.f32 %v1426_v27, %v1427_v28 }
 0x102   : > { %1648 = vst.msk [vmem:[%s2392_s14 + $0x10] sm:$0xf] %vm1643_vm4, %v1622_v31  ;;  %v1430_v33 = vmax.f32 %v1428_v32, %v1429_v30 }
 0x103   : > { %v1280_v34 = vpop.f32.mrf.mxu2  ;;  %v1345_v40 = vpop.f32.mrf.mxu3 }
 0x104   : > { %v1573_v41 = vadd.f32 %v2379_v63, %v1430_v33  ;;  %v1153_v42 = vpop.f32.mrf.mxu0  ;;  %v1218_v43 = vpop.f32.mrf.mxu1  ;;  %v1441_v1 = vsel %vm1388_vm3, %v1280_v34, -inf  ;;  %v1450_v19 = vsel %vm1388_vm3, %v1345_v40, -inf }
 0x105   : > { %v1431_v46 = vsel %vm1388_vm3, %v1153_v42, -inf  ;;  %v1439_v60 = vsel %vm1388_vm3, %v1218_v43, -inf }
 0x106   : > { %v1598_v47 = vmax.f32 %v1573_v41, 0.0  ;;  %v1433_v48 = vmax.f32 %v1431_v46, %v1432_v45 }
 0x107   : > { %1953 = vmatmul.msk.bf16.gmra.mxu0 %vm971_vm2, %v2006_v35  ;;  %1966 = vmatmul.msk.bf16.gmra.mxu1 %vm971_vm2, %v2019_v36 }
 0x108   : > { %v1623_v51 = vpack.c.bf16 %v1598_v47, %v1598_v47  ;;  %1979 = vmatmul.msk.bf16.gmra.mxu2 %vm971_vm2, %v2032_v44  ;;  %v1435_v53 = vmax.f32 %v1433_v48, %v1434_v49 }
 0x10a   : > { %1649 = vst.msk [vmem:[%s2392_s14 + $0x14] sm:$0xf] %vm1643_vm4, %v1623_v51  ;;  %v1437_v54 = vmax.f32 %v1435_v53, %v1436_v50 }
 0x10b   : > { %v1283_v55 = vpop.f32.mrf.mxu2  ;;  %v1348_v56 = vpop.f32.mrf.mxu3 }
 0x10c   : > { %v1574_v57 = vadd.f32 %v2379_v63, %v1437_v54  ;;  %v1155_v58 = vpop.f32.mrf.mxu0  ;;  %v1220_v59 = vpop.f32.mrf.mxu1  ;;  %v1448_v18 = vsel %vm1388_vm3, %v1283_v55, -inf  ;;  %v1457_v34 = vsel %vm1388_vm3, %v1348_v56, -inf }
 0x10d   : > { %v1438_v61 = vsel %vm1388_vm3, %v1155_v58, -inf  ;;  %v1446_v14 = vsel %vm1388_vm3, %v1220_v59, -inf }
 0x10e   : > { %v1599_v62 = vmax.f32 %v1574_v57, 0.0  ;;  %v1440_v0 = vmax.f32 %v1438_v61, %v1439_v60 }
 0x110   : > { %v1624_v3 = vpack.c.bf16 %v1599_v62, %v1599_v62  ;;  %v1442_v4 = vmax.f32 %v1440_v0, %v1441_v1 }
 0x112   : > { %1650 = vst.msk [vmem:[%s2392_s14 + $0x18] sm:$0xf] %vm1643_vm4, %v1624_v3  ;;  %v1444_v5 = vmax.f32 %v1442_v4, %v1443_v2 }
 0x113   : > { %v1285_v6 = vpop.f32.mrf.mxu2  ;;  %v1350_v9 = vpop.f32.mrf.mxu3 }
 0x114   : > { %v1575_v10 = vadd.f32 %v2379_v63, %v1444_v5  ;;  %v1158_v11 = vpop.f32.mrf.mxu0  ;;  %v1223_v12 = vpop.f32.mrf.mxu1  ;;  %v1455_v33 = vsel %vm1388_vm3, %v1285_v6, -inf  ;;  %v1464_v51 = vsel %vm1388_vm3, %v1350_v9, -inf }
 0x115   : > { %v1445_v15 = vsel %vm1388_vm3, %v1158_v11, -inf  ;;  %v1453_v28 = vsel %vm1388_vm3, %v1223_v12, -inf }
 0x116   : > { %v1600_v16 = vmax.f32 %v1575_v10, 0.0  ;;  %v1447_v17 = vmax.f32 %v1445_v15, %v1446_v14 }
 0x117   : > { %1954 = vmatmul.msk.bf16.gmra.mxu0 %vm971_vm2, %v2007_v7  ;;  %1967 = vmatmul.msk.bf16.gmra.mxu1 %vm971_vm2, %v2020_v8 }
 0x118   : > { %v1625_v20 = vpack.c.bf16 %v1600_v16, %v1600_v16  ;;  %1980 = vmatmul.msk.bf16.gmra.mxu2 %vm971_vm2, %v2033_v13  ;;  %v1449_v21 = vmax.f32 %v1447_v17, %v1448_v18 }
 0x11a   : > { %1651 = vst.msk [vmem:[%s2392_s14 + $0x1c] sm:$0xf] %vm1643_vm4, %v1625_v20  ;;  %v1451_v22 = vmax.f32 %v1449_v21, %v1450_v19 }
 0x11b   : > { %v1288_v23 = vpop.f32.mrf.mxu2  ;;  %v1353_v24 = vpop.f32.mrf.mxu3 }
 0x11c   : > { %v1576_v25 = vadd.f32 %v2379_v63, %v1451_v22  ;;  %v1160_v26 = vpop.f32.mrf.mxu0  ;;  %v1225_v27 = vpop.f32.mrf.mxu1  ;;  %v1462_v50 = vsel %vm1388_vm3, %v1288_v23, -inf  ;;  %v1471_v3 = vsel %vm1388_vm3, %v1353_v24, -inf }
 0x11d   : > { %v1452_v30 = vsel %vm1388_vm3, %v1160_v26, -inf  ;;  %v1460_v46 = vsel %vm1388_vm3, %v1225_v27, -inf }
 0x11e   : > { %v1601_v31 = vmax.f32 %v1576_v25, 0.0  ;;  %v1454_v32 = vmax.f32 %v1452_v30, %v1453_v28 }
 0x120   : > { %v1626_v35 = vpack.c.bf16 %v1601_v31, %v1601_v31  ;;  %v1456_v36 = vmax.f32 %v1454_v32, %v1455_v33 }
 0x122   : > { %1652 = vst.msk [vmem:[%s2392_s14 + $0x20] sm:$0xf] %vm1643_vm4, %v1626_v35  ;;  %v1458_v40 = vmax.f32 %v1456_v36, %v1457_v34 }
 0x123   : > { %v1290_v41 = vpop.f32.mrf.mxu2  ;;  %v1355_v42 = vpop.f32.mrf.mxu3 }
 0x124   : > { %v1577_v43 = vadd.f32 %v2379_v63, %v1458_v40  ;;  %v1163_v44 = vpop.f32.mrf.mxu0  ;;  %v1228_v45 = vpop.f32.mrf.mxu1  ;;  %v1469_v2 = vsel %vm1388_vm3, %v1290_v41, -inf  ;;  %v1478_v17 = vsel %vm1388_vm3, %v1355_v42, -inf }
 0x125   : > { %v1459_v47 = vsel %vm1388_vm3, %v1163_v44, -inf  ;;  %v1467_v61 = vsel %vm1388_vm3, %v1228_v45, -inf }
 0x126   : > { %v1602_v48 = vmax.f32 %v1577_v43, 0.0  ;;  %v1461_v49 = vmax.f32 %v1459_v47, %v1460_v46 }
 0x128   : > { %v1627_v53 = vpack.c.bf16 %v1602_v48, %v1602_v48  ;;  %v1463_v54 = vmax.f32 %v1461_v49, %v1462_v50 }
 0x12a   : > { %1653 = vst.msk [vmem:[%s2392_s14 + $0x24] sm:$0xf] %vm1643_vm4, %v1627_v53  ;;  %v1465_v55 = vmax.f32 %v1463_v54, %v1464_v51 }
 0x12b   : > { %v1293_v56 = vpop.f32.mrf.mxu2  ;;  %v1358_v57 = vpop.f32.mrf.mxu3 }
 0x12c   : > { %v1578_v58 = vadd.f32 %v2379_v63, %v1465_v55  ;;  %v1165_v59 = vpop.f32.mrf.mxu0  ;;  %v1230_v60 = vpop.f32.mrf.mxu1  ;;  %v1476_v16 = vsel %vm1388_vm3, %v1293_v56, -inf  ;;  %v1485_v32 = vsel %vm1388_vm3, %v1358_v57, -inf }
 0x12d   : > { %v1466_v62 = vsel %vm1388_vm3, %v1165_v59, -inf  ;;  %v1474_v12 = vsel %vm1388_vm3, %v1230_v60, -inf }
 0x12e   : > { %v1603_v0 = vmax.f32 %v1578_v58, 0.0  ;;  %v1468_v1 = vmax.f32 %v1466_v62, %v1467_v61 }
 0x130   : > { %v1628_v4 = vpack.c.bf16 %v1603_v0, %v1603_v0  ;;  %v1470_v5 = vmax.f32 %v1468_v1, %v1469_v2 }
 0x132   : > { %1654 = vst.msk [vmem:[%s2392_s14 + $0x28] sm:$0xf] %vm1643_vm4, %v1628_v4  ;;  %v1472_v6 = vmax.f32 %v1470_v5, %v1471_v3 }
 0x133   : > { %v1295_v7 = vpop.f32.mrf.mxu2  ;;  %v1360_v8 = vpop.f32.mrf.mxu3 }
 0x134   : > { %v1579_v9 = vadd.f32 %v2379_v63, %v1472_v6  ;;  %v1168_v10 = vpop.f32.mrf.mxu0  ;;  %v1233_v11 = vpop.f32.mrf.mxu1  ;;  %v1483_v31 = vsel %vm1388_vm3, %v1295_v7, -inf  ;;  %v1492_v49 = vsel %vm1388_vm3, %v1360_v8, -inf }
 0x135   : > { %v1473_v13 = vsel %vm1388_vm3, %v1168_v10, -inf  ;;  %v1481_v26 = vsel %vm1388_vm3, %v1233_v11, -inf }
 0x136   : > { %v1604_v14 = vmax.f32 %v1579_v9, 0.0  ;;  %v1475_v15 = vmax.f32 %v1473_v13, %v1474_v12 }
 0x138   : > { %v1629_v18 = vpack.c.bf16 %v1604_v14, %v1604_v14  ;;  %v1477_v19 = vmax.f32 %v1475_v15, %v1476_v16 }
 0x13a   : > { %1655 = vst.msk [vmem:[%s2392_s14 + $0x2c] sm:$0xf] %vm1643_vm4, %v1629_v18  ;;  %v1479_v20 = vmax.f32 %v1477_v19, %v1478_v17 }
 0x13b   : > { %v1298_v21 = vpop.f32.mrf.mxu2  ;;  %v1363_v22 = vpop.f32.mrf.mxu3 }
 0x13c   : > { %v1580_v23 = vadd.f32 %v2379_v63, %v1479_v20  ;;  %v1170_v24 = vpop.f32.mrf.mxu0  ;;  %v1235_v25 = vpop.f32.mrf.mxu1  ;;  %v1490_v48 = vsel %vm1388_vm3, %v1298_v21, -inf  ;;  %v1499_v1 = vsel %vm1388_vm3, %v1363_v22, -inf }
 0x13d   : > { %v1480_v27 = vsel %vm1388_vm3, %v1170_v24, -inf  ;;  %v1488_v44 = vsel %vm1388_vm3, %v1235_v25, -inf }
 0x13e   : > { %v1605_v28 = vmax.f32 %v1580_v23, 0.0  ;;  %v1482_v30 = vmax.f32 %v1480_v27, %v1481_v26 }
 0x140   : > { %v1630_v33 = vpack.c.bf16 %v1605_v28, %v1605_v28  ;;  %v1484_v34 = vmax.f32 %v1482_v30, %v1483_v31 }
 0x142   : > { %1656 = vst.msk [vmem:[%s2392_s14 + $0x30] sm:$0xf] %vm1643_vm4, %v1630_v33  ;;  %v1486_v35 = vmax.f32 %v1484_v34, %v1485_v32 }
 0x143   : > { %v1300_v36 = vpop.f32.mrf.mxu2  ;;  %v1365_v40 = vpop.f32.mrf.mxu3 }
 0x144   : > { %v1581_v41 = vadd.f32 %v2379_v63, %v1486_v35  ;;  %v1173_v42 = vpop.f32.mrf.mxu0  ;;  %v1238_v43 = vpop.f32.mrf.mxu1  ;;  %v1497_v0 = vsel %vm1388_vm3, %v1300_v36, -inf  ;;  %v1506_v14 = vsel %vm1388_vm3, %v1365_v40, -inf }
 0x145   : > { %v1487_v45 = vsel %vm1388_vm3, %v1173_v42, -inf  ;;  %v1495_v58 = vsel %vm1388_vm3, %v1238_v43, -inf }
 0x146   : > { %v1606_v46 = vmax.f32 %v1581_v41, 0.0  ;;  %v1489_v47 = vmax.f32 %v1487_v45, %v1488_v44 }
 0x148   : > { %v1631_v50 = vpack.c.bf16 %v1606_v46, %v1606_v46  ;;  %v1491_v51 = vmax.f32 %v1489_v47, %v1490_v48 }
 0x14a   : > { %1657 = vst.msk [vmem:[%s2392_s14 + $0x34] sm:$0xf] %vm1643_vm4, %v1631_v50  ;;  %v1493_v53 = vmax.f32 %v1491_v51, %v1492_v49 }
 0x14b   : > { %v1303_v54 = vpop.f32.mrf.mxu2  ;;  %v1368_v60 = vpop.f32.mrf.mxu3 }
 0x14c   : > { %v1582_v55 = vadd.f32 %v2379_v63, %v1493_v53  ;;  %v1175_v56 = vpop.f32.mrf.mxu0  ;;  %v1240_v57 = vpop.f32.mrf.mxu1  ;;  %v1504_v13 = vsel %vm1388_vm3, %v1303_v54, -inf  ;;  %v1513_v28 = vsel %vm1388_vm3, %v1368_v60, -inf }
 0x14d   : > { %v1494_v59 = vsel %vm1388_vm3, %v1175_v56, -inf  ;;  %v1502_v9 = vsel %vm1388_vm3, %v1240_v57, -inf }
 0x14e   : > { %v1607_v61 = vmax.f32 %v1582_v55, 0.0  ;;  %v1496_v62 = vmax.f32 %v1494_v59, %v1495_v58 }
 0x150   : > { %v1632_v2 = vpack.c.bf16 %v1607_v61, %v1607_v61  ;;  %v1498_v3 = vmax.f32 %v1496_v62, %v1497_v0 }
 0x152   : > { %1658 = vst.msk [vmem:[%s2392_s14 + $0x38] sm:$0xf] %vm1643_vm4, %v1632_v2  ;;  %v1500_v4 = vmax.f32 %v1498_v3, %v1499_v1 }
 0x153   : > { %v1305_v5 = vpop.f32.mrf.mxu2  ;;  %v1370_v15 = vpop.f32.mrf.mxu3 }
 0x154   : > { %v1583_v6 = vadd.f32 %v2379_v63, %v1500_v4  ;;  %v1178_v7 = vpop.f32.mrf.mxu0  ;;  %v1243_v8 = vpop.f32.mrf.mxu1  ;;  %v1511_v27 = vsel %vm1388_vm3, %v1305_v5, -inf  ;;  %v1520_v46 = vsel %vm1388_vm3, %v1370_v15, -inf }
 0x155   : > { %v1501_v10 = vsel %vm1388_vm3, %v1178_v7, -inf  ;;  %v1509_v23 = vsel %vm1388_vm3, %v1243_v8, -inf }
 0x156   : > { %v1608_v11 = vmax.f32 %v1583_v6, 0.0  ;;  %v1503_v12 = vmax.f32 %v1501_v10, %v1502_v9 }
 0x158   : > { %v1633_v16 = vpack.c.bf16 %v1608_v11, %v1608_v11  ;;  %v1505_v17 = vmax.f32 %v1503_v12, %v1504_v13 }
 0x15a   : > { %1659 = vst.msk [vmem:[%s2392_s14 + $0x3c] sm:$0xf] %vm1643_vm4, %v1633_v16  ;;  %v1507_v18 = vmax.f32 %v1505_v17, %v1506_v14 }
 0x15b   : > { %v1308_v19 = vpop.f32.mrf.mxu2  ;;  %v1373_v32 = vpop.f32.mrf.mxu3 }
 0x15c   : > { %v1584_v20 = vadd.f32 %v2379_v63, %v1507_v18  ;;  %v1180_v21 = vpop.f32.mrf.mxu0  ;;  %v1245_v22 = vpop.f32.mrf.mxu1  ;;  %v1518_v45 = vsel %vm1388_vm3, %v1308_v19, -inf  ;;  %v1527_v61 = vsel %vm1388_vm3, %v1373_v32, -inf }
 0x15d   : > { %v1508_v24 = vsel %vm1388_vm3, %v1180_v21, -inf  ;;  %v1516_v41 = vsel %vm1388_vm3, %v1245_v22, -inf }
 0x15e   : > { %v1609_v25 = vmax.f32 %v1584_v20, 0.0  ;;  %v1510_v26 = vmax.f32 %v1508_v24, %v1509_v23 }
 0x160   : > { %v1634_v30 = vpack.c.bf16 %v1609_v25, %v1609_v25  ;;  %v1512_v31 = vmax.f32 %v1510_v26, %v1511_v27 }
 0x162   : > { %1660 = vst.msk [vmem:[%s2392_s14 + $0x40] sm:$0xf] %vm1643_vm4, %v1634_v30  ;;  %v1514_v33 = vmax.f32 %v1512_v31, %v1513_v28 }
 0x163   : > { %v1310_v34 = vpop.f32.mrf.mxu2  ;;  %v1375_v51 = vpop.f32.mrf.mxu3 }
 0x164   : > { %v1585_v35 = vadd.f32 %v2379_v63, %v1514_v33  ;;  %v1183_v36 = vpop.f32.mrf.mxu0  ;;  %v1248_v40 = vpop.f32.mrf.mxu1  ;;  %v1525_v60 = vsel %vm1388_vm3, %v1310_v34, -inf  ;;  %v1534_v12 = vsel %vm1388_vm3, %v1375_v51, -inf }
 0x165   : > { %v1515_v42 = vsel %vm1388_vm3, %v1183_v36, -inf  ;;  %v1523_v56 = vsel %vm1388_vm3, %v1248_v40, -inf }
 0x166   : > { %v1610_v43 = vmax.f32 %v1585_v35, 0.0  ;;  %v1517_v44 = vmax.f32 %v1515_v42, %v1516_v41 }
 0x168   : > { %v1635_v47 = vpack.c.bf16 %v1610_v43, %v1610_v43  ;;  %v1519_v48 = vmax.f32 %v1517_v44, %v1518_v45 }
 0x16a   : > { %1661 = vst.msk [vmem:[%s2392_s14 + $0x44] sm:$0xf] %vm1643_vm4, %v1635_v47  ;;  %v1521_v49 = vmax.f32 %v1519_v48, %v1520_v46 }
 0x16b   : > { %v1313_v50 = vpop.f32.mrf.mxu2  ;;  %v1378_v8 = vpop.f32.mrf.mxu3 }
 0x16c   : > { %v1586_v53 = vadd.f32 %v2379_v63, %v1521_v49  ;;  %v1185_v54 = vpop.f32.mrf.mxu0  ;;  %v1250_v55 = vpop.f32.mrf.mxu1  ;;  %v1532_v11 = vsel %vm1388_vm3, %v1313_v50, -inf  ;;  %v1541_v25 = vsel %vm1388_vm3, %v1378_v8, -inf }
 0x16d   : > { %v1522_v57 = vsel %vm1388_vm3, %v1185_v54, -inf  ;;  %v1530_v6 = vsel %vm1388_vm3, %v1250_v55, -inf }
 0x16e   : > { %v1611_v58 = vmax.f32 %v1586_v53, 0.0  ;;  %v1524_v59 = vmax.f32 %v1522_v57, %v1523_v56 }
 0x170   : > { %v1636_v62 = vpack.c.bf16 %v1611_v58, %v1611_v58  ;;  %v1526_v0 = vmax.f32 %v1524_v59, %v1525_v60 }
 0x172   : > { %1662 = vst.msk [vmem:[%s2392_s14 + $0x48] sm:$0xf] %vm1643_vm4, %v1636_v62  ;;  %v1528_v1 = vmax.f32 %v1526_v0, %v1527_v61 }
 0x173   : > { %v1315_v2 = vpop.f32.mrf.mxu2  ;;  %v1380_v26 = vpop.f32.mrf.mxu3 }
 0x174   : > { %v1587_v3 = vadd.f32 %v2379_v63, %v1528_v1  ;;  %v1188_v4 = vpop.f32.mrf.mxu0  ;;  %v1253_v5 = vpop.f32.mrf.mxu1  ;;  %v1539_v24 = vsel %vm1388_vm3, %v1315_v2, -inf  ;;  %v1548_v43 = vsel %vm1388_vm3, %v1380_v26, -inf }
 0x175   : > { %v1529_v7 = vsel %vm1388_vm3, %v1188_v4, -inf  ;;  %v1537_v20 = vsel %vm1388_vm3, %v1253_v5, -inf }
 0x176   : > { %v1612_v9 = vmax.f32 %v1587_v3, 0.0  ;;  %v1531_v10 = vmax.f32 %v1529_v7, %v1530_v6 }
 0x178   : > { %v1637_v13 = vpack.c.bf16 %v1612_v9, %v1612_v9  ;;  %v1533_v14 = vmax.f32 %v1531_v10, %v1532_v11 }
 0x17a   : > { %1663 = vst.msk [vmem:[%s2392_s14 + $0x4c] sm:$0xf] %vm1643_vm4, %v1637_v13  ;;  %v1535_v15 = vmax.f32 %v1533_v14, %v1534_v12 }
 0x17b   : > { %v1318_v16 = vpop.f32.mrf.mxu2  ;;  %v1383_v46 = vpop.f32.mrf.mxu3 }
 0x17c   : > { %v1588_v17 = vadd.f32 %v2379_v63, %v1535_v15  ;;  %v1190_v18 = vpop.f32.mrf.mxu0  ;;  %v1255_v19 = vpop.f32.mrf.mxu1  ;;  %v1546_v42 = vsel %vm1388_vm3, %v1318_v16, -inf  ;;  %v1555_v58 = vsel %vm1388_vm3, %v1383_v46, -inf }
 0x17d   : > { %v1536_v21 = vsel %vm1388_vm3, %v1190_v18, -inf  ;;  %v1544_v35 = vsel %vm1388_vm3, %v1255_v19, -inf }
 0x17e   : > { %v1613_v22 = vmax.f32 %v1588_v17, 0.0  ;;  %v1538_v23 = vmax.f32 %v1536_v21, %v1537_v20  ;;  %v1389_v17 = vsel %vm1388_vm3, %v2341_v29, -inf }
 0x180   : > { %v1638_v27 = vpack.c.bf16 %v1613_v22, %v1613_v22  ;;  %v1540_v28 = vmax.f32 %v1538_v23, %v1539_v24 }
 0x182   : > { %1664 = vst.msk [vmem:[%s2392_s14 + $0x50] sm:$0xf] %vm1643_vm4, %v1638_v27  ;;  %v1542_v30 = vmax.f32 %v1540_v28, %v1541_v25 }
 0x183   : > { %v1320_v31 = vpop.f32.mrf.mxu2  ;;  %v1385_v0 = vpop.f32.mrf.mxu3 }
 0x184   : > { %v1589_v32 = vadd.f32 %v2379_v63, %v1542_v30  ;;  %v1193_v33 = vpop.f32.mrf.mxu0  ;;  %v1258_v34 = vpop.f32.mrf.mxu1  ;;  %v1553_v57 = vsel %vm1388_vm3, %v1320_v31, -inf  ;;  %v1562_v9 = vsel %vm1388_vm3, %v1385_v0, -inf }
 0x185   : > { %v1543_v36 = vsel %vm1388_vm3, %v1193_v33, -inf  ;;  %v1551_v53 = vsel %vm1388_vm3, %v1258_v34, -inf }
 0x186   : > { %v1614_v40 = vmax.f32 %v1589_v32, 0.0  ;;  %v1545_v41 = vmax.f32 %v1543_v36, %v1544_v35 }
 0x188   : > { %v1639_v44 = vpack.c.bf16 %v1614_v40, %v1614_v40  ;;  %v1547_v45 = vmax.f32 %v1545_v41, %v1546_v42 }
 0x18a   : > { %1665 = vst.msk [vmem:[%s2392_s14 + $0x54] sm:$0xf] %vm1643_vm4, %v1639_v44  ;;  %v1549_v47 = vmax.f32 %v1547_v45, %v1548_v43 }
 0x18b   : > { %v1323_v48 = vpop.f32.mrf.mxu2 }
 0x18c   : > { %v1590_v49 = vadd.f32 %v2379_v63, %v1549_v47  ;;  %v1195_v50 = vpop.f32.mrf.mxu0  ;;  %v1260_v51 = vpop.f32.mrf.mxu1  ;;  %v1560_v8 = vsel %vm1388_vm3, %v1323_v48, -inf }
 0x18d   : > { %v1550_v54 = vsel %vm1388_vm3, %v1195_v50, -inf  ;;  %v1558_v4 = vsel %vm1388_vm3, %v1260_v51, -inf }
 0x18e   : > { %v1615_v55 = vmax.f32 %v1590_v49, 0.0  ;;  %v1552_v56 = vmax.f32 %v1550_v54, %v1551_v53 }
 0x190   : > { %v1640_v59 = vpack.c.bf16 %v1615_v55, %v1615_v55  ;;  %v1554_v60 = vmax.f32 %v1552_v56, %v1553_v57 }
 0x192   : > { %1666 = vst.msk [vmem:[%s2392_s14 + $0x58] sm:$0xf] %vm1643_vm4, %v1640_v59  ;;  %v1556_v61 = vmax.f32 %v1554_v60, %v1555_v58 }
 0x193   : > { %v1325_v62 = vpop.f32.mrf.mxu2 }
 0x194   : > { %v1591_v1 = vadd.f32 %v2379_v63, %v1556_v61  ;;  %v1198_v2 = vpop.f32.mrf.mxu0  ;;  %v1263_v3 = vpop.f32.mrf.mxu1  ;;  %v1394_v29 = vsel %vm1388_vm3, %v1325_v62, -inf }
 0x195   : > { %v1557_v5 = vsel %vm1388_vm3, %v1198_v2, -inf  ;;  %v1392_v23 = vsel %vm1388_vm3, %v1263_v3, -inf }
 0x196   : > { %v1616_v6 = vmax.f32 %v1591_v1, 0.0  ;;  %v1559_v7 = vmax.f32 %v1557_v5, %v1558_v4 }
 0x198   : > { %v1641_v10 = vpack.c.bf16 %v1616_v6, %v1616_v6  ;;  %v1561_v11 = vmax.f32 %v1559_v7, %v1560_v8 }
 0x19a   : > { %1667 = vst.msk [vmem:[%s2392_s14 + $0x5c] sm:$0xf] %vm1643_vm4, %v1641_v10  ;;  %v1563_v12 = vmax.f32 %v1561_v11, %v1562_v9 }
 0x19b   : > { %v1328_v13 = vpop.f32.mrf.mxu2 }
 0x19c   : > { %v1592_v14 = vadd.f32 %v2379_v63, %v1563_v12  ;;  %v1200_v15 = vpop.f32.mrf.mxu0  ;;  %v1265_v16 = vpop.f32.mrf.mxu1  ;;  %v1401_v24 = vsel %vm1388_vm3, %v1328_v13, -inf }
 0x19d   : > { %v1390_v18 = vsel %vm1388_vm3, %v1200_v15, -inf  ;;  %v1399_v19 = vsel %vm1388_vm3, %v1265_v16, -inf }
 0x19e   : > { %v1617_v20 = vmax.f32 %v1592_v14, 0.0  ;;  %v1391_v21 = vmax.f32 %v1389_v17, %v1390_v18  ;;  %v1400_v22 = vmax.f32 %v1398_v39, %v1399_v19 }
 0x1a0   : > { %v1642_v25 = vpack.c.bf16 %v1617_v20, %v1617_v20  ;;  %v1393_v26 = vmax.f32 %v1391_v21, %v1392_v23  ;;  %v1402_v27 = vmax.f32 %v1400_v22, %v1401_v24 }
 0x1a2   : > { %1668 = vst.msk [vmem:[%s2392_s14 + $0x60] sm:$0xf] %vm1643_vm4, %v1642_v25  ;;  %v1395_v28 = vmax.f32 %v1393_v26, %v1394_v29  ;;  %v1569_v30 = vadd.f32 %v2379_v63, %v1402_v27 }
 0x1a3   : > { %v1330_v31 = vpop.f32.mrf.mxu2 }
 0x1a4   : > { %v1568_v37 = vadd.f32 %v2379_v63, %v1395_v28  ;;  %v1594_v38 = vmax.f32 %v1569_v30, 0.0  ;;  %v1408_v39 = vsel %vm1388_vm3, %v1330_v31, -inf }
 0x1a5   : > { %v1409_v32 = vmax.f32 %v2370_v52, %v1408_v39 }
 0x1a6   : > { %v1593_v33 = vmax.f32 %v1568_v37, 0.0  ;;  %v1619_v34 = vpack.c.bf16 %v1594_v38, %v1594_v38 }
 0x1a7   : > { %v1570_v35 = vadd.f32 %v2379_v63, %v1409_v32 }
 0x1a8   : > { %v1618_v36 = vpack.c.bf16 %v1593_v33, %v1593_v33  ;;  %1645 = vst.msk [vmem:[%s2392_s14 + $0x4] sm:$0xf] %vm1643_vm4, %v1619_v34 }
 0x1a9   : > { %v1595_v40 = vmax.f32 %v1570_v35, 0.0 }
 0x1aa   : > { %1644 = vst.msk [vmem:[%s2392_s14] sm:$0xf] %vm1643_vm4, %v1618_v36 }
 0x1ab   : > { %v1620_v41 = vpack.c.bf16 %v1595_v40, %v1595_v40 }
 0x1ad   : > { %1646 = vst.msk [vmem:[%s2392_s14 + $0x8] sm:$0xf] %vm1643_vm4, %v1620_v41 }
 0x1ae PF: > { %p10_p9 = scmp.ge.s32.totalorder %s2139_s16, 4   ;;  %s2591_s12 = smov %s2095_s13 }
 0x1af   : > { %s2592_s13 = smov %s2148_s19  ;;  %s2593_s14 = smov %s2139_s16 }
 0x1b0   :  { %12 = sbr.rel (!%p10_p9) target bundleno = 2 (0x2), region = 108 }

// kernel: cnn_forward.4
= control target key start
LH: loop header
LB: loop body
LE: loop exit
PB: predicated region body
PF: predicated region fallthrough
CT: control target
= control target key end

     0   :  { %s1624_s12 = smov 0   ;;  %s1626_s13 = smov 0   ;;  %s2101_s0 = inlined_call_operand.vmem [shape: bf16[4,112,288], index: 0, kind: input, shape index: {}]   ;;  %s2102_s1 = inlined_call_operand.vmem [shape: bf16[288,64], index: 1, kind: input, shape index: {}]   ;;  %s2103_s2 = inlined_call_operand.vmem [shape: f32[1,64], index: 2, kind: input, shape index: {}]   ;;  %s2104_s3 = inlined_call_operand.vmem [shape: bf16[112,64], index: 3, kind: output, shape index: {}]  }
   0x1   :  { %s1628_s14 = smov 0  }
   0x2 LB: > { %s1154_s15 = sadd.s32 4294967295, %s1602_s14   ;;  %s1641_s16 = sadd.s32 1, %s1602_s14   ;;  %s1602_s14 = sphi %s1628_s14, %s2107_s14   ;;  %s1598_s13 = sphi %s1626_s13, %s2106_s13   ;;  %s1594_s12 = sphi %s1624_s12, %s2105_s12  }
   0x3   : > { %s17_s17 = ssub.s32 %s1602_s14, %s1641_s16  ;;  %s20_s18 = sadd.s32 1, %s1598_s13 }
   0x4   : > { %p18_p0 = scmp.eq.s32.totalorder %s17_s17, 0  ;;  %p27_p1 = scmp.ne.s32.totalorder %s1598_s13, %s1594_s12 }
   0x5   : > { %p28_p2 = scmp.eq.s32.totalorder %s1602_s14, 0  ;;  %p1157_p4 = scmp.ge.s32.totalorder %s1602_s14, 2 }
   0x6   : > { %s1650_s19 = scalar_select %p18_p0, %s1598_s13, %s20_s18  }
   0x7   : > { %p29_p3 = por %p28_p2, %p27_p1  ;;  %127 = sbr.rel (%p1157_p4) target bundleno = 74 (0x4a), region = 24 }
   0xc   : > { %130 = sbr.rel (!%p29_p3) target bundleno = 74 (0x4a), region = 28  ;;  %s132_s20 = sand.u32 (%p29_p3), 1, %s1598_s13  }
   0xd   : > { %s1551_s21 = smul.u32 (%p29_p3), 336, %s132_s20 }
   0xe   : > { %s1554_s22 = smul.u32 (%p29_p3), 84, %s1602_s14 }
   0xf   : > { %s1663_s26 = scalar_lea.vmem (%p29_p3), [#allocation2], %s1551_s21 }
  0x10   : > { %s1658_s25 = scalar_lea.vmem (%p29_p3), %s2101_s0, %s1554_s22 }
  0x11   : > { %v153_v0 = vld [vmem:[%s1658_s25] sm:$0xff]  ;;  %v155_v1 = vld [vmem:[%s1658_s25 + $0xc] sm:$0xff]  ;;  %v157_v2 = vld [vmem:[%s1658_s25 + $0x18] sm:$0xff] }
  0x12   : > { %154 = vst [vmem:[%s1663_s26] sm:$0xff] %v153_v0  ;;  %v159_v3 = vld [vmem:[%s1658_s25 + $0x24] sm:$0xff]  ;;  %v161_v4 = vld [vmem:[%s1658_s25 + $0x30] sm:$0xff]  ;;  %v163_v5 = vld [vmem:[%s1658_s25 + $0x3c] sm:$0xff] }
  0x13   : > { %156 = vst [vmem:[%s1663_s26 + $0xc] sm:$0xff] %v155_v1  ;;  %v165_v6 = vld [vmem:[%s1658_s25 + $0x48] sm:$0xff]  ;;  %v169_v8 = vld [vmem:[%s1658_s25 + $0xb4] sm:$0xff]  ;;  %v171_v9 = vld [vmem:[%s1658_s25 + $0xc0] sm:$0xff] }
  0x14   : > { %158 = vst [vmem:[%s1663_s26 + $0x18] sm:$0xff] %v157_v2  ;;  %v167_v7 = vld [vmem:[%s1658_s25 + $0xa8] sm:$0xff]  ;;  %v175_v11 = vld [vmem:[%s1658_s25 + $0xd8] sm:$0xff]  ;;  %v179_v13 = vld [vmem:[%s1658_s25 + $0xf0] sm:$0xff] }
  0x15   : > { %160 = vst [vmem:[%s1663_s26 + $0x24] sm:$0xff] %v159_v3  ;;  %v173_v10 = vld [vmem:[%s1658_s25 + $0xcc] sm:$0xff]  ;;  %v177_v12 = vld [vmem:[%s1658_s25 + $0xe4] sm:$0xff]  ;;  %v183_v15 = vld [vmem:[%s1658_s25 + $0x15c] sm:$0xff] }
  0x16   : > { %162 = vst [vmem:[%s1663_s26 + $0x30] sm:$0xff] %v161_v4  ;;  %v181_v14 = vld [vmem:[%s1658_s25 + $0x150] sm:$0xff]  ;;  %v185_v16 = vld [vmem:[%s1658_s25 + $0x168] sm:$0xff]  ;;  %v189_v18 = vld [vmem:[%s1658_s25 + $0x180] sm:$0xff] }
  0x17   : > { %164 = vst [vmem:[%s1663_s26 + $0x3c] sm:$0xff] %v163_v5  ;;  %v187_v17 = vld [vmem:[%s1658_s25 + $0x174] sm:$0xff]  ;;  %v191_v19 = vld [vmem:[%s1658_s25 + $0x18c] sm:$0xff]  ;;  %v197_v22 = vld [vmem:[%s1658_s25 + $0x204] sm:$0xff] }
  0x18   : > { %166 = vst [vmem:[%s1663_s26 + $0x48] sm:$0xff] %v165_v6  ;;  %v193_v20 = vld [vmem:[%s1658_s25 + $0x198] sm:$0xff]  ;;  %v199_v23 = vld [vmem:[%s1658_s25 + $0x210] sm:$0xff]  ;;  %v203_v25 = vld [vmem:[%s1658_s25 + $0x228] sm:$0xff] }
  0x19   : > { %168 = vst [vmem:[%s1663_s26 + $0x54] sm:$0xff] %v167_v7  ;;  %v195_v21 = vld [vmem:[%s1658_s25 + $0x1f8] sm:$0xff]  ;;  %v207_v27 = vld [vmem:[%s1658_s25 + $0x240] sm:$0xff]  ;;  %v1159_v28 = vld [vmem:[%s1658_s25 + $0x8] sm:$0xf] }
  0x1a   : > { %170 = vst [vmem:[%s1663_s26 + $0x60] sm:$0xff] %v169_v8  ;;  %v201_v24 = vld [vmem:[%s1658_s25 + $0x21c] sm:$0xff]  ;;  %v205_v26 = vld [vmem:[%s1658_s25 + $0x234] sm:$0xff]  ;;  %v1165_v31 = vld [vmem:[%s1658_s25 + $0x2c] sm:$0xf] }
  0x1b   : > { %172 = vst [vmem:[%s1663_s26 + $0x6c] sm:$0xff] %v171_v9  ;;  %v1161_v29 = vld [vmem:[%s1658_s25 + $0x14] sm:$0xf]  ;;  %v1163_v30 = vld [vmem:[%s1658_s25 + $0x20] sm:$0xf] }
  0x1c   : > { %174 = vst [vmem:[%s1663_s26 + $0x78] sm:$0xff] %v173_v10  ;;  %v1167_v32 = vld [vmem:[%s1658_s25 + $0x38] sm:$0xf]  ;;  %v1169_v33 = vld [vmem:[%s1658_s25 + $0x44] sm:$0xf] }
  0x1d   : > { %176 = vst [vmem:[%s1663_s26 + $0x84] sm:$0xff] %v175_v11  ;;  %v1171_v34 = vld [vmem:[%s1658_s25 + $0x50] sm:$0xf]  ;;  %v1175_v36 = vld [vmem:[%s1658_s25 + $0xbc] sm:$0xf] }
  0x1e   : > { %178 = vst [vmem:[%s1663_s26 + $0x90] sm:$0xff] %v177_v12  ;;  %v1173_v35 = vld [vmem:[%s1658_s25 + $0xb0] sm:$0xf]  ;;  %v1177_v37 = vld [vmem:[%s1658_s25 + $0xc8] sm:$0xf] }
  0x1f   : > { %180 = vst [vmem:[%s1663_s26 + $0x9c] sm:$0xff] %v179_v13  ;;  %v1179_v38 = vld [vmem:[%s1658_s25 + $0xd4] sm:$0xf]  ;;  %v1181_v39 = vld [vmem:[%s1658_s25 + $0xe0] sm:$0xf] }
  0x20   : > { %182 = vst [vmem:[%s1663_s26 + $0xa8] sm:$0xff] %v181_v14  ;;  %v1183_v40 = vld [vmem:[%s1658_s25 + $0xec] sm:$0xf]  ;;  %v1185_v41 = vld [vmem:[%s1658_s25 + $0xf8] sm:$0xf] }
  0x21   : > { %184 = vst [vmem:[%s1663_s26 + $0xb4] sm:$0xff] %v183_v15  ;;  %v1187_v42 = vld [vmem:[%s1658_s25 + $0x158] sm:$0xf]  ;;  %v1189_v43 = vld [vmem:[%s1658_s25 + $0x164] sm:$0xf] }
  0x22   : > { %186 = vst [vmem:[%s1663_s26 + $0xc0] sm:$0xff] %v185_v16  ;;  %v1191_v44 = vld [vmem:[%s1658_s25 + $0x170] sm:$0xf]  ;;  %v1193_v45 = vld [vmem:[%s1658_s25 + $0x17c] sm:$0xf] }
  0x23   : > { %188 = vst [vmem:[%s1663_s26 + $0xcc] sm:$0xff] %v187_v17  ;;  %v1195_v46 = vld [vmem:[%s1658_s25 + $0x188] sm:$0xf]  ;;  %v1197_v47 = vld [vmem:[%s1658_s25 + $0x194] sm:$0xf] }
  0x24   : > { %190 = vst [vmem:[%s1663_s26 + $0xd8] sm:$0xff] %v189_v18  ;;  %v1199_v48 = vld [vmem:[%s1658_s25 + $0x1a0] sm:$0xf]  ;;  %v1203_v50 = vld [vmem:[%s1658_s25 + $0x20c] sm:$0xf] }
  0x25   : > { %192 = vst [vmem:[%s1663_s26 + $0xe4] sm:$0xff] %v191_v19  ;;  %v1201_v49 = vld [vmem:[%s1658_s25 + $0x200] sm:$0xf]  ;;  %v1205_v51 = vld [vmem:[%s1658_s25 + $0x218] sm:$0xf] }
  0x26   : > { %194 = vst [vmem:[%s1663_s26 + $0xf0] sm:$0xff] %v193_v20  ;;  %v1207_v52 = vld [vmem:[%s1658_s25 + $0x224] sm:$0xf]  ;;  %v1209_v53 = vld [vmem:[%s1658_s25 + $0x230] sm:$0xf] }
  0x27   : > { %196 = vst [vmem:[%s1663_s26 + $0xfc] sm:$0xff] %v195_v21  ;;  %v1211_v54 = vld [vmem:[%s1658_s25 + $0x23c] sm:$0xf]  ;;  %v1213_v55 = vld [vmem:[%s1658_s25 + $0x248] sm:$0xf] }
  0x28   : > { %198 = vst [vmem:[%s1663_s26 + $0x108] sm:$0xff] %v197_v22 }
  0x29   : > { %200 = vst [vmem:[%s1663_s26 + $0x114] sm:$0xff] %v199_v23 }
  0x2a   : > { %202 = vst [vmem:[%s1663_s26 + $0x120] sm:$0xff] %v201_v24 }
  0x2b   : > { %204 = vst [vmem:[%s1663_s26 + $0x12c] sm:$0xff] %v203_v25 }
  0x2c   : > { %206 = vst [vmem:[%s1663_s26 + $0x138] sm:$0xff] %v205_v26 }
  0x2d   : > { %208 = vst [vmem:[%s1663_s26 + $0x144] sm:$0xff] %v207_v27 }
  0x2e   : > { %1160 = vst [vmem:[%s1663_s26 + $0x8] sm:$0xf] %v1159_v28 }
  0x2f   : > { %1162 = vst [vmem:[%s1663_s26 + $0x14] sm:$0xf] %v1161_v29 }
  0x30   : > { %1164 = vst [vmem:[%s1663_s26 + $0x20] sm:$0xf] %v1163_v30 }
  0x31   : > { %1166 = vst [vmem:[%s1663_s26 + $0x2c] sm:$0xf] %v1165_v31 }
  0x32   : > { %1168 = vst [vmem:[%s1663_s26 + $0x38] sm:$0xf] %v1167_v32 }
  0x33   : > { %1170 = vst [vmem:[%s1663_s26 + $0x44] sm:$0xf] %v1169_v33 }
  0x34   : > { %1172 = vst [vmem:[%s1663_s26 + $0x50] sm:$0xf] %v1171_v34 }
  0x35   : > { %1174 = vst [vmem:[%s1663_s26 + $0x5c] sm:$0xf] %v1173_v35 }
  0x36   : > { %1176 = vst [vmem:[%s1663_s26 + $0x68] sm:$0xf] %v1175_v36 }
  0x37   : > { %1178 = vst [vmem:[%s1663_s26 + $0x74] sm:$0xf] %v1177_v37 }
  0x38   : > { %1180 = vst [vmem:[%s1663_s26 + $0x80] sm:$0xf] %v1179_v38 }
  0x39   : > { %1182 = vst [vmem:[%s1663_s26 + $0x8c] sm:$0xf] %v1181_v39 }
  0x3a   : > { %1184 = vst [vmem:[%s1663_s26 + $0x98] sm:$0xf] %v1183_v40 }
  0x3b   : > { %1186 = vst [vmem:[%s1663_s26 + $0xa4] sm:$0xf] %v1185_v41 }
  0x3c   : > { %1188 = vst [vmem:[%s1663_s26 + $0xb0] sm:$0xf] %v1187_v42 }
  0x3d   : > { %1190 = vst [vmem:[%s1663_s26 + $0xbc] sm:$0xf] %v1189_v43 }
  0x3e   : > { %1192 = vst [vmem:[%s1663_s26 + $0xc8] sm:$0xf] %v1191_v44 }
  0x3f   : > { %1194 = vst [vmem:[%s1663_s26 + $0xd4] sm:$0xf] %v1193_v45 }
  0x40   : > { %1196 = vst [vmem:[%s1663_s26 + $0xe0] sm:$0xf] %v1195_v46 }
  0x41   : > { %1198 = vst [vmem:[%s1663_s26 + $0xec] sm:$0xf] %v1197_v47 }
  0x42   : > { %1200 = vst [vmem:[%s1663_s26 + $0xf8] sm:$0xf] %v1199_v48 }
  0x43   : > { %1202 = vst [vmem:[%s1663_s26 + $0x104] sm:$0xf] %v1201_v49 }
  0x44   : > { %1204 = vst [vmem:[%s1663_s26 + $0x110] sm:$0xf] %v1203_v50 }
  0x45   : > { %1206 = vst [vmem:[%s1663_s26 + $0x11c] sm:$0xf] %v1205_v51 }
  0x46   : > { %1208 = vst [vmem:[%s1663_s26 + $0x128] sm:$0xf] %v1207_v52 }
  0x47   : > { %1210 = vst [vmem:[%s1663_s26 + $0x134] sm:$0xf] %v1209_v53 }
  0x48   : > { %1212 = vst [vmem:[%s1663_s26 + $0x140] sm:$0xf] %v1211_v54 }
  0x49   : > { %1214 = vst [vmem:[%s1663_s26 + $0x14c] sm:$0xf] %v1213_v55 }
  0x4a PF: > { %p1215_p5 = scmp.ge.s32.totalorder %s1602_s14, 1  ;;  %p277_p6 = scmp.lt.s32.totalorder %s1602_s14, 3 }
  0x4c   : > { %p278_p7 = pnand %p1215_p5, %p277_p6 }
  0x4d   : > { %s284_s6 = sand.u32 (!%p278_p7), 1, %s1594_s12  }
  0x4e   : > { %281 = sbr.rel (%p278_p7) target bundleno = 424 (0x1a8), region = 54 }
  0x4f   : > { %s1553_s7 = smul.u32 (!%p278_p7), 336, %s284_s6 }
  0x51   : > { %s1803_s12 = scalar_lea.vmem (!%p278_p7), [#allocation2], %s1553_s7 }
  0x53   : > { %v1522_v56 = vld [vmem:[%s2102_s1 + $0x38] sm:$0xff]  ;;  %v1787_v58 = vld [vmem:[%s2102_s1 + $0x88] sm:$0xff]  ;;  %v1521_v59 = vld [vmem:[%s2102_s1 + $0x30] sm:$0xff]  ;;  %vm725_vm0 = vcmask 261120   ;;  %vm1005_vm1 = vcmask 523264   ;;  %vm1080_vm2 = vcmask 519168  }
  0x54   : > { %v1782_v57 = vld [vmem:[%s2102_s1 + $0x78] sm:$0xff]  ;;  %768 = vmatpush.bf16.msra.mxu0 %v1522_v56  ;;  %1533 = vmatpush.bf16.msra.mxu3 %v1522_v56  ;;  %v1529_v60 = vld [vmem:[%s2102_s1 + $0x70] sm:$0xff]  ;;  %v1801_v61 = vld [vmem:[%s2102_s1 + $0x80] sm:$0xff] }
  0x55   : > { %847 = vmatpush.bf16.msra.mxu1 %v1782_v57  ;;  %932 = vmatpush.bf16.msra.mxu2 %v1787_v58  ;;  %v1227_v62 = vld [vmem:[%s1803_s12 + $0x8] sm:$0xf]  ;;  %v1475_v63 = vld [vmem:[%s1803_s12 + $0x10] sm:$0xf0]  ;;  %v1239_v9 = vld [vmem:[%s1803_s12 + $0x20] sm:$0xf] }
  0x56   : > { %v1228_v0 = vor.u32 %v1475_v63, %v1227_v62  ;;  %v1520_v1 = vld [vmem:[%s2102_s1 + $0x28] sm:$0xff]  ;;  %v1519_v3 = vld [vmem:[%s2102_s1 + $0x20] sm:$0xff]  ;;  %v1518_v5 = vld [vmem:[%s2102_s1 + $0x18] sm:$0xff] }
  0x57   : > { %v1528_v2 = vld [vmem:[%s2102_s1 + $0x68] sm:$0xff]  ;;  %v1527_v4 = vld [vmem:[%s2102_s1 + $0x60] sm:$0xff]  ;;  %v1526_v6 = vld [vmem:[%s2102_s1 + $0x58] sm:$0xff] }
  0x58   : > { %769 = vmatpush.bf16.msra.mxu0 %v1521_v59  ;;  %1534 = vmatpush.bf16.msra.mxu3 %v1521_v59  ;;  %v1517_v7 = vld [vmem:[%s2102_s1 + $0x10] sm:$0xff]  ;;  %v1478_v10 = vld [vmem:[%s1803_s12 + $0x28] sm:$0xf0]  ;;  %v1515_v14 = vld [vmem:[%s2102_s1] sm:$0xff] }
  0x59   : > { %848 = vmatpush.bf16.msra.mxu1 %v1529_v60  ;;  %933 = vmatpush.bf16.msra.mxu2 %v1801_v61  ;;  %v1525_v8 = vld [vmem:[%s2102_s1 + $0x50] sm:$0xff]  ;;  %v1240_v11 = vor.u32 %v1478_v10, %v1239_v9  ;;  %v1516_v12 = vld [vmem:[%s2102_s1 + $0x8] sm:$0xff]  ;;  %v1523_v15 = vld [vmem:[%s2102_s1 + $0x40] sm:$0xff] }
  0x5a   : > { %v1524_v13 = vld [vmem:[%s2102_s1 + $0x48] sm:$0xff]  ;;  %v1219_v16 = vld [vmem:[%s1803_s12] sm:$0xf]  ;;  %v1507_v19 = vld [vmem:[%s1803_s12 + $0x110] sm:$0xf0] }
  0x5b   : > { %v1474_v17 = vld [vmem:[%s1803_s12 + $0x8] sm:$0xf0]  ;;  %v1351_v18 = vld [vmem:[%s1803_s12 + $0x108] sm:$0xf]  ;;  %v1473_v20 = vld [vmem:[%s1803_s12 + $0x4] sm:$0xf] }
  0x5c   : > { %1457 = vmatmul.msk.bf16.vlgmr.msra.gmra.mxu2 %vm725_vm0, %v1228_v0  ;;  %770 = vmatpush.bf16.msra.mxu0 %v1520_v1  ;;  %v1221_v21 = vld [vmem:[%s1803_s12 + $0xc] sm:$0xf0]  ;;  %v1220_v22 = vor.u32 %v1474_v17, %v1219_v16  ;;  %v1352_v23 = vor.u32 %v1507_v19, %v1351_v18  ;;  %v1251_v25 = vld [vmem:[%s1803_s12 + $0x38] sm:$0xf]  ;;  %v1481_v26 = vld [vmem:[%s1803_s12 + $0x40] sm:$0xf0] }
  0x5d   : > { %1535 = vmatpush.bf16.msra.mxu3 %v1520_v1  ;;  %849 = vmatpush.bf16.msra.mxu1 %v1528_v2  ;;  %v1224_v24 = vor.u32 %v1473_v20, %v1221_v21  ;;  %v1252_v27 = vor.u32 %v1481_v26, %v1251_v25  ;;  %v1231_v28 = vld [vmem:[%s1803_s12 + $0x18] sm:$0xf]  ;;  %v1477_v29 = vld [vmem:[%s1803_s12 + $0x20] sm:$0xf0]  ;;  %v1363_v30 = vld [vmem:[%s1803_s12 + $0x120] sm:$0xf] }
  0x5e   : > { %v1510_v31 = vld [vmem:[%s1803_s12 + $0x128] sm:$0xf0]  ;;  %v1476_v32 = vld [vmem:[%s1803_s12 + $0x1c] sm:$0xf]  ;;  %v1233_v33 = vld [vmem:[%s1803_s12 + $0x24] sm:$0xf0]  ;;  %v1232_v34 = vor.u32 %v1477_v29, %v1231_v28 }
  0x5f   : > { %v1364_v35 = vor.u32 %v1510_v31, %v1363_v30  ;;  %v1236_v36 = vor.u32 %v1476_v32, %v1233_v33  ;;  %v1263_v37 = vld [vmem:[%s1803_s12 + $0x50] sm:$0xf]  ;;  %v1484_v38 = vld [vmem:[%s1803_s12 + $0x58] sm:$0xf0]  ;;  %v1375_v42 = vld [vmem:[%s1803_s12 + $0x138] sm:$0xf] }
  0x60   : > { %771 = vmatpush.bf16.msra.mxu0 %v1519_v3  ;;  %v1264_v39 = vor.u32 %v1484_v38, %v1263_v37  ;;  %v1243_v40 = vld [vmem:[%s1803_s12 + $0x30] sm:$0xf]  ;;  %v1480_v41 = vld [vmem:[%s1803_s12 + $0x38] sm:$0xf0]  ;;  %v1513_v43 = vld [vmem:[%s1803_s12 + $0x140] sm:$0xf0] }
  0x61   : > { %1536 = vmatpush.bf16.msra.mxu3 %v1519_v3  ;;  %850 = vmatpush.bf16.msra.mxu1 %v1527_v4  ;;  %v1479_v44 = vld [vmem:[%s1803_s12 + $0x34] sm:$0xf]  ;;  %v1245_v45 = vld [vmem:[%s1803_s12 + $0x3c] sm:$0xf0]  ;;  %v1244_v46 = vor.u32 %v1480_v41, %v1243_v40  ;;  %v1376_v47 = vor.u32 %v1513_v43, %v1375_v42  ;;  %v1275_v49 = vld [vmem:[%s1803_s12 + $0x68] sm:$0xf] }
  0x62   : > { %v1248_v48 = vor.u32 %v1479_v44, %v1245_v45  ;;  %v1487_v50 = vld [vmem:[%s1803_s12 + $0x70] sm:$0xf0]  ;;  %v1255_v52 = vld [vmem:[%s1803_s12 + $0x48] sm:$0xf]  ;;  %v1482_v54 = vld [vmem:[%s1803_s12 + $0x4c] sm:$0xf] }
  0x63   : > { %v1276_v51 = vor.u32 %v1487_v50, %v1275_v49  ;;  %v1483_v53 = vld [vmem:[%s1803_s12 + $0x50] sm:$0xf0]  ;;  %v1257_v55 = vld [vmem:[%s1803_s12 + $0x54] sm:$0xf0]  ;;  %v1506_v56 = vld [vmem:[%s1803_s12 + $0x10c] sm:$0xf] }
  0x64   : > { %772 = vmatpush.bf16.msra.mxu0 %v1518_v5  ;;  %v1260_v59 = vor.u32 %v1482_v54, %v1257_v55  ;;  %v1490_v62 = vld [vmem:[%s1803_s12 + $0x88] sm:$0xf0]  ;;  %v1267_v0 = vld [vmem:[%s1803_s12 + $0x60] sm:$0xf]  ;;  %v1269_v3 = vld [vmem:[%s1803_s12 + $0x6c] sm:$0xf0] }
  0x65   : > { %1537 = vmatpush.bf16.msra.mxu3 %v1518_v5  ;;  %851 = vmatpush.bf16.msra.mxu1 %v1526_v6  ;;  %v1486_v1 = vld [vmem:[%s1803_s12 + $0x68] sm:$0xf0]  ;;  %v1365_v5 = vld [vmem:[%s1803_s12 + $0x12c] sm:$0xf0]  ;;  %v1299_v9 = vld [vmem:[%s1803_s12 + $0x98] sm:$0xf] }
  0x66   : > { %v1493_v10 = vld [vmem:[%s1803_s12 + $0xa0] sm:$0xf0]  ;;  %v1512_v16 = vld [vmem:[%s1803_s12 + $0x13c] sm:$0xf]  ;;  %v1377_v17 = vld [vmem:[%s1803_s12 + $0x144] sm:$0xf0] }
  0x67   : > { %v1380_v20 = vor.u32 %v1512_v16, %v1377_v17  ;;  %v1311_v21 = vld [vmem:[%s1803_s12 + $0xb0] sm:$0xf]  ;;  %v1492_v25 = vld [vmem:[%s1803_s12 + $0x98] sm:$0xf0]  ;;  %v1491_v26 = vld [vmem:[%s1803_s12 + $0x94] sm:$0xf] }
  0x68   : > { %773 = vmatpush.bf16.msra.mxu0 %v1517_v7  ;;  %v1371_v28 = vld [vmem:[%s1803_s12 + $0x128] sm:$0xf]  ;;  %v1511_v29 = vld [vmem:[%s1803_s12 + $0x130] sm:$0xf0]  ;;  %v1494_v38 = vld [vmem:[%s1803_s12 + $0xac] sm:$0xf] }
  0x69   : > { %1538 = vmatpush.bf16.msra.mxu3 %v1517_v7  ;;  %852 = vmatpush.bf16.msra.mxu1 %v1525_v8  ;;  %v1372_v32 = vor.u32 %v1511_v29, %v1371_v28  ;;  %v1323_v33 = vld [vmem:[%s1803_s12 + $0xc8] sm:$0xf]  ;;  %v1495_v37 = vld [vmem:[%s1803_s12 + $0xb0] sm:$0xf0]  ;;  %v1383_v40 = vld [vmem:[%s1803_s12 + $0x140] sm:$0xf] }
  0x6a   : > { %v1514_v41 = vld [vmem:[%s1803_s12 + $0x148] sm:$0xf0]  ;;  %v1315_v50 = vld [vmem:[%s1803_s12 + $0xc0] sm:$0xf]  ;;  %v1504_v28 = vld [vmem:[%s1803_s12 + $0xf8] sm:$0xf0] }
  0x6b   : > { %v1384_v45 = vor.u32 %v1514_v41, %v1383_v40  ;;  %v1503_v29 = vld [vmem:[%s1803_s12 + $0xf4] sm:$0xf] }
  0x6c   : > { %1458 = vmatmul.msk.bf16.gmra.mxu2 %vm725_vm0, %v1240_v11  ;;  %774 = vmatpush.bf16.msra.mxu0 %v1516_v12  ;;  %v1300_v11 = vor.u32 %v1493_v10, %v1299_v9  ;;  %v1329_v9 = vld [vmem:[%s1803_s12 + $0xe4] sm:$0xf0] }
  0x6d   : > { %1539 = vmatpush.bf16.msra.mxu3 %v1516_v12  ;;  %853 = vmatpush.bf16.msra.mxu1 %v1524_v13  ;;  %v1279_v12 = vld [vmem:[%s1803_s12 + $0x78] sm:$0xf] }
  0x70   : > { %775 = vmatpush.bf16.msra.mxu0 %v1515_v14 }
  0x71   : > { %1540 = vmatpush.bf16.msra.mxu3 %v1515_v14  ;;  %854 = vmatpush.bf16.msra.mxu1 %v1523_v15  ;;  %v1488_v14 = vld [vmem:[%s1803_s12 + $0x7c] sm:$0xf] }
  0x73   : > { %776 = vmatmul.bf16.vlgmr.msra.gmra.mxu0 %v1220_v22  ;;  %v1496_v22 = vld [vmem:[%s1803_s12 + $0xb8] sm:$0xf0] }
  0x74   : > { %831 = vmatmul.bf16.vlgmr.msra.gmra.mxu3 %v1352_v23  ;;  %855 = vmatmul.bf16.vlgmr.msra.gmra.mxu1 %v1224_v24  ;;  %v1312_v23 = vor.u32 %v1496_v22, %v1311_v21  ;;  %v1291_v24 = vld [vmem:[%s1803_s12 + $0x90] sm:$0xf] }
  0x75   : > { %1541 = vmatpush.bf16.msrb.mxu3 %v1782_v57  ;;  %v1353_v57 = vld [vmem:[%s1803_s12 + $0x114] sm:$0xf0]  ;;  %v1292_v30 = vor.u32 %v1492_v25, %v1291_v24 }
  0x79   : > { %1542 = vmatpush.bf16.msrb.mxu3 %v1529_v60  ;;  %v1356_v60 = vor.u32 %v1506_v56, %v1353_v57 }
  0x7c   : > { %1459 = vmatmul.msk.bf16.gmra.mxu2 %vm725_vm0, %v1252_v27  ;;  %v1293_v27 = vld [vmem:[%s1803_s12 + $0x9c] sm:$0xf0] }
  0x7d   : > { %1543 = vmatpush.bf16.msrb.mxu3 %v1528_v2  ;;  %v1485_v2 = vld [vmem:[%s1803_s12 + $0x64] sm:$0xf]  ;;  %v1296_v31 = vor.u32 %v1491_v26, %v1293_v27  ;;  %v1339_v27 = vld [vmem:[%s1803_s12 + $0xf0] sm:$0xf] }
  0x7e   : > { %v1272_v7 = vor.u32 %v1485_v2, %v1269_v3 }
  0x81   : > { %1544 = vmatpush.bf16.msrb.mxu3 %v1527_v4  ;;  %v1509_v4 = vld [vmem:[%s1803_s12 + $0x124] sm:$0xf] }
  0x83   : > { %781 = vmatmul.bf16.gmra.mxu0 %v1232_v34  ;;  %v1499_v34 = vld [vmem:[%s1803_s12 + $0xd0] sm:$0xf0] }
  0x84   : > { %836 = vmatmul.bf16.gmra.mxu3 %v1364_v35  ;;  %860 = vmatmul.bf16.gmra.mxu1 %v1236_v36  ;;  %v1324_v35 = vor.u32 %v1499_v34, %v1323_v33  ;;  %v1303_v36 = vld [vmem:[%s1803_s12 + $0xa8] sm:$0xf]  ;;  %v1340_v33 = vor.u32 %v1504_v28, %v1339_v27 }
  0x85   : > { %1545 = vmatpush.bf16.msrb.mxu3 %v1526_v6  ;;  %v1268_v6 = vor.u32 %v1486_v1, %v1267_v0  ;;  %v1304_v43 = vor.u32 %v1495_v37, %v1303_v36 }
  0x89   : > { %1546 = vmatpush.bf16.msrb.mxu3 %v1525_v8  ;;  %v1368_v8 = vor.u32 %v1509_v4, %v1365_v5 }
  0x8c   : > { %1460 = vmatmul.msk.bf16.gmra.mxu2 %vm725_vm0, %v1264_v39  ;;  %v1305_v39 = vld [vmem:[%s1803_s12 + $0xb4] sm:$0xf0] }
  0x8d   : > { %1547 = vmatpush.bf16.msrb.mxu3 %v1524_v13  ;;  %v1489_v13 = vld [vmem:[%s1803_s12 + $0x80] sm:$0xf0]  ;;  %v1308_v44 = vor.u32 %v1494_v38, %v1305_v39 }
  0x8e   : > { %v1280_v18 = vor.u32 %v1489_v13, %v1279_v12 }
  0x91   : > { %1548 = vmatpush.bf16.msrb.mxu3 %v1523_v15  ;;  %v1281_v15 = vld [vmem:[%s1803_s12 + $0x84] sm:$0xf0] }
  0x92   : > { %v1284_v19 = vor.u32 %v1488_v14, %v1281_v15 }
  0x93   : > { %786 = vmatmul.bf16.gmra.mxu0 %v1244_v46  ;;  %v1335_v46 = vld [vmem:[%s1803_s12 + $0xe0] sm:$0xf] }
  0x94   : > { %841 = vmatmul.bf16.gmra.mxu3 %v1376_v47  ;;  %865 = vmatmul.bf16.gmra.mxu1 %v1248_v48  ;;  %v1502_v47 = vld [vmem:[%s1803_s12 + $0xe8] sm:$0xf0] }
  0x95   : > { %1549 = vmatpush.bf16.msra.mxu3 %v1787_v58  ;;  %v1256_v58 = vor.u32 %v1483_v53, %v1255_v52  ;;  %v1336_v49 = vor.u32 %v1502_v47, %v1335_v46  ;;  %v1497_v52 = vld [vmem:[%s1803_s12 + $0xc4] sm:$0xf]  ;;  %v1317_v53 = vld [vmem:[%s1803_s12 + $0xcc] sm:$0xf0] }
  0x96   : > { %v1320_v57 = vor.u32 %v1497_v52, %v1317_v53 }
  0x99   : > { %1550 = vmatpush.bf16.msra.mxu3 %v1801_v61  ;;  %v1287_v61 = vld [vmem:[%s1803_s12 + $0x80] sm:$0xf] }
  0x9a   : > { %v1288_v63 = vor.u32 %v1490_v62, %v1287_v61  ;;  %v1347_v61 = vld [vmem:[%s1803_s12 + $0xf8] sm:$0xf]  ;;  %v1505_v62 = vld [vmem:[%s1803_s12 + $0x100] sm:$0xf0] }
  0x9b   : > { %v1348_v2 = vor.u32 %v1505_v62, %v1347_v61 }
  0x9c   : > { %1461 = vmatmul.msk.bf16.gmra.mxu2 %vm725_vm0, %v1276_v51  ;;  %v1498_v51 = vld [vmem:[%s1803_s12 + $0xc8] sm:$0xf0] }
  0x9d   : > { %v1316_v55 = vor.u32 %v1498_v51, %v1315_v50 }
  0xa3   : > { %791 = vmatmul.bf16.gmra.mxu0 %v1256_v58 }
  0xa4   : > { %870 = vmatmul.bf16.gmra.mxu1 %v1260_v59  ;;  %910 = vmatmul.bf16.vlgmr.msrb.gmra.mxu3 %v1356_v60 }
  0xac   : > { %1462 = vmatmul.msk.bf16.gmra.mxu2 %vm725_vm0, %v1288_v63 }
  0xb3   : > { %796 = vmatmul.bf16.gmra.mxu0 %v1268_v6  ;;  %v1327_v6 = vld [vmem:[%s1803_s12 + $0xd8] sm:$0xf] }
  0xb4   : > { %875 = vmatmul.bf16.gmra.mxu1 %v1272_v7  ;;  %915 = vmatmul.bf16.gmra.mxu3 %v1368_v8  ;;  %v1501_v7 = vld [vmem:[%s1803_s12 + $0xe0] sm:$0xf0]  ;;  %v1500_v8 = vld [vmem:[%s1803_s12 + $0xdc] sm:$0xf] }
  0xb5   : > { %v1328_v12 = vor.u32 %v1501_v7, %v1327_v6  ;;  %v1332_v14 = vor.u32 %v1500_v8, %v1329_v9 }
  0xbc   : > { %1463 = vmatmul.msk.bf16.gmra.mxu2 %vm725_vm0, %v1300_v11 }
  0xc3   : > { %801 = vmatmul.bf16.gmra.mxu0 %v1280_v18  ;;  %v1359_v18 = vld [vmem:[%s1803_s12 + $0x110] sm:$0xf] }
  0xc4   : > { %880 = vmatmul.bf16.gmra.mxu1 %v1284_v19  ;;  %920 = vmatmul.bf16.gmra.mxu3 %v1380_v20  ;;  %v1508_v19 = vld [vmem:[%s1803_s12 + $0x118] sm:$0xf0] }
  0xcc   : > { %1464 = vmatmul.msk.bf16.gmra.mxu2 %vm725_vm0, %v1312_v23  ;;  %v1360_v23 = vor.u32 %v1508_v19, %v1359_v18 }
  0xd3   : > { %806 = vmatmul.bf16.gmra.mxu0 %v1292_v30  ;;  %v1341_v30 = vld [vmem:[%s1803_s12 + $0xfc] sm:$0xf0]  ;;  %s308_s12 = smul.u32 7, %s1154_s15 }
  0xd4   : > { %885 = vmatmul.bf16.gmra.mxu1 %v1296_v31  ;;  %1469 = vmatmul.msk.bf16.vlgmr.msra.gmra.mxu3 %vm725_vm0, %v1372_v32 }
  0xd5   : > { %p309_p8 = scmp.lt.s32.totalorder %s308_s12, 13 }
  0xd7   : > { %s2109_s12 = smov (!%p309_p8, %s308_s12), 13 }
  0xd8   : > { %s1216_s14 = sshll.u32 %s2109_s12, 2 }
  0xd9   : > { %s2035_s26 = scalar_lea.vmem %s2104_s3, %s1216_s14 }
  0xdc   : > { %1465 = vmatmul.msk.bf16.gmra.mxu2 %vm725_vm0, %v1324_v35  ;;  %v1344_v35 = vor.u32 %v1503_v29, %v1341_v30 }
  0xdf   : > { %v935_v42 = vpop.f32.mrf.mxu2 }
  0xe3   : > { %811 = vmatmul.bf16.gmra.mxu0 %v1304_v43 }
  0xe4   : > { %890 = vmatmul.bf16.gmra.mxu1 %v1308_v44  ;;  %1470 = vmatmul.msk.bf16.gmra.mxu3 %vm725_vm0, %v1384_v45 }
  0xe7   : > { %v937_v48 = vpop.f32.mrf.mxu2 }
  0xec   : > { %1466 = vmatmul.msk.bf16.gmra.mxu2 %vm725_vm0, %v1336_v49 }
  0xef   : > { %v940_v54 = vpop.f32.mrf.mxu2 }
  0xf0   : > { %v777_v56 = vpop.f32.mrf.mxu0 }
  0xf1   : > { %v856_v58 = vpop.f32.mrf.mxu1 }
  0xf2   : > { %v857_v59 = vadd.f32 %v856_v58, %v777_v56 }
  0xf3   : > { %816 = vmatmul.bf16.gmra.mxu0 %v1316_v55 }
  0xf4   : > { %v1929_v60 = vadd.f32 %v935_v42, %v857_v59  ;;  %895 = vmatmul.bf16.gmra.mxu1 %v1320_v57 }
  0xf6   : > { %v1961_v58 = vsel %vm1005_vm1, %v1929_v60, -inf }
  0xf7   : > { %v832_v63 = vpop.f32.mrf.mxu3  ;;  %v942_v0 = vpop.f32.mrf.mxu2 }
  0xf8   : > { %v779_v1 = vpop.f32.mrf.mxu0 }
  0xf9   : > { %v858_v3 = vpop.f32.mrf.mxu1 }
  0xfa   : > { %v859_v4 = vadd.f32 %v858_v3, %v779_v1 }
  0xfc   : > { %v1933_v5 = vadd.f32 %v937_v48, %v859_v4  ;;  %1467 = vmatmul.msk.bf16.gmra.mxu2 %vm725_vm0, %v1348_v2 }
  0xfe   : > { %v1969_v6 = vsel %vm1005_vm1, %v1933_v5, -inf }
  0xff   : > { %v834_v10 = vpop.f32.mrf.mxu3  ;;  %v945_v11 = vpop.f32.mrf.mxu2 }
 0x100   : > { %v782_v13 = vpop.f32.mrf.mxu0 }
 0x101   : > { %v861_v15 = vpop.f32.mrf.mxu1 }
 0x102   : > { %v862_v16 = vadd.f32 %v861_v15, %v782_v13 }
 0x103   : > { %821 = vmatmul.bf16.gmra.mxu0 %v1328_v12 }
 0x104   : > { %v1940_v17 = vadd.f32 %v940_v54, %v862_v16  ;;  %900 = vmatmul.bf16.gmra.mxu1 %v1332_v14 }
 0x106   : > { %v1978_v13 = vsel %vm1005_vm1, %v1940_v17, -inf }
 0x107   : > { %v1944_v20 = vpop.f32.mrf.mxu3  ;;  %v947_v21 = vpop.f32.mrf.mxu2 }
 0x108   : > { %v784_v22 = vpop.f32.mrf.mxu0 }
 0x109   : > { %v863_v24 = vpop.f32.mrf.mxu1 }
 0x10a   : > { %v864_v25 = vadd.f32 %v863_v24, %v784_v22 }
 0x10c   : > { %v943_v26 = vadd.f32 %v942_v0, %v864_v25  ;;  %1468 = vmatmul.msk.bf16.gmra.mxu2 %vm725_vm0, %v1360_v23 }
 0x10e   : > { %v1027_v22 = vsel %vm1005_vm1, %v943_v26, -inf }
 0x10f   : > { %v1951_v31 = vpop.f32.mrf.mxu3  ;;  %v950_v32 = vpop.f32.mrf.mxu2 }
 0x110   : > { %v787_v34 = vpop.f32.mrf.mxu0 }
 0x111   : > { %v866_v36 = vpop.f32.mrf.mxu1 }
 0x112   : > { %v867_v37 = vadd.f32 %v866_v36, %v787_v34 }
 0x113   : > { %826 = vmatmul.bf16.gmra.mxu0 %v1340_v33 }
 0x114   : > { %v946_v38 = vadd.f32 %v945_v11, %v867_v37  ;;  %905 = vmatmul.bf16.gmra.mxu1 %v1344_v35 }
 0x117   : > { %v1953_v39 = vpop.f32.mrf.mxu3  ;;  %v952_v40 = vpop.f32.mrf.mxu2 }
 0x118   : > { %v789_v41 = vpop.f32.mrf.mxu0 }
 0x119   : > { %v868_v42 = vpop.f32.mrf.mxu1 }
 0x11a   : > { %v869_v43 = vadd.f32 %v868_v42, %v789_v41 }
 0x11c   : > { %v948_v44 = vadd.f32 %v947_v21, %v869_v43 }
 0x11e   : > { %v1996_v42 = vsel %vm1005_vm1, %v948_v44, -inf }
 0x11f   : > { %v1955_v45 = vpop.f32.mrf.mxu3  ;;  %v955_v46 = vpop.f32.mrf.mxu2 }
 0x120   : > { %v792_v47 = vpop.f32.mrf.mxu0 }
 0x121   : > { %v871_v48 = vpop.f32.mrf.mxu1 }
 0x122   : > { %v872_v49 = vadd.f32 %v871_v48, %v792_v47 }
 0x124   : > { %v951_v50 = vadd.f32 %v950_v32, %v872_v49  ;;  %v1988_v32 = vsel %vm1005_vm1, %v946_v38, -inf }
 0x127   : > { %v911_v51 = vpop.f32.mrf.mxu3  ;;  %v957_v52 = vpop.f32.mrf.mxu2 }
 0x128   : > { %v1957_v53 = vadd.f32 %v911_v51, %v832_v63  ;;  %v794_v54 = vpop.f32.mrf.mxu0 }
 0x129   : > { %v873_v55 = vpop.f32.mrf.mxu1 }
 0x12a   : > { %v874_v56 = vadd.f32 %v873_v55, %v794_v54 }
 0x12c   : > { %v953_v57 = vadd.f32 %v952_v40, %v874_v56 }
 0x12e   : > { %v1007_v59 = vsel %vm1005_vm1, %v953_v57, -inf }
 0x12f   : > { %v1008_v61 = vmax.f32 %v1961_v58, %v1007_v59  ;;  %v913_v62 = vpop.f32.mrf.mxu3  ;;  %v960_v0 = vpop.f32.mrf.mxu2 }
 0x130   : > { %v1965_v1 = vadd.f32 %v913_v62, %v834_v10  ;;  %v797_v2 = vpop.f32.mrf.mxu0 }
 0x131   : > { %v876_v63 = vpop.f32.mrf.mxu1 }
 0x132   : > { %v877_v3 = vadd.f32 %v876_v63, %v797_v2 }
 0x134   : > { %v956_v4 = vadd.f32 %v955_v46, %v877_v3 }
 0x136   : > { %v1972_v7 = vsel %vm1005_vm1, %v956_v4, -inf }
 0x137   : > { %v1015_v60 = vmax.f32 %v1969_v6, %v1972_v7  ;;  %v962_v8 = vpop.f32.mrf.mxu2  ;;  %v916_v29 = vpop.f32.mrf.mxu3 }
 0x138   : > { %v799_v9 = vpop.f32.mrf.mxu0 }
 0x139   : > { %v878_v11 = vpop.f32.mrf.mxu1 }
 0x13a   : > { %v879_v12 = vadd.f32 %v878_v11, %v799_v9 }
 0x13c   : > { %v958_v10 = vadd.f32 %v957_v52, %v879_v12  ;;  %v2006_v52 = vsel %vm1005_vm1, %v951_v50, -inf }
 0x13e   : > { %v1981_v14 = vsel %vm1005_vm1, %v958_v10, -inf }
 0x13f   : > { %v1022_v5 = vmax.f32 %v1978_v13, %v1981_v14  ;;  %v965_v15 = vpop.f32.mrf.mxu2  ;;  %v918_v41 = vpop.f32.mrf.mxu3 }
 0x140   : > { %v802_v16 = vpop.f32.mrf.mxu0 }
 0x141   : > { %v881_v18 = vpop.f32.mrf.mxu1 }
 0x142   : > { %v882_v19 = vadd.f32 %v881_v18, %v802_v16  ;;  %v917_v18 = vadd.f32 %v916_v29, %v1944_v20  ;;  %v919_v29 = vadd.f32 %v918_v41, %v1951_v31 }
 0x144   : > { %v961_v21 = vadd.f32 %v960_v0, %v882_v19 }
 0x146   : > { %v1028_v23 = vsel %vm1005_vm1, %v961_v21, -inf }
 0x147   : > { %v1029_v24 = vmax.f32 %v1027_v22, %v1028_v23  ;;  %v967_v25 = vpop.f32.mrf.mxu2  ;;  %v921_v44 = vpop.f32.mrf.mxu3 }
 0x148   : > { %v804_v27 = vpop.f32.mrf.mxu0 }
 0x149   : > { %v883_v17 = vpop.f32.mrf.mxu1 }
 0x14a   : > { %v884_v28 = vadd.f32 %v883_v17, %v804_v27  ;;  %v2027_v27 = vld [vmem:[%s2103_s2] ss:$0 sm:$0xff] }
 0x14c   : > { %v963_v30 = vadd.f32 %v962_v8, %v884_v28 }
 0x14e   : > { %v1991_v33 = vsel %vm1005_vm1, %v963_v30, -inf }
 0x14f   : > { %v1036_v34 = vmax.f32 %v1988_v32, %v1991_v33  ;;  %v970_v35 = vpop.f32.mrf.mxu2  ;;  %v2018_v3 = vpop.f32.mrf.mxu3 }
 0x150   : > { %v807_v26 = vpop.f32.mrf.mxu0 }
 0x151   : > { %v886_v36 = vpop.f32.mrf.mxu1 }
 0x152   : > { %v887_v37 = vadd.f32 %v886_v36, %v807_v26 }
 0x154   : > { %v966_v40 = vadd.f32 %v965_v15, %v887_v37 }
 0x156   : > { %v1999_v43 = vsel %vm1005_vm1, %v966_v40, -inf }
 0x157   : > { %v1043_v38 = vmax.f32 %v1996_v42, %v1999_v43  ;;  %v2003_v46 = vpop.f32.mrf.mxu2  ;;  %v995_v12 = vpop.f32.mrf.mxu3 }
 0x158   : > { %v809_v47 = vpop.f32.mrf.mxu0 }
 0x159   : > { %v888_v48 = vpop.f32.mrf.mxu1 }
 0x15a   : > { %v889_v49 = vadd.f32 %v888_v48, %v809_v47 }
 0x15c   : > { %v968_v51 = vadd.f32 %v967_v25, %v889_v49 }
 0x15e   : > { %v2009_v54 = vsel %vm1005_vm1, %v968_v51, -inf }
 0x15f   : > { %v1050_v55 = vmax.f32 %v2006_v52, %v2009_v54  ;;  %v2013_v56 = vpop.f32.mrf.mxu2  ;;  %v997_v22 = vpop.f32.mrf.mxu3 }
 0x160   : > { %v812_v57 = vpop.f32.mrf.mxu0  ;;  %v998_v37 = vadd.f32 %v997_v22, %v919_v29 }
 0x161   : > { %v891_v58 = vpop.f32.mrf.mxu1 }
 0x162   : > { %v892_v59 = vadd.f32 %v891_v58, %v812_v57  ;;  %v1039_v57 = vsel %vm1005_vm1, %v998_v37, -inf }
 0x164   : > { %v971_v62 = vadd.f32 %v970_v35, %v892_v59 }
 0x166   : > { %v1009_v0 = vsel %vm1005_vm1, %v971_v62, -inf }
 0x167   : > { %v2016_v2 = vmax.f32 %v1008_v61, %v1009_v0  ;;  %v977_v50 = vpop.f32.mrf.mxu2  ;;  %v996_v61 = vadd.f32 %v995_v12, %v917_v18  ;;  %v1000_v49 = vpop.f32.mrf.mxu3  ;;  %v922_v0 = vadd.f32 %v921_v44, %v1953_v39 }
 0x168   : > { %v814_v63 = vpop.f32.mrf.mxu0 }
 0x169   : > { %v893_v4 = vpop.f32.mrf.mxu1  ;;  %v1032_v28 = vsel %vm1005_vm1, %v996_v61, -inf }
 0x16a   : > { %v894_v47 = vadd.f32 %v893_v4, %v814_v63 }
 0x16f   : > { %v980_v8 = vpop.f32.mrf.mxu2  ;;  %v1002_v61 = vpop.f32.mrf.mxu3 }
 0x170   : > { %v817_v9 = vpop.f32.mrf.mxu0 }
 0x171   : > { %v896_v11 = vpop.f32.mrf.mxu1 }
 0x177   : > { %v982_v10 = vpop.f32.mrf.mxu2 }
 0x178   : > { %v819_v15 = vpop.f32.mrf.mxu0 }
 0x179   : > { %v898_v16 = vpop.f32.mrf.mxu1 }
 0x17a   : > { %v899_v19 = vadd.f32 %v898_v16, %v819_v15 }
 0x17c   : > { %v978_v21 = vadd.f32 %v977_v50, %v899_v19  ;;  %v973_v50 = vadd.f32 %v2003_v46, %v894_v47 }
 0x17e   : > { %v1030_v23 = vsel %vm1005_vm1, %v978_v21, -inf  ;;  %v1016_v33 = vsel %vm1005_vm1, %v973_v50, -inf  ;;  %v924_v21 = vadd.f32 %v2018_v3, %v1955_v45 }
 0x17f   : > { %v1031_v25 = vmax.f32 %v1029_v24, %v1030_v23  ;;  %v985_v17 = vpop.f32.mrf.mxu2 }
 0x180   : > { %v822_v30 = vpop.f32.mrf.mxu0  ;;  %v1003_v23 = vadd.f32 %v1002_v61, %v924_v21 }
 0x181   : > { %v1033_v35 = vmax.f32 %v1031_v25, %v1032_v28  ;;  %v901_v20 = vpop.f32.mrf.mxu1 }
 0x182   : > { %v902_v26 = vadd.f32 %v901_v20, %v822_v30 }
 0x183   : > { %v1062_v36 = vadd.f32 %v2027_v27, %v1033_v35  ;;  %v1053_v35 = vsel %vm1005_vm1, %v1003_v23, -inf }
 0x184   : > { %v981_v40 = vadd.f32 %v980_v8, %v902_v26  ;;  %v1001_v8 = vadd.f32 %v1000_v49, %v922_v0 }
 0x185   : > { %v1069_v24 = vmax.f32 %v1062_v36, 0.0 }
 0x186   : > { %v1037_v48 = vsel %vm1005_vm1, %v981_v40, -inf  ;;  %v1046_v46 = vsel %vm1005_vm1, %v1001_v8, -inf }
 0x187   : > { %v1076_v51 = vpack.c.bf16 %v1069_v24, %v1069_v24  ;;  %v1038_v31 = vmax.f32 %v1036_v34, %v1037_v48  ;;  %v987_v41 = vpop.f32.mrf.mxu2  ;;  %v897_v34 = vadd.f32 %v896_v11, %v817_v9  ;;  %v1017_v9 = vmax.f32 %v1015_v60, %v1016_v33 }
 0x188   : > { %v824_v58 = vpop.f32.mrf.mxu0 }
 0x189   : > { %1084 = vst.msk [vmem:[%s2035_s26 + $0xc] sm:$0xf] %vm1080_vm2, %v1076_v51  ;;  %v1040_v59 = vmax.f32 %v1038_v31, %v1039_v57  ;;  %v903_v62 = vpop.f32.mrf.mxu1  ;;  %v976_v42 = vadd.f32 %v2013_v56, %v897_v34 }
 0x18a   : > { %v904_v63 = vadd.f32 %v903_v62, %v824_v58 }
 0x18b   : > { %v1063_v4 = vadd.f32 %v2027_v27, %v1040_v59  ;;  %v1023_v6 = vsel %vm1005_vm1, %v976_v42, -inf }
 0x18c   : > { %v983_v12 = vadd.f32 %v982_v10, %v904_v63  ;;  %v1024_v36 = vmax.f32 %v1022_v5, %v1023_v6 }
 0x18d   : > { %v1070_v32 = vmax.f32 %v1063_v4, 0.0 }
 0x18e   : > { %v1044_v15 = vsel %vm1005_vm1, %v983_v12, -inf }
 0x18f   : > { %v1077_v16 = vpack.c.bf16 %v1070_v32, %v1070_v32  ;;  %v1045_v18 = vmax.f32 %v1043_v38, %v1044_v15  ;;  %v990_v39 = vpop.f32.mrf.mxu2 }
 0x190   : > { %v991_v44 = vadd.f32 %v990_v39, %v1957_v53  ;;  %v827_v19 = vpop.f32.mrf.mxu0 }
 0x191   : > { %1085 = vst.msk [vmem:[%s2035_s26 + $0x10] sm:$0xf] %vm1080_vm2, %v1077_v16  ;;  %v1047_v10 = vmax.f32 %v1045_v18, %v1046_v46  ;;  %v906_v11 = vpop.f32.mrf.mxu1 }
 0x192   : > { %v1018_v43 = vsel %vm1005_vm1, %v991_v44, -inf  ;;  %v907_v38 = vadd.f32 %v906_v11, %v827_v19 }
 0x193   : > { %v1064_v53 = vadd.f32 %v2027_v27, %v1047_v10  ;;  %v1019_v22 = vmax.f32 %v1017_v9, %v1018_v43 }
 0x194   : > { %v986_v25 = vadd.f32 %v985_v17, %v907_v38 }
 0x195   : > { %v1071_v28 = vmax.f32 %v1064_v53, 0.0  ;;  %v1060_v30 = vadd.f32 %v2027_v27, %v1019_v22 }
 0x196   : > { %v1051_v7 = vsel %vm1005_vm1, %v986_v25, -inf }
 0x197   : > { %v1078_v45 = vpack.c.bf16 %v1071_v28, %v1071_v28  ;;  %v1067_v60 = vmax.f32 %v1060_v30, 0.0  ;;  %v1052_v56 = vmax.f32 %v1050_v55, %v1051_v7  ;;  %v992_v3 = vpop.f32.mrf.mxu2 }
 0x198   : > { %v993_v20 = vadd.f32 %v992_v3, %v1965_v1  ;;  %v829_v17 = vpop.f32.mrf.mxu0 }
 0x199   : > { %1086 = vst.msk [vmem:[%s2035_s26 + $0x14] sm:$0xf] %vm1080_vm2, %v1078_v45  ;;  %v1074_v29 = vpack.c.bf16 %v1067_v60, %v1067_v60  ;;  %v1054_v26 = vmax.f32 %v1052_v56, %v1053_v35  ;;  %v908_v37 = vpop.f32.mrf.mxu1 }
 0x19a   : > { %v1025_v52 = vsel %vm1005_vm1, %v993_v20, -inf  ;;  %v909_v54 = vadd.f32 %v908_v37, %v829_v17 }
 0x19b   : > { %1082 = vst.msk [vmem:[%s2035_s26 + $0x4] sm:$0xf] %vm1080_vm2, %v1074_v29  ;;  %v1065_v1 = vadd.f32 %v2027_v27, %v1054_v26  ;;  %v1026_v55 = vmax.f32 %v1024_v36, %v1025_v52 }
 0x19c   : > { %v988_v40 = vadd.f32 %v987_v41, %v909_v54 }
 0x19d   : > { %v1072_v24 = vmax.f32 %v1065_v1, 0.0  ;;  %v1061_v47 = vadd.f32 %v2027_v27, %v1026_v55 }
 0x19e   : > { %v1011_v48 = vsel %vm1005_vm1, %v988_v40, -inf }
 0x19f   : > { %v1079_v49 = vpack.c.bf16 %v1072_v24, %v1072_v24  ;;  %v1068_v13 = vmax.f32 %v1061_v47, 0.0  ;;  %v1012_v14 = vmax.f32 %v2016_v2, %v1011_v48 }
 0x1a1   : > { %1087 = vst.msk [vmem:[%s2035_s26 + $0x18] sm:$0xf] %vm1080_vm2, %v1079_v49  ;;  %v1075_v5 = vpack.c.bf16 %v1068_v13, %v1068_v13  ;;  %v1059_v51 = vadd.f32 %v2027_v27, %v1012_v14 }
 0x1a3   : > { %1083 = vst.msk [vmem:[%s2035_s26 + $0x8] sm:$0xf] %vm1080_vm2, %v1075_v5  ;;  %v1066_v31 = vmax.f32 %v1059_v51, 0.0 }
 0x1a5   : > { %v1073_v57 = vpack.c.bf16 %v1066_v31, %v1066_v31 }
 0x1a7   : > { %1081 = vst.msk [vmem:[%s2035_s26] sm:$0xf] %vm1080_vm2, %v1073_v57 }
 0x1a8 PF: > { %p10_p9 = scmp.ge.s32.totalorder %s1641_s16, 4   ;;  %s2105_s12 = smov %s1598_s13 }
 0x1a9   : > { %s2106_s13 = smov %s1650_s19  ;;  %s2107_s14 = smov %s1641_s16 }
 0x1aa   :  { %12 = sbr.rel (!%p10_p9) target bundleno = 2 (0x2), region = 99 }

// kernel: cnn_forward.5
= control target key start
LH: loop header
LB: loop body
LE: loop exit
PB: predicated region body
PF: predicated region fallthrough
CT: control target
= control target key end

     0   :  { %vm1693_vm0 = vcmask 523264   ;;  %s3823_s1 = inlined_call_operand.vmem [shape: bf16[3136,128], index: 1, kind: input, shape index: {}]   ;;  %s3824_s0 = inlined_call_operand.vmem [shape: bf16[8,3136], index: 0, kind: input, shape index: {}]   ;;  %s3825_s2 = inlined_call_operand.vmem [shape: f32[1,128], index: 2, kind: input, shape index: {}]   ;;  %s3826_s4 = inlined_call_operand.vmem [shape: f32[1,128], index: 4, kind: input, shape index: {}]   ;;  %s3827_s3 = inlined_call_operand.vmem [shape: bf16[128,128], index: 3, kind: input, shape index: {}]   ;;  %s3828_s5 = inlined_call_operand.vmem [shape: f32[8,128], index: 5, kind: output, shape index: {}]  }
   0x1   :  { %v2934_v0 = vld [vmem:[%s3823_s1 + $0x38] sm:$0xff]  ;;  %v2933_v4 = vld [vmem:[%s3823_s1 + $0x30] sm:$0xff]  ;;  %v2932_v8 = vld [vmem:[%s3823_s1 + $0x28] sm:$0xff] }
   0x2   :  { %v2950_v1 = vld [vmem:[%s3823_s1 + $0xb8] sm:$0xff]  ;;  %1697 = vmatpush.bf16.msra.mxu0 %v2934_v0  ;;  %v2949_v5 = vld [vmem:[%s3823_s1 + $0xb0] sm:$0xff]  ;;  %v2948_v9 = vld [vmem:[%s3823_s1 + $0xa8] sm:$0xff] }
   0x3   :  { %v2958_v2 = vld [vmem:[%s3823_s1 + $0xf8] sm:$0xff]  ;;  %1723 = vmatpush.bf16.msra.mxu2 %v2950_v1  ;;  %v2957_v6 = vld [vmem:[%s3823_s1 + $0xf0] sm:$0xff]  ;;  %v2956_v10 = vld [vmem:[%s3823_s1 + $0xe8] sm:$0xff] }
   0x4   :  { %v2942_v3 = vld [vmem:[%s3823_s1 + $0x78] sm:$0xff]  ;;  %1736 = vmatpush.bf16.msra.mxu3 %v2958_v2  ;;  %v2941_v7 = vld [vmem:[%s3823_s1 + $0x70] sm:$0xff]  ;;  %v2940_v11 = vld [vmem:[%s3823_s1 + $0x68] sm:$0xff] }
   0x5   :  { %1710 = vmatpush.bf16.msra.mxu1 %v2942_v3  ;;  %v2931_v12 = vld [vmem:[%s3823_s1 + $0x20] sm:$0xff]  ;;  %v2930_v16 = vld [vmem:[%s3823_s1 + $0x18] sm:$0xff]  ;;  %v2929_v20 = vld [vmem:[%s3823_s1 + $0x10] sm:$0xff] }
   0x6   :  { %1698 = vmatpush.bf16.msra.mxu0 %v2933_v4  ;;  %v2947_v13 = vld [vmem:[%s3823_s1 + $0xa0] sm:$0xff]  ;;  %v2946_v17 = vld [vmem:[%s3823_s1 + $0x98] sm:$0xff]  ;;  %v2945_v21 = vld [vmem:[%s3823_s1 + $0x90] sm:$0xff] }
   0x7   :  { %1724 = vmatpush.bf16.msra.mxu2 %v2949_v5  ;;  %v2955_v14 = vld [vmem:[%s3823_s1 + $0xe0] sm:$0xff]  ;;  %v2954_v18 = vld [vmem:[%s3823_s1 + $0xd8] sm:$0xff]  ;;  %v2953_v22 = vld [vmem:[%s3823_s1 + $0xd0] sm:$0xff] }
   0x8   :  { %1737 = vmatpush.bf16.msra.mxu3 %v2957_v6  ;;  %v2939_v15 = vld [vmem:[%s3823_s1 + $0x60] sm:$0xff]  ;;  %v2938_v19 = vld [vmem:[%s3823_s1 + $0x58] sm:$0xff]  ;;  %v2937_v23 = vld [vmem:[%s3823_s1 + $0x50] sm:$0xff] }
   0x9   :  { %1711 = vmatpush.bf16.msra.mxu1 %v2941_v7  ;;  %v2928_v24 = vld [vmem:[%s3823_s1 + $0x8] sm:$0xff]  ;;  %v21_v29 = vld [vmem:[%s3824_s0] sm:$0xff]  ;;  %v2966_v35 = vld [vmem:[%s3823_s1 + $0x138] sm:$0xff] }
   0xa   :  { %1699 = vmatpush.bf16.msra.mxu0 %v2932_v8  ;;  %v2944_v25 = vld [vmem:[%s3823_s1 + $0x88] sm:$0xff]  ;;  %v2927_v31 = vld [vmem:[%s3823_s1] sm:$0xff]  ;;  %v443_v33 = vunpack.c.l.b16 %v21_v29  ;;  %v2982_v37 = vld [vmem:[%s3823_s1 + $0x1b8] sm:$0xff]  ;;  %v444_v41 = vunpack.c.h.b16 %v21_v29 }
   0xb   :  { %1725 = vmatpush.bf16.msra.mxu2 %v2948_v9  ;;  %v22_v26 = vld [vmem:[%s3824_s0 + $0x8] sm:$0xff]  ;;  %v2943_v32 = vld [vmem:[%s3823_s1 + $0x80] sm:$0xff]  ;;  %v2990_v38 = vld [vmem:[%s3823_s1 + $0x1f8] sm:$0xff] }
   0xc   :  { %1738 = vmatpush.bf16.msra.mxu3 %v2956_v10  ;;  %v2952_v27 = vld [vmem:[%s3823_s1 + $0xc8] sm:$0xff]  ;;  %v445_v30 = vunpack.c.l.b16 %v22_v26  ;;  %v2951_v34 = vld [vmem:[%s3823_s1 + $0xc0] sm:$0xff]  ;;  %v446_v36 = vunpack.c.h.b16 %v22_v26  ;;  %v2974_v42 = vld [vmem:[%s3823_s1 + $0x178] sm:$0xff]  ;;  %v468_v43 = vpack.c.b16 %v443_v33, %v443_v33  ;;  %v469_v48 = vpack.c.b16 %v444_v41, %v444_v41 }
   0xd   :  { %1712 = vmatpush.bf16.msra.mxu1 %v2940_v11  ;;  %v2936_v28 = vld [vmem:[%s3823_s1 + $0x48] sm:$0xff]  ;;  %v2935_v39 = vld [vmem:[%s3823_s1 + $0x40] sm:$0xff]  ;;  %v2965_v44 = vld [vmem:[%s3823_s1 + $0x130] sm:$0xff] }
   0xe   :  { %1700 = vmatpush.bf16.msra.mxu0 %v2931_v12  ;;  %v470_v40 = vpack.c.b16 %v445_v30, %v445_v30  ;;  %v471_v45 = vpack.c.b16 %v446_v36, %v446_v36  ;;  %v2981_v46 = vld [vmem:[%s3823_s1 + $0x1b0] sm:$0xff]  ;;  %v2964_v50 = vld [vmem:[%s3823_s1 + $0x128] sm:$0xff]  ;;  %v2963_v54 = vld [vmem:[%s3823_s1 + $0x120] sm:$0xff] }
   0xf   :  { %1726 = vmatpush.bf16.msra.mxu2 %v2947_v13  ;;  %v2989_v47 = vld [vmem:[%s3823_s1 + $0x1f0] sm:$0xff]  ;;  %v2980_v51 = vld [vmem:[%s3823_s1 + $0x1a8] sm:$0xff]  ;;  %v2979_v55 = vld [vmem:[%s3823_s1 + $0x1a0] sm:$0xff] }
  0x10   :  { %1739 = vmatpush.bf16.msra.mxu3 %v2955_v14  ;;  %v2973_v49 = vld [vmem:[%s3823_s1 + $0x170] sm:$0xff]  ;;  %v2988_v52 = vld [vmem:[%s3823_s1 + $0x1e8] sm:$0xff]  ;;  %v2987_v56 = vld [vmem:[%s3823_s1 + $0x1e0] sm:$0xff] }
  0x11   :  { %1713 = vmatpush.bf16.msra.mxu1 %v2939_v15  ;;  %v2972_v53 = vld [vmem:[%s3823_s1 + $0x168] sm:$0xff]  ;;  %v2971_v57 = vld [vmem:[%s3823_s1 + $0x160] sm:$0xff]  ;;  %v2962_v58 = vld [vmem:[%s3823_s1 + $0x118] sm:$0xff] }
  0x12   :  { %1701 = vmatpush.bf16.msra.mxu0 %v2930_v16  ;;  %v2978_v59 = vld [vmem:[%s3823_s1 + $0x198] sm:$0xff]  ;;  %v2961_v62 = vld [vmem:[%s3823_s1 + $0x110] sm:$0xff]  ;;  %v2960_v2 = vld [vmem:[%s3823_s1 + $0x108] sm:$0xff] }
  0x13   :  { %1727 = vmatpush.bf16.msra.mxu2 %v2946_v17  ;;  %v2986_v60 = vld [vmem:[%s3823_s1 + $0x1d8] sm:$0xff]  ;;  %v2977_v63 = vld [vmem:[%s3823_s1 + $0x190] sm:$0xff]  ;;  %v2976_v3 = vld [vmem:[%s3823_s1 + $0x188] sm:$0xff] }
  0x14   :  { %1740 = vmatpush.bf16.msra.mxu3 %v2954_v18  ;;  %v2970_v61 = vld [vmem:[%s3823_s1 + $0x158] sm:$0xff]  ;;  %v2985_v0 = vld [vmem:[%s3823_s1 + $0x1d0] sm:$0xff]  ;;  %v2984_v4 = vld [vmem:[%s3823_s1 + $0x1c8] sm:$0xff] }
  0x15   :  { %1714 = vmatpush.bf16.msra.mxu1 %v2938_v19  ;;  %v2969_v1 = vld [vmem:[%s3823_s1 + $0x150] sm:$0xff]  ;;  %v24_v5 = vld [vmem:[%s3824_s0 + $0x18] sm:$0xff]  ;;  %v2968_v7 = vld [vmem:[%s3823_s1 + $0x148] sm:$0xff] }
  0x16   :  { %1702 = vmatpush.bf16.msra.mxu0 %v2929_v20  ;;  %v23_v6 = vld [vmem:[%s3824_s0 + $0x10] sm:$0xff]  ;;  %v2959_v8 = vld [vmem:[%s3823_s1 + $0x100] sm:$0xff]  ;;  %v449_v9 = vunpack.c.l.b16 %v24_v5  ;;  %v450_v13 = vunpack.c.h.b16 %v24_v5  ;;  %v2998_v14 = vld [vmem:[%s3823_s1 + $0x238] sm:$0xff] }
  0x17   :  { %1728 = vmatpush.bf16.msra.mxu2 %v2945_v21  ;;  %v2975_v10 = vld [vmem:[%s3823_s1 + $0x180] sm:$0xff]  ;;  %v447_v12 = vunpack.c.l.b16 %v23_v6  ;;  %v3014_v15 = vld [vmem:[%s3823_s1 + $0x2b8] sm:$0xff]  ;;  %v448_v18 = vunpack.c.h.b16 %v23_v6  ;;  %v3012_v29 = vld [vmem:[%s3823_s1 + $0x2a8] sm:$0xff] }
  0x18   :  { %1741 = vmatpush.bf16.msra.mxu3 %v2953_v22  ;;  %v2983_v11 = vld [vmem:[%s3823_s1 + $0x1c0] sm:$0xff]  ;;  %v3022_v16 = vld [vmem:[%s3823_s1 + $0x2f8] sm:$0xff]  ;;  %v474_v20 = vpack.c.b16 %v449_v9, %v449_v9  ;;  %v475_v22 = vpack.c.b16 %v450_v13, %v450_v13  ;;  %v3020_v30 = vld [vmem:[%s3823_s1 + $0x2e8] sm:$0xff] }
  0x19   :  { %1715 = vmatpush.bf16.msra.mxu1 %v2937_v23  ;;  %v2967_v17 = vld [vmem:[%s3823_s1 + $0x140] sm:$0xff]  ;;  %v3006_v19 = vld [vmem:[%s3823_s1 + $0x278] sm:$0xff]  ;;  %v472_v21 = vpack.c.b16 %v447_v12, %v447_v12  ;;  %v2997_v23 = vld [vmem:[%s3823_s1 + $0x230] sm:$0xff]  ;;  %v473_v26 = vpack.c.b16 %v448_v18, %v448_v18 }
  0x1a   :  { %1703 = vmatpush.bf16.msra.mxu0 %v2928_v24  ;;  %v3013_v24 = vld [vmem:[%s3823_s1 + $0x2b0] sm:$0xff]  ;;  %v3011_v33 = vld [vmem:[%s3823_s1 + $0x2a0] sm:$0xff]  ;;  %v2994_v36 = vld [vmem:[%s3823_s1 + $0x218] sm:$0xff] }
  0x1b   :  { %1729 = vmatpush.bf16.msra.mxu2 %v2944_v25  ;;  %v3021_v25 = vld [vmem:[%s3823_s1 + $0x2f0] sm:$0xff]  ;;  %v3028_v6 = vld [vmem:[%s3823_s1 + $0x328] sm:$0xff]  ;;  %v3051_v12 = vld [vmem:[%s3823_s1 + $0x3e0] sm:$0xff] }
  0x1c   :  { %1742 = vmatpush.bf16.msra.mxu3 %v2952_v27  ;;  %v3005_v27 = vld [vmem:[%s3823_s1 + $0x270] sm:$0xff]  ;;  %v3036_v9 = vld [vmem:[%s3823_s1 + $0x368] sm:$0xff]  ;;  %v3035_v13 = vld [vmem:[%s3823_s1 + $0x360] sm:$0xff] }
  0x1d   :  { %1716 = vmatpush.bf16.msra.mxu1 %v2936_v28  ;;  %v2996_v28 = vld [vmem:[%s3823_s1 + $0x228] sm:$0xff]  ;;  %v3009_v41 = vld [vmem:[%s3823_s1 + $0x290] sm:$0xff] }
  0x1e   :  { %1704 = vmatpush.bf16.msra.mxu0 %v2927_v31  ;;  %v3004_v31 = vld [vmem:[%s3823_s1 + $0x268] sm:$0xff]  ;;  %v3037_v5 = vld [vmem:[%s3823_s1 + $0x370] sm:$0xff] }
  0x1f   :  { %1730 = vmatpush.bf16.msra.mxu2 %v2943_v32  ;;  %v2995_v32 = vld [vmem:[%s3823_s1 + $0x220] sm:$0xff]  ;;  %v3025_v18 = vld [vmem:[%s3823_s1 + $0x310] sm:$0xff] }
  0x20   :  { %1743 = vmatpush.bf16.msra.mxu3 %v2951_v34  ;;  %v3019_v34 = vld [vmem:[%s3823_s1 + $0x2e0] sm:$0xff] }
  0x21   :  { %1717 = vmatpush.bf16.msra.mxu1 %v2935_v39  ;;  %1705 = vmatmul.bf16.vlgmr.msra.gmra.mxu0 %v468_v43  ;;  %v3002_v39 = vld [vmem:[%s3823_s1 + $0x258] sm:$0xff]  ;;  %v3001_v43 = vld [vmem:[%s3823_s1 + $0x250] sm:$0xff] }
  0x22   :  { %1749 = vmatpush.bf16.msrb.mxu0 %v2966_v35  ;;  %1731 = vmatmul.bf16.vlgmr.msra.gmra.mxu2 %v470_v40  ;;  %v3003_v35 = vld [vmem:[%s3823_s1 + $0x260] sm:$0xff]  ;;  %v2993_v40 = vld [vmem:[%s3823_s1 + $0x210] sm:$0xff] }
  0x23   :  { %1775 = vmatpush.bf16.msrb.mxu2 %v2982_v37  ;;  %1744 = vmatmul.bf16.vlgmr.msra.gmra.mxu3 %v471_v45  ;;  %v3010_v37 = vld [vmem:[%s3823_s1 + $0x298] sm:$0xff]  ;;  %v3008_v45 = vld [vmem:[%s3823_s1 + $0x288] sm:$0xff] }
  0x24   :  { %1788 = vmatpush.bf16.msrb.mxu3 %v2990_v38  ;;  %1718 = vmatmul.bf16.vlgmr.msra.gmra.mxu1 %v469_v48  ;;  %v3018_v38 = vld [vmem:[%s3823_s1 + $0x2d8] sm:$0xff]  ;;  %v26_v48 = vld [vmem:[%s3824_s0 + $0x28] sm:$0xff] }
  0x25   :  { %1762 = vmatpush.bf16.msrb.mxu1 %v2974_v42  ;;  %v3017_v42 = vld [vmem:[%s3823_s1 + $0x2d0] sm:$0xff] }
  0x26   :  { %1750 = vmatpush.bf16.msrb.mxu0 %v2965_v44  ;;  %v2992_v44 = vld [vmem:[%s3823_s1 + $0x208] sm:$0xff] }
  0x27   :  { %1776 = vmatpush.bf16.msrb.mxu2 %v2981_v46  ;;  %v25_v46 = vld [vmem:[%s3824_s0 + $0x20] sm:$0xff] }
  0x28   :  { %1789 = vmatpush.bf16.msrb.mxu3 %v2989_v47  ;;  %v3016_v47 = vld [vmem:[%s3823_s1 + $0x2c8] sm:$0xff] }
  0x29   :  { %1763 = vmatpush.bf16.msrb.mxu1 %v2973_v49  ;;  %v3000_v49 = vld [vmem:[%s3823_s1 + $0x248] sm:$0xff] }
  0x2a   :  { %1751 = vmatpush.bf16.msrb.mxu0 %v2964_v50  ;;  %v451_v50 = vunpack.c.l.b16 %v25_v46 }
  0x2b   :  { %1777 = vmatpush.bf16.msrb.mxu2 %v2980_v51  ;;  %v2991_v51 = vld [vmem:[%s3823_s1 + $0x200] sm:$0xff] }
  0x2c   :  { %1790 = vmatpush.bf16.msrb.mxu3 %v2988_v52  ;;  %v3007_v52 = vld [vmem:[%s3823_s1 + $0x280] sm:$0xff] }
  0x2d   :  { %1764 = vmatpush.bf16.msrb.mxu1 %v2972_v53  ;;  %v453_v53 = vunpack.c.l.b16 %v26_v48 }
  0x2e   :  { %1752 = vmatpush.bf16.msrb.mxu0 %v2963_v54  ;;  %v3015_v54 = vld [vmem:[%s3823_s1 + $0x2c0] sm:$0xff] }
  0x2f   :  { %1778 = vmatpush.bf16.msrb.mxu2 %v2979_v55  ;;  %v3030_v55 = vld [vmem:[%s3823_s1 + $0x338] sm:$0xff] }
  0x30   :  { %1791 = vmatpush.bf16.msrb.mxu3 %v2987_v56  ;;  %v454_v56 = vunpack.c.h.b16 %v26_v48  ;;  %v3060_v48 = vld [vmem:[%s3823_s1 + $0x428] sm:$0xff] }
  0x31   :  { %1765 = vmatpush.bf16.msrb.mxu1 %v2971_v57  ;;  %v3046_v57 = vld [vmem:[%s3823_s1 + $0x3b8] sm:$0xff] }
  0x32   :  { %1753 = vmatpush.bf16.msrb.mxu0 %v2962_v58  ;;  %v3054_v58 = vld [vmem:[%s3823_s1 + $0x3f8] sm:$0xff] }
  0x33   :  { %1779 = vmatpush.bf16.msrb.mxu2 %v2978_v59  ;;  %v452_v59 = vunpack.c.h.b16 %v25_v46  ;;  %v3085_v46 = vld [vmem:[%s3823_s1 + $0x4f0] sm:$0xff] }
  0x34   :  { %1792 = vmatpush.bf16.msrb.mxu3 %v2986_v60  ;;  %v2999_v60 = vld [vmem:[%s3823_s1 + $0x240] sm:$0xff] }
  0x35   :  { %1766 = vmatpush.bf16.msrb.mxu1 %v2970_v61  ;;  %v476_v61 = vpack.c.b16 %v451_v50, %v451_v50  ;;  %v3084_v50 = vld [vmem:[%s3823_s1 + $0x4e8] sm:$0xff] }
  0x36   :  { %1754 = vmatpush.bf16.msrb.mxu0 %v2961_v62  ;;  %v478_v62 = vpack.c.b16 %v453_v53, %v453_v53  ;;  %v3075_v53 = vld [vmem:[%s3823_s1 + $0x4a0] sm:$0xff] }
  0x37   :  { %1780 = vmatpush.bf16.msrb.mxu2 %v2977_v63  ;;  %v3038_v63 = vld [vmem:[%s3823_s1 + $0x378] sm:$0xff] }
  0x38   :  { %1793 = vmatpush.bf16.msrb.mxu3 %v2985_v0  ;;  %v479_v0 = vpack.c.b16 %v454_v56, %v454_v56  ;;  %v3058_v56 = vld [vmem:[%s3823_s1 + $0x418] sm:$0xff] }
  0x39   :  { %1767 = vmatpush.bf16.msrb.mxu1 %v2969_v1  ;;  %v3029_v1 = vld [vmem:[%s3823_s1 + $0x330] sm:$0xff] }
  0x3a   :  { %1755 = vmatpush.bf16.msrb.mxu0 %v2960_v2  ;;  %v477_v2 = vpack.c.b16 %v452_v59, %v452_v59  ;;  %v3066_v59 = vld [vmem:[%s3823_s1 + $0x458] sm:$0xff] }
  0x3b   :  { %1781 = vmatpush.bf16.msrb.mxu2 %v2976_v3  ;;  %v3045_v3 = vld [vmem:[%s3823_s1 + $0x3b0] sm:$0xff] }
  0x3c   :  { %1794 = vmatpush.bf16.msrb.mxu3 %v2984_v4  ;;  %v3053_v4 = vld [vmem:[%s3823_s1 + $0x3f0] sm:$0xff] }
  0x3d   :  { %1768 = vmatpush.bf16.msrb.mxu1 %v2968_v7  ;;  %v3044_v7 = vld [vmem:[%s3823_s1 + $0x3a8] sm:$0xff] }
  0x3e   :  { %1756 = vmatpush.bf16.msrb.mxu0 %v2959_v8  ;;  %v3052_v8 = vld [vmem:[%s3823_s1 + $0x3e8] sm:$0xff] }
  0x3f   :  { %1782 = vmatpush.bf16.msrb.mxu2 %v2975_v10  ;;  %v3027_v10 = vld [vmem:[%s3823_s1 + $0x320] sm:$0xff] }
  0x40   :  { %1795 = vmatpush.bf16.msrb.mxu3 %v2983_v11  ;;  %v3043_v11 = vld [vmem:[%s3823_s1 + $0x3a0] sm:$0xff] }
  0x41   :  { %1769 = vmatpush.bf16.msrb.mxu1 %v2967_v17  ;;  %1757 = vmatmul.bf16.vlgmr.msrb.gmra.mxu0 %v472_v21  ;;  %v3034_v17 = vld [vmem:[%s3823_s1 + $0x358] sm:$0xff]  ;;  %v3033_v21 = vld [vmem:[%s3823_s1 + $0x350] sm:$0xff] }
  0x42   :  { %1801 = vmatpush.bf16.msra.mxu0 %v2998_v14  ;;  %1783 = vmatmul.bf16.vlgmr.msrb.gmra.mxu2 %v474_v20  ;;  %v3026_v14 = vld [vmem:[%s3823_s1 + $0x318] sm:$0xff]  ;;  %v3049_v20 = vld [vmem:[%s3823_s1 + $0x3d0] sm:$0xff] }
  0x43   :  { %1827 = vmatpush.bf16.msra.mxu2 %v3014_v15  ;;  %1796 = vmatmul.bf16.vlgmr.msrb.gmra.mxu3 %v475_v22  ;;  %v3042_v15 = vld [vmem:[%s3823_s1 + $0x398] sm:$0xff]  ;;  %v3024_v22 = vld [vmem:[%s3823_s1 + $0x308] sm:$0xff] }
  0x44   :  { %1840 = vmatpush.bf16.msra.mxu3 %v3022_v16  ;;  %1770 = vmatmul.bf16.vlgmr.msrb.gmra.mxu1 %v473_v26  ;;  %v3050_v16 = vld [vmem:[%s3823_s1 + $0x3d8] sm:$0xff]  ;;  %v3048_v26 = vld [vmem:[%s3823_s1 + $0x3c8] sm:$0xff] }
  0x45   :  { %1814 = vmatpush.bf16.msra.mxu1 %v3006_v19  ;;  %v3041_v19 = vld [vmem:[%s3823_s1 + $0x390] sm:$0xff] }
  0x46   :  { %1802 = vmatpush.bf16.msra.mxu0 %v2997_v23  ;;  %v3040_v23 = vld [vmem:[%s3823_s1 + $0x388] sm:$0xff] }
  0x47   :  { %1828 = vmatpush.bf16.msra.mxu2 %v3013_v24  ;;  %v27_v24 = vld [vmem:[%s3824_s0 + $0x30] sm:$0xff] }
  0x48   :  { %1841 = vmatpush.bf16.msra.mxu3 %v3021_v25  ;;  %v28_v25 = vld [vmem:[%s3824_s0 + $0x38] sm:$0xff] }
  0x49   :  { %1815 = vmatpush.bf16.msra.mxu1 %v3005_v27  ;;  %v3032_v27 = vld [vmem:[%s3823_s1 + $0x348] sm:$0xff] }
  0x4a   :  { %1803 = vmatpush.bf16.msra.mxu0 %v2996_v28  ;;  %v3023_v28 = vld [vmem:[%s3823_s1 + $0x300] sm:$0xff] }
  0x4b   :  { %1829 = vmatpush.bf16.msra.mxu2 %v3012_v29  ;;  %v455_v29 = vunpack.c.l.b16 %v27_v24 }
  0x4c   :  { %1842 = vmatpush.bf16.msra.mxu3 %v3020_v30  ;;  %v457_v30 = vunpack.c.l.b16 %v28_v25 }
  0x4d   :  { %1816 = vmatpush.bf16.msra.mxu1 %v3004_v31  ;;  %v3039_v31 = vld [vmem:[%s3823_s1 + $0x380] sm:$0xff] }
  0x4e   :  { %1804 = vmatpush.bf16.msra.mxu0 %v2995_v32  ;;  %v3062_v32 = vld [vmem:[%s3823_s1 + $0x438] sm:$0xff] }
  0x4f   :  { %1830 = vmatpush.bf16.msra.mxu2 %v3011_v33  ;;  %v458_v33 = vunpack.c.h.b16 %v28_v25  ;;  %v3101_v25 = vld [vmem:[%s3823_s1 + $0x570] sm:$0xff] }
  0x50   :  { %1843 = vmatpush.bf16.msra.mxu3 %v3019_v34  ;;  %v3047_v34 = vld [vmem:[%s3823_s1 + $0x3c0] sm:$0xff] }
  0x51   :  { %1817 = vmatpush.bf16.msra.mxu1 %v3003_v35  ;;  %v3078_v35 = vld [vmem:[%s3823_s1 + $0x4b8] sm:$0xff] }
  0x52   :  { %1805 = vmatpush.bf16.msra.mxu0 %v2994_v36  ;;  %v456_v36 = vunpack.c.h.b16 %v27_v24  ;;  %v3117_v24 = vld [vmem:[%s3823_s1 + $0x5f0] sm:$0xff] }
  0x53   :  { %1831 = vmatpush.bf16.msra.mxu2 %v3010_v37  ;;  %v3086_v37 = vld [vmem:[%s3823_s1 + $0x4f8] sm:$0xff] }
  0x54   :  { %1844 = vmatpush.bf16.msra.mxu3 %v3018_v38  ;;  %v3031_v38 = vld [vmem:[%s3823_s1 + $0x340] sm:$0xff] }
  0x55   :  { %1818 = vmatpush.bf16.msra.mxu1 %v3002_v39  ;;  %v480_v39 = vpack.c.b16 %v455_v29, %v455_v29  ;;  %v3131_v29 = vld [vmem:[%s3825_s2] ss:$0 sm:$0xff] }
  0x56   :  { %1806 = vmatpush.bf16.msra.mxu0 %v2993_v40  ;;  %v482_v40 = vpack.c.b16 %v457_v30, %v457_v30  ;;  %v3100_v30 = vld [vmem:[%s3823_s1 + $0x568] sm:$0xff] }
  0x57   :  { %1832 = vmatpush.bf16.msra.mxu2 %v3009_v41  ;;  %v3070_v41 = vld [vmem:[%s3823_s1 + $0x478] sm:$0xff] }
  0x58   :  { %1845 = vmatpush.bf16.msra.mxu3 %v3017_v42  ;;  %v483_v42 = vpack.c.b16 %v458_v33, %v458_v33  ;;  %v3115_v33 = vld [vmem:[%s3823_s1 + $0x5e0] sm:$0xff] }
  0x59   :  { %1819 = vmatpush.bf16.msra.mxu1 %v3001_v43  ;;  %v481_v43 = vpack.c.b16 %v456_v36, %v456_v36  ;;  %v3099_v36 = vld [vmem:[%s3823_s1 + $0x560] sm:$0xff] }
  0x5a   :  { %1807 = vmatpush.bf16.msra.mxu0 %v2992_v44  ;;  %v3061_v44 = vld [vmem:[%s3823_s1 + $0x430] sm:$0xff] }
  0x5b   :  { %1833 = vmatpush.bf16.msra.mxu2 %v3008_v45  ;;  %v3077_v45 = vld [vmem:[%s3823_s1 + $0x4b0] sm:$0xff] }
  0x5c   :  { %1846 = vmatpush.bf16.msra.mxu3 %v3016_v47  ;;  %v3069_v47 = vld [vmem:[%s3823_s1 + $0x470] sm:$0xff] }
  0x5d   :  { %1820 = vmatpush.bf16.msra.mxu1 %v3000_v49  ;;  %v3076_v49 = vld [vmem:[%s3823_s1 + $0x4a8] sm:$0xff] }
  0x5e   :  { %1808 = vmatpush.bf16.msra.mxu0 %v2991_v51  ;;  %v3068_v51 = vld [vmem:[%s3823_s1 + $0x468] sm:$0xff] }
  0x5f   :  { %1834 = vmatpush.bf16.msra.mxu2 %v3007_v52  ;;  %v3059_v52 = vld [vmem:[%s3823_s1 + $0x420] sm:$0xff] }
  0x60   :  { %1847 = vmatpush.bf16.msra.mxu3 %v3015_v54  ;;  %v3083_v54 = vld [vmem:[%s3823_s1 + $0x4e0] sm:$0xff] }
  0x61   :  { %1821 = vmatpush.bf16.msra.mxu1 %v2999_v60  ;;  %1809 = vmatmul.bf16.vlgmr.msra.gmra.mxu0 %v476_v61  ;;  %v3057_v60 = vld [vmem:[%s3823_s1 + $0x410] sm:$0xff] }
  0x62   :  { %1853 = vmatpush.bf16.msrb.mxu0 %v3030_v55  ;;  %1835 = vmatmul.bf16.vlgmr.msra.gmra.mxu2 %v478_v62  ;;  %v3067_v55 = vld [vmem:[%s3823_s1 + $0x460] sm:$0xff]  ;;  %v3073_v61 = vld [vmem:[%s3823_s1 + $0x490] sm:$0xff] }
  0x63   :  { %1879 = vmatpush.bf16.msrb.mxu2 %v3046_v57  ;;  %1848 = vmatmul.bf16.vlgmr.msra.gmra.mxu3 %v479_v0  ;;  %v3074_v57 = vld [vmem:[%s3823_s1 + $0x498] sm:$0xff]  ;;  %v3081_v62 = vld [vmem:[%s3823_s1 + $0x4d0] sm:$0xff]  ;;  %v3056_v0 = vld [vmem:[%s3823_s1 + $0x408] sm:$0xff] }
  0x64   :  { %1892 = vmatpush.bf16.msrb.mxu3 %v3054_v58  ;;  %1822 = vmatmul.bf16.vlgmr.msra.gmra.mxu1 %v477_v2  ;;  %v3082_v58 = vld [vmem:[%s3823_s1 + $0x4d8] sm:$0xff]  ;;  %v3080_v2 = vld [vmem:[%s3823_s1 + $0x4c8] sm:$0xff] }
  0x65   :  { %1866 = vmatpush.bf16.msrb.mxu1 %v3038_v63  ;;  %v3065_v63 = vld [vmem:[%s3823_s1 + $0x450] sm:$0xff] }
  0x66   :  { %1854 = vmatpush.bf16.msrb.mxu0 %v3029_v1  ;;  %v3072_v1 = vld [vmem:[%s3823_s1 + $0x488] sm:$0xff] }
  0x67   :  { %1880 = vmatpush.bf16.msrb.mxu2 %v3045_v3  ;;  %v29_v3 = vld [vmem:[%s3824_s0 + $0x40] sm:$0xff] }
  0x68   :  { %1893 = vmatpush.bf16.msrb.mxu3 %v3053_v4  ;;  %v30_v4 = vld [vmem:[%s3824_s0 + $0x48] sm:$0xff] }
  0x69   :  { %1867 = vmatpush.bf16.msrb.mxu1 %v3037_v5  ;;  %v3064_v5 = vld [vmem:[%s3823_s1 + $0x448] sm:$0xff] }
  0x6a   :  { %1855 = vmatpush.bf16.msrb.mxu0 %v3028_v6  ;;  %v3055_v6 = vld [vmem:[%s3823_s1 + $0x400] sm:$0xff] }
  0x6b   :  { %1881 = vmatpush.bf16.msrb.mxu2 %v3044_v7  ;;  %v459_v7 = vunpack.c.l.b16 %v29_v3 }
  0x6c   :  { %1894 = vmatpush.bf16.msrb.mxu3 %v3052_v8  ;;  %v461_v8 = vunpack.c.l.b16 %v30_v4 }
  0x6d   :  { %1868 = vmatpush.bf16.msrb.mxu1 %v3036_v9  ;;  %v3071_v9 = vld [vmem:[%s3823_s1 + $0x480] sm:$0xff] }
  0x6e   :  { %1856 = vmatpush.bf16.msrb.mxu0 %v3027_v10  ;;  %v3079_v10 = vld [vmem:[%s3823_s1 + $0x4c0] sm:$0xff] }
  0x6f   :  { %1882 = vmatpush.bf16.msrb.mxu2 %v3043_v11  ;;  %v462_v11 = vunpack.c.h.b16 %v30_v4 }
  0x70   :  { %1895 = vmatpush.bf16.msrb.mxu3 %v3051_v12  ;;  %v3094_v12 = vld [vmem:[%s3823_s1 + $0x538] sm:$0xff] }
  0x71   :  { %1869 = vmatpush.bf16.msrb.mxu1 %v3035_v13  ;;  %v3110_v13 = vld [vmem:[%s3823_s1 + $0x5b8] sm:$0xff] }
  0x72   :  { %1857 = vmatpush.bf16.msrb.mxu0 %v3026_v14  ;;  %v460_v14 = vunpack.c.h.b16 %v29_v3  ;;  %v3122_v3 = vld [vmem:[%s3823_s1 + $0x618] sm:$0xff] }
  0x73   :  { %1883 = vmatpush.bf16.msrb.mxu2 %v3042_v15  ;;  %v3118_v15 = vld [vmem:[%s3823_s1 + $0x5f8] sm:$0xff] }
  0x74   :  { %1896 = vmatpush.bf16.msrb.mxu3 %v3050_v16  ;;  %v3063_v16 = vld [vmem:[%s3823_s1 + $0x440] sm:$0xff] }
  0x75   :  { %1870 = vmatpush.bf16.msrb.mxu1 %v3034_v17  ;;  %v484_v17 = vpack.c.b16 %v459_v7, %v459_v7 }
  0x76   :  { %1858 = vmatpush.bf16.msrb.mxu0 %v3025_v18  ;;  %v486_v18 = vpack.c.b16 %v461_v8, %v461_v8 }
  0x77   :  { %1884 = vmatpush.bf16.msrb.mxu2 %v3041_v19  ;;  %v3102_v19 = vld [vmem:[%s3823_s1 + $0x578] sm:$0xff] }
  0x78   :  { %1897 = vmatpush.bf16.msrb.mxu3 %v3049_v20  ;;  %v487_v20 = vpack.c.b16 %v462_v11, %v462_v11  ;;  %v3120_v11 = vld [vmem:[%s3823_s1 + $0x608] sm:$0xff] }
  0x79   :  { %1871 = vmatpush.bf16.msrb.mxu1 %v3033_v21  ;;  %v485_v21 = vpack.c.b16 %v460_v14, %v460_v14 }
  0x7a   :  { %1859 = vmatpush.bf16.msrb.mxu0 %v3024_v22  ;;  %v3093_v22 = vld [vmem:[%s3823_s1 + $0x530] sm:$0xff] }
  0x7b   :  { %1885 = vmatpush.bf16.msrb.mxu2 %v3040_v23  ;;  %v3109_v23 = vld [vmem:[%s3823_s1 + $0x5b0] sm:$0xff] }
  0x7c   :  { %1898 = vmatpush.bf16.msrb.mxu3 %v3048_v26  ;;  %v3092_v26 = vld [vmem:[%s3823_s1 + $0x528] sm:$0xff] }
  0x7d   :  { %1872 = vmatpush.bf16.msrb.mxu1 %v3032_v27  ;;  %v3108_v27 = vld [vmem:[%s3823_s1 + $0x5a8] sm:$0xff] }
  0x7e   :  { %1860 = vmatpush.bf16.msrb.mxu0 %v3023_v28  ;;  %v3116_v28 = vld [vmem:[%s3823_s1 + $0x5e8] sm:$0xff] }
  0x7f   :  { %1886 = vmatpush.bf16.msrb.mxu2 %v3039_v31  ;;  %v3091_v31 = vld [vmem:[%s3823_s1 + $0x520] sm:$0xff] }
  0x80   :  { %1899 = vmatpush.bf16.msrb.mxu3 %v3047_v34 }
  0x81   :  { %1873 = vmatpush.bf16.msrb.mxu1 %v3031_v38  ;;  %1861 = vmatmul.bf16.vlgmr.msrb.gmra.mxu0 %v480_v39  ;;  %v3106_v39 = vld [vmem:[%s3823_s1 + $0x598] sm:$0xff] }
  0x82   :  { %1905 = vmatpush.bf16.msra.mxu0 %v3062_v32  ;;  %1887 = vmatmul.bf16.vlgmr.msrb.gmra.mxu2 %v482_v40  ;;  %v3107_v32 = vld [vmem:[%s3823_s1 + $0x5a0] sm:$0xff]  ;;  %v3114_v40 = vld [vmem:[%s3823_s1 + $0x5d8] sm:$0xff] }
  0x83   :  { %1931 = vmatpush.bf16.msra.mxu2 %v3078_v35  ;;  %1900 = vmatmul.bf16.vlgmr.msrb.gmra.mxu3 %v483_v42 }
  0x84   :  { %1944 = vmatpush.bf16.msra.mxu3 %v3086_v37  ;;  %1874 = vmatmul.bf16.vlgmr.msrb.gmra.mxu1 %v481_v43  ;;  %v3090_v37 = vld [vmem:[%s3823_s1 + $0x518] sm:$0xff] }
  0x85   :  { %1918 = vmatpush.bf16.msra.mxu1 %v3070_v41  ;;  %v3098_v43 = vld [vmem:[%s3823_s1 + $0x558] sm:$0xff] }
  0x86   :  { %1906 = vmatpush.bf16.msra.mxu0 %v3061_v44 }
  0x87   :  { %1932 = vmatpush.bf16.msra.mxu2 %v3077_v45  ;;  %v3089_v45 = vld [vmem:[%s3823_s1 + $0x510] sm:$0xff] }
  0x88   :  { %1945 = vmatpush.bf16.msra.mxu3 %v3085_v46 }
  0x89   :  { %1919 = vmatpush.bf16.msra.mxu1 %v3069_v47  ;;  %v3105_v47 = vld [vmem:[%s3823_s1 + $0x590] sm:$0xff] }
  0x8a   :  { %1907 = vmatpush.bf16.msra.mxu0 %v3060_v48  ;;  %v3113_v48 = vld [vmem:[%s3823_s1 + $0x5d0] sm:$0xff] }
  0x8b   :  { %1933 = vmatpush.bf16.msra.mxu2 %v3076_v49 }
  0x8c   :  { %1946 = vmatpush.bf16.msra.mxu3 %v3084_v50 }
  0x8d   :  { %1920 = vmatpush.bf16.msra.mxu1 %v3068_v51  ;;  %v3097_v51 = vld [vmem:[%s3823_s1 + $0x550] sm:$0xff] }
  0x8e   :  { %1908 = vmatpush.bf16.msra.mxu0 %v3059_v52  ;;  %v3088_v52 = vld [vmem:[%s3823_s1 + $0x508] sm:$0xff] }
  0x8f   :  { %1934 = vmatpush.bf16.msra.mxu2 %v3075_v53  ;;  %v31_v53 = vld [vmem:[%s3824_s0 + $0x50] sm:$0xff] }
  0x90   :  { %1947 = vmatpush.bf16.msra.mxu3 %v3083_v54  ;;  %v464_v4 = vunpack.c.h.b16 %v31_v53 }
  0x91   :  { %1921 = vmatpush.bf16.msra.mxu1 %v3067_v55  ;;  %v3104_v55 = vld [vmem:[%s3823_s1 + $0x588] sm:$0xff] }
  0x92   :  { %1909 = vmatpush.bf16.msra.mxu0 %v3058_v56  ;;  %v3112_v56 = vld [vmem:[%s3823_s1 + $0x5c8] sm:$0xff] }
  0x93   :  { %1935 = vmatpush.bf16.msra.mxu2 %v3074_v57  ;;  %v32_v57 = vld [vmem:[%s3824_s0 + $0x58] sm:$0xff] }
  0x94   :  { %1948 = vmatpush.bf16.msra.mxu3 %v3082_v58 }
  0x95   :  { %1922 = vmatpush.bf16.msra.mxu1 %v3066_v59  ;;  %v3096_v59 = vld [vmem:[%s3823_s1 + $0x548] sm:$0xff] }
  0x96   :  { %1910 = vmatpush.bf16.msra.mxu0 %v3057_v60  ;;  %v463_v60 = vunpack.c.l.b16 %v31_v53 }
  0x97   :  { %1936 = vmatpush.bf16.msra.mxu2 %v3073_v61  ;;  %v3087_v61 = vld [vmem:[%s3823_s1 + $0x500] sm:$0xff] }
  0x98   :  { %1949 = vmatpush.bf16.msra.mxu3 %v3081_v62  ;;  %v465_v62 = vunpack.c.l.b16 %v32_v57 }
  0x99   :  { %1923 = vmatpush.bf16.msra.mxu1 %v3065_v63  ;;  %v466_v63 = vunpack.c.h.b16 %v32_v57 }
  0x9a   :  { %1911 = vmatpush.bf16.msra.mxu0 %v3056_v0  ;;  %v490_v7 = vpack.c.b16 %v465_v62, %v465_v62 }
  0x9b   :  { %1937 = vmatpush.bf16.msra.mxu2 %v3072_v1  ;;  %v3103_v1 = vld [vmem:[%s3823_s1 + $0x580] sm:$0xff]  ;;  %v491_v8 = vpack.c.b16 %v466_v63, %v466_v63 }
  0x9c   :  { %1950 = vmatpush.bf16.msra.mxu3 %v3080_v2  ;;  %v3111_v2 = vld [vmem:[%s3823_s1 + $0x5c0] sm:$0xff] }
  0x9d   :  { %1924 = vmatpush.bf16.msra.mxu1 %v3064_v5  ;;  %v3095_v5 = vld [vmem:[%s3823_s1 + $0x540] sm:$0xff] }
  0x9e   :  { %1912 = vmatpush.bf16.msra.mxu0 %v3055_v6  ;;  %v1706_v34 = vpop.f32.mrf.mxu0  ;;  %v488_v6 = vpack.c.b16 %v463_v60, %v463_v60 }
  0x9f   :  { %1938 = vmatpush.bf16.msra.mxu2 %v3071_v9  ;;  %v1707_v35 = vadd.f32 %v3131_v29, %v1706_v34  ;;  %v489_v9 = vpack.c.b16 %v464_v4, %v464_v4 }
  0xa0   :  { %1951 = vmatpush.bf16.msra.mxu3 %v3079_v10  ;;  %v3121_v10 = vld [vmem:[%s3823_s1 + $0x610] sm:$0xff] }
  0xa1   :  { %1925 = vmatpush.bf16.msra.mxu1 %v3063_v16  ;;  %1913 = vmatmul.bf16.vlgmr.msra.gmra.mxu0 %v484_v17  ;;  %v1719_v38 = vpop.f32.mrf.mxu1 }
  0xa2   :  { %1957 = vmatpush.bf16.msrb.mxu0 %v3094_v12  ;;  %1939 = vmatmul.bf16.vlgmr.msra.gmra.mxu2 %v486_v18  ;;  %v1720_v41 = vadd.f32 %v1719_v38, %v1707_v35  ;;  %v33_v12 = vld [vmem:[%s3824_s0 + $0x60] sm:$0xf] }
  0xa3   :  { %1983 = vmatpush.bf16.msrb.mxu2 %v3110_v13  ;;  %1952 = vmatmul.bf16.vlgmr.msra.gmra.mxu3 %v487_v20  ;;  %v3119_v13 = vld [vmem:[%s3823_s1 + $0x600] sm:$0xff] }
  0xa4   :  { %1996 = vmatpush.bf16.msrb.mxu3 %v3118_v15  ;;  %1926 = vmatmul.bf16.vlgmr.msra.gmra.mxu1 %v485_v21  ;;  %v467_v15 = vunpack.c.l.b16 %v33_v12 }
  0xa5   :  { %1970 = vmatpush.bf16.msrb.mxu1 %v3102_v19  ;;  %v1732_v42 = vpop.f32.mrf.mxu2 }
  0xa6   :  { %1958 = vmatpush.bf16.msrb.mxu0 %v3093_v22  ;;  %v1733_v44 = vadd.f32 %v1732_v42, %v1720_v41  ;;  %v1745_v46 = vpop.f32.mrf.mxu3  ;;  %v1708_v50 = vpop.f32.mrf.mxu0  ;;  %v492_v19 = vpack.c.b16 %v467_v15, %v467_v15 }
  0xa7   :  { %1984 = vmatpush.bf16.msrb.mxu2 %v3109_v23  ;;  %v3128_v50 = vld [vmem:[%s3827_s3 + $0x28] sm:$0xff] }
  0xa8   :  { %1997 = vmatpush.bf16.msrb.mxu3 %v3117_v24  ;;  %v1746_v49 = vadd.f32 %v1745_v46, %v1733_v44  ;;  %v3130_v44 = vld [vmem:[%s3827_s3 + $0x38] sm:$0xff] }
  0xa9   :  { %1971 = vmatpush.bf16.msrb.mxu1 %v3101_v25  ;;  %v1721_v54 = vpop.f32.mrf.mxu1 }
  0xaa   :  { %1959 = vmatpush.bf16.msrb.mxu0 %v3092_v26  ;;  %v3126_v54 = vld [vmem:[%s3827_s3 + $0x18] sm:$0xff] }
  0xab   :  { %1985 = vmatpush.bf16.msrb.mxu2 %v3108_v27 }
  0xac   :  { %1998 = vmatpush.bf16.msrb.mxu3 %v3116_v28 }
  0xad   :  { %1972 = vmatpush.bf16.msrb.mxu1 %v3100_v30  ;;  %v1734_v58 = vpop.f32.mrf.mxu2 }
  0xae   :  { %1960 = vmatpush.bf16.msrb.mxu0 %v3091_v31  ;;  %v1747_v0 = vpop.f32.mrf.mxu3  ;;  %v3125_v58 = vld [vmem:[%s3827_s3 + $0x10] sm:$0xff] }
  0xaf   :  { %1986 = vmatpush.bf16.msrb.mxu2 %v3107_v32 }
  0xb0   :  { %1999 = vmatpush.bf16.msrb.mxu3 %v3115_v33 }
  0xb1   :  { %1973 = vmatpush.bf16.msrb.mxu1 %v3099_v36 }
  0xb2   :  { %1961 = vmatpush.bf16.msrb.mxu0 %v3090_v37 }
  0xb3   :  { %1987 = vmatpush.bf16.msrb.mxu2 %v3106_v39 }
  0xb4   :  { %2000 = vmatpush.bf16.msrb.mxu3 %v3114_v40 }
  0xb5   :  { %1974 = vmatpush.bf16.msrb.mxu1 %v3098_v43 }
  0xb6   :  { %1962 = vmatpush.bf16.msrb.mxu0 %v3089_v45 }
  0xb7   :  { %1988 = vmatpush.bf16.msrb.mxu2 %v3105_v47  ;;  %v3129_v47 = vld [vmem:[%s3827_s3 + $0x30] sm:$0xff] }
  0xb8   :  { %2001 = vmatpush.bf16.msrb.mxu3 %v3113_v48 }
  0xb9   :  { %1975 = vmatpush.bf16.msrb.mxu1 %v3097_v51 }
  0xba   :  { %1963 = vmatpush.bf16.msrb.mxu0 %v3088_v52  ;;  %v3127_v52 = vld [vmem:[%s3827_s3 + $0x20] sm:$0xff] }
  0xbb   :  { %1989 = vmatpush.bf16.msrb.mxu2 %v3104_v55 }
  0xbc   :  { %2002 = vmatpush.bf16.msrb.mxu3 %v3112_v56 }
  0xbd   :  { %1976 = vmatpush.bf16.msrb.mxu1 %v3096_v59 }
  0xbe   :  { %1964 = vmatpush.bf16.msrb.mxu0 %v3087_v61  ;;  %v1758_v14 = vpop.f32.mrf.mxu0  ;;  %v3124_v61 = vld [vmem:[%s3827_s3 + $0x8] sm:$0xff] }
  0xbf   :  { %1990 = vmatpush.bf16.msrb.mxu2 %v3103_v1  ;;  %v1759_v16 = vadd.f32 %v1758_v14, %v1746_v49 }
  0xc0   :  { %2003 = vmatpush.bf16.msrb.mxu3 %v3111_v2  ;;  %v3123_v2 = vld [vmem:[%s3827_s3] sm:$0xff] }
  0xc1   :  { %1977 = vmatpush.bf16.msrb.mxu1 %v3095_v5  ;;  %1965 = vmatmul.bf16.vlgmr.msrb.gmra.mxu0 %v488_v6  ;;  %v1771_v17 = vpop.f32.mrf.mxu1 }
  0xc2   :  { %2013 = vmatpush.bf16.msra.mxu0 %v3122_v3  ;;  %1991 = vmatmul.bf16.vlgmr.msrb.gmra.mxu2 %v490_v7  ;;  %v1772_v18 = vadd.f32 %v1771_v17, %v1759_v16 }
  0xc3   :  { %2004 = vmatmul.bf16.vlgmr.msrb.gmra.mxu3 %v491_v8 }
  0xc4   :  { %1978 = vmatmul.bf16.vlgmr.msrb.gmra.mxu1 %v489_v9 }
  0xc5   :  { %v1784_v20 = vpop.f32.mrf.mxu2  ;;  %2092 = vmatpush.bf16.msra.mxu1 %v3130_v44 }
  0xc6   :  { %2014 = vmatpush.bf16.msra.mxu0 %v3121_v10  ;;  %v1785_v21 = vadd.f32 %v1784_v20, %v1772_v18  ;;  %v1797_v22 = vpop.f32.mrf.mxu3  ;;  %v1760_v24 = vpop.f32.mrf.mxu0 }
  0xc8   :  { %v1798_v23 = vadd.f32 %v1797_v22, %v1785_v21 }
  0xc9   :  { %v1773_v25 = vpop.f32.mrf.mxu1  ;;  %2093 = vmatpush.bf16.msra.mxu1 %v3129_v47 }
  0xca   :  { %2015 = vmatpush.bf16.msra.mxu0 %v3120_v11  ;;  %v3132_v25 = vld [vmem:[%s3826_s4] ss:$0 sm:$0xff] }
  0xcd   :  { %v1786_v26 = vpop.f32.mrf.mxu2  ;;  %2094 = vmatpush.bf16.msra.mxu1 %v3128_v50 }
  0xce   :  { %2016 = vmatpush.bf16.msra.mxu0 %v3119_v13  ;;  %v1799_v27 = vpop.f32.mrf.mxu3 }
  0xd1   :  { %2894 = vmatmul.msk.bf16.vlgmr.msra.gmra.mxu0 %vm1693_vm0, %v492_v19  ;;  %2095 = vmatpush.bf16.msra.mxu1 %v3127_v52 }
  0xd5   :  { %2096 = vmatpush.bf16.msra.mxu1 %v3126_v54 }
  0xd9   :  { %2097 = vmatpush.bf16.msra.mxu1 %v3125_v58 }
  0xdd   :  { %2098 = vmatpush.bf16.msra.mxu1 %v3124_v61 }
  0xde   :  { %v1810_v28 = vpop.f32.mrf.mxu0 }
  0xdf   :  { %v1811_v29 = vadd.f32 %v1810_v28, %v1798_v23 }
  0xe1   :  { %v1823_v30 = vpop.f32.mrf.mxu1  ;;  %2099 = vmatpush.bf16.msra.mxu1 %v3123_v2 }
  0xe2   :  { %v1824_v31 = vadd.f32 %v1823_v30, %v1811_v29 }
  0xe5   :  { %v1836_v32 = vpop.f32.mrf.mxu2 }
  0xe6   :  { %v1837_v33 = vadd.f32 %v1836_v32, %v1824_v31  ;;  %v1849_v34 = vpop.f32.mrf.mxu3  ;;  %v1812_v35 = vpop.f32.mrf.mxu0 }
  0xe8   :  { %v1850_v36 = vadd.f32 %v1849_v34, %v1837_v33 }
  0xe9   :  { %v1825_v37 = vpop.f32.mrf.mxu1 }
  0xed   :  { %v1838_v38 = vpop.f32.mrf.mxu2 }
  0xee   :  { %v1851_v39 = vpop.f32.mrf.mxu3 }
  0xfe   :  { %v1862_v40 = vpop.f32.mrf.mxu0 }
  0xff   :  { %v1863_v59 = vadd.f32 %v1862_v40, %v1850_v36 }
 0x101   :  { %v1875_v41 = vpop.f32.mrf.mxu1 }
 0x102   :  { %v1876_v62 = vadd.f32 %v1875_v41, %v1863_v59 }
 0x105   :  { %v1888_v42 = vpop.f32.mrf.mxu2 }
 0x106   :  { %v1901_v43 = vpop.f32.mrf.mxu3  ;;  %v1864_v45 = vpop.f32.mrf.mxu0  ;;  %v1889_v1 = vadd.f32 %v1888_v42, %v1876_v62 }
 0x108   :  { %v1902_v3 = vadd.f32 %v1901_v43, %v1889_v1 }
 0x109   :  { %v1877_v46 = vpop.f32.mrf.mxu1 }
 0x10d   :  { %v1890_v48 = vpop.f32.mrf.mxu2 }
 0x10e   :  { %v1903_v49 = vpop.f32.mrf.mxu3 }
 0x11e   :  { %v1914_v51 = vpop.f32.mrf.mxu0 }
 0x11f   :  { %v1915_v4 = vadd.f32 %v1914_v51, %v1902_v3 }
 0x121   :  { %v1927_v53 = vpop.f32.mrf.mxu1 }
 0x122   :  { %v1928_v5 = vadd.f32 %v1927_v53, %v1915_v4 }
 0x125   :  { %v1940_v55 = vpop.f32.mrf.mxu2 }
 0x126   :  { %v1953_v56 = vpop.f32.mrf.mxu3  ;;  %v1916_v57 = vpop.f32.mrf.mxu0  ;;  %v1941_v6 = vadd.f32 %v1940_v55, %v1928_v5 }
 0x128   :  { %v1954_v8 = vadd.f32 %v1953_v56, %v1941_v6 }
 0x129   :  { %v1929_v60 = vpop.f32.mrf.mxu1 }
 0x12d   :  { %v1942_v63 = vpop.f32.mrf.mxu2 }
 0x12e   :  { %v1955_v0 = vpop.f32.mrf.mxu3 }
 0x13e   :  { %v1966_v7 = vpop.f32.mrf.mxu0 }
 0x13f   :  { %v1967_v10 = vadd.f32 %v1966_v7, %v1954_v8 }
 0x141   :  { %v1979_v9 = vpop.f32.mrf.mxu1 }
 0x142   :  { %v1980_v14 = vadd.f32 %v1979_v9, %v1967_v10 }
 0x145   :  { %v1992_v11 = vpop.f32.mrf.mxu2 }
 0x146   :  { %v2005_v12 = vpop.f32.mrf.mxu3  ;;  %v1968_v13 = vpop.f32.mrf.mxu0  ;;  %v1993_v15 = vadd.f32 %v1992_v11, %v1980_v14 }
 0x148   :  { %v2006_v17 = vadd.f32 %v2005_v12, %v1993_v15 }
 0x149   :  { %v1981_v16 = vpop.f32.mrf.mxu1 }
 0x14d   :  { %v1994_v18 = vpop.f32.mrf.mxu2 }
 0x14e   :  { %v2007_v19 = vpop.f32.mrf.mxu3  ;;  %v2018_v20 = vpop.f32.mrf.mxu0 }
 0x14f   :  { %v2019_v21 = vadd.f32 %v2018_v20, %v2006_v17 }
 0x151   :  { %v2022_v22 = vmax.f32 %v2019_v21, 0.0 }
 0x153   :  { %v2023_v23 = vpack.c.bf16 %v2022_v22, %v2022_v22 }
 0x155   :  { %2100 = vmatmul.bf16.vlgmr.msra.gmra.mxu1 %v2023_v23 }
 0x156   :  { %v2020_v24 = vpop.f32.mrf.mxu0 }
 0x1d2   :  { %v2101_v26 = vpop.f32.mrf.mxu1 }
 0x1d3   :  { %v2102_v27 = vadd.f32 %v3132_v25, %v2101_v26 }
 0x1d5   :  { %2105 = vst [vmem:[%s3828_s5] sm:$0xff] %v2102_v27 }
 0x1da   :  { %v2103_v28 = vpop.f32.mrf.mxu1 }

</bundles_post_ra>
